<compile_context>
chip_gen: v7x
topology: tpu7x:2x2x1
jax: 0.10.0
libtpu: 0.0.40
codegen_flags: <defaults>
</compile_context>

<pallas_src>
import functools

import jax
import jax.numpy as jnp
import numpy as np
from jax import lax
from jax.experimental import pallas as pl
from jax.experimental.pallas import tpu as pltpu

_FAR = 3.0e38            # plain Python float -> stays a jaxpr literal
_MIB = 1024 * 1024


def _round_up(x, m):
    return ((x + m - 1) // m) * m


def _vmem_capacity_bytes():
    try:
        return int(pltpu.get_tpu_info().vmem_capacity_bytes)
    except Exception:
        return 64 * _MIB                      # conservative (v7x-sized) fallback


def _vmem_budget_bytes():
    cap = _vmem_capacity_bytes()
    # ~40 MiB scoped limit on v7x (64 MiB physical), ~100 MiB on v5e/v6e (128 MiB).
    return max(min(cap - 24 * _MIB, 100 * _MIB), 24 * _MIB)


def _pick_tiling(n, batch, budget):
    """Pick (row_tile, padded_N) against a VMEM budget."""
    n_pad128 = max(_round_up(n, 128), 128)
    usable = int(budget * 0.6)                # headroom for compiler scratch
    best = 128
    for cand in (1024, 512, 256, 128):
        if cand > n_pad128:
            continue
        n_pad_c = _round_up(n, cand)
        # ~5 live (tn, Np) f32/i32 slabs + lane-padded (tn,3) tiles + (3,Np) inputs
        need = 5 * 4 * cand * n_pad_c + 4096 * cand + 448 * n_pad_c
        if need <= usable:
            best = cand
            break
    tn = min(best, n_pad128)
    n_pad = _round_up(n, tn)
    # B == 1: force >= 2 row tiles so the "parallel" tile axis can shard across
    # v7x's two TensorCores (harmless ~0.35us extra grid step on 1-TC chips).
    if batch == 1 and n_pad // tn < 2 and n_pad >= 256:
        tn //= 2
        n_pad = _round_up(n, tn)
    return tn, n_pad


# -----------------------------------------------------------------------------
# Pallas kernel: one grid step per (batch, row-tile).  Emits partial losses.
# -----------------------------------------------------------------------------
def _boundary_losses_kernel(tn, n_true, n_pad, curv_k, idx_bits,
                            adv_pm_ref, ori_pm_ref, neg2_ori_t_ref,
                            neg2_adv_t_ref, adv_t_ref, nrm_t_ref,
                            ori_sq_ref, adv_sq_ref, out_ref):
    """Partial losses for one row tile of one batch element.

    adv_pm_ref     : (1, tn, 3)   adversarial points, this tile (matmul lhs)
    ori_pm_ref     : (1, tn, 3)   original points, this tile (for L2)
    neg2_ori_t_ref : (1, 3, Np)   -2 * original points, lane-dense (Gram rhs)
    neg2_adv_t_ref : (1, 3, Np)   -2 * adversarial points, lane-dense (Gram rhs)
    adv_t_ref      : (1, 3, Np)   adversarial points, lane-dense (kNN gather rhs)
    nrm_t_ref      : (1, 3, Np)   original normals, lane-dense (normal gather rhs)
    ori_sq_ref     : (1, 1, Np)   ||ori||^2 per point (hoisted to wrapper)
    adv_sq_ref     : (1, 1, Np)   ||adv||^2 per point (hoisted to wrapper)
    out_ref        : (1, 1, 8, 128) lanes 0..3 = [l2_sum, hd_max, cd_sum, curv_sum]
    """
    t = pl.program_id(1)
    row0 = t * tn
    padded = n_pad > n_true

    adv_tile = adv_pm_ref[0]                        # (tn, 3)
    ori_tile = ori_pm_ref[0]                        # (tn, 3)
    neg2_ori_t = neg2_ori_t_ref[0]                  # (3, Np)
    neg2_adv_t = neg2_adv_t_ref[0]                  # (3, Np)
    adv_t = adv_t_ref[0]                            # (3, Np)
    nrm_t = nrm_t_ref[0]                            # (3, Np)
    ori_sq = ori_sq_ref[0]                          # (1, Np)
    adv_sq = adv_sq_ref[0]                          # (1, Np)

    col = lax.broadcasted_iota(jnp.int32, (tn, n_pad), 1)
    row_ok = None
    if padded:
        row_ids = lax.broadcasted_iota(jnp.int32, (tn, 1), 0) + row0
        row_ok = row_ids < n_true

    # --- norm_l2_loss partial --------------------------------------------------
    d = adv_tile - ori_tile
    d2 = jnp.sum(d * d, axis=1, keepdims=True)                         # (tn, 1)
    if padded:
        d2 = jnp.where(row_ok, d2, 0.0)
    l2_part = jnp.sum(d2)

    # --- adv -> ori squared distances: Gram matrix on the MXU (-2 pre-folded) --
    adv_sq_col = jnp.sum(adv_tile * adv_tile, axis=1, keepdims=True)   # (tn, 1)
    g = jnp.dot(adv_tile, neg2_ori_t, preferred_element_type=jnp.float32)
    dist = jnp.maximum(adv_sq_col + ori_sq + g, 0.0)                   # (tn, Np)
    if padded:
        dist = jnp.where(col < n_true, dist, _FAR)

    min_d = jnp.min(dist, axis=1, keepdims=True)                       # (tn, 1)
    if padded:
        min_d = jnp.where(row_ok, min_d, 0.0)
    hd_part = jnp.max(min_d)          # hausdorff (one-sided, squared distances)
    cd_part = jnp.sum(min_d)          # pseudo-chamfer numerator

    # --- nearest original normal: packed-key argmin (single reduction) ---------
    keep_hi = -(1 << idx_bits)        # clears the low idx_bits mantissa bits
    dist_key = lax.bitcast_convert_type(
        (lax.bitcast_convert_type(dist, jnp.int32) & keep_hi) | col, jnp.float32)
    dk_min = jnp.min(dist_key, axis=1, keepdims=True)
    onehot = (dist_key == dk_min).astype(jnp.float32)                  # (tn, Np)
    knn_nrm = lax.dot_general(onehot, nrm_t, (((1,), (1,)), ((), ())),
                              preferred_element_type=jnp.float32)      # (tn, 3)

    # --- adv -> adv squared distances + packed keys for the kNN loop -----------
    gs = jnp.dot(adv_tile, neg2_adv_t, preferred_element_type=jnp.float32)
    da = jnp.maximum(adv_sq_col + adv_sq + gs, 0.0)
    keys = lax.bitcast_convert_type(
        (lax.bitcast_convert_type(da, jnp.int32) & keep_hi) | col, jnp.float32)
    row_g = lax.broadcasted_iota(jnp.int32, (tn, n_pad), 0) + row0
    invalid = col == row_g                                             # no self
    if padded:
        invalid = invalid | (col >= n_true)
    keys = jnp.where(invalid, _FAR, keys)

    # --- local_curvature_loss: curv_k nearest adversarial neighbours -----------
    def body(_, carry):
        keys_c, acc_c = carry
        mk = jnp.min(keys_c, axis=1, keepdims=True)    # one fused reduction
        mask = keys_c == mk                            # exactly one col per row
        oh = mask.astype(jnp.float32)
        nbr = lax.dot_general(oh, adv_t, (((1,), (1,)), ((), ())),
                              preferred_element_type=jnp.float32)      # (tn, 3)
        vec = nbr - adv_tile
        inv = lax.rsqrt(jnp.sum(vec * vec, axis=1, keepdims=True) + 1e-12)
        proj = jnp.abs(jnp.sum(vec * knn_nrm, axis=1, keepdims=True)) * inv
        return jnp.where(mask, _FAR, keys_c), acc_c + proj

    if curv_k <= 4:
        unroll = True
    elif curv_k % 2 == 0:
        unroll = 2                       # cap unroll for large k (spill control)
    else:
        unroll = 1
    acc0 = adv_sq_col * 0.0              # traced zeros (no captured constant)
    _, acc = lax.fori_loop(0, curv_k, body, (keys, acc0), unroll=unroll)
    if padded:
        acc = jnp.where(row_ok, acc, 0.0)
    curv_part = jnp.sum(acc)

    # --- pack the four partial scalars into a full-lane (8, 128) tile ----------
    lane = lax.broadcasted_iota(jnp.int32, (8, 128), 1)
    vals = jnp.where(lane == 0, l2_part,
           jnp.where(lane == 1, hd_part,
           jnp.where(lane == 2, cd_part,
           jnp.where(lane == 3, curv_part, 0.0))))
    out_ref[0, 0] = vals


def boundary_losses(points, ori_points, normal_vec, curv_loss_knn):
    """Returns (l2, hausdorff, chamfer, curvature), each of shape (B,)."""
    B, N, C = points.shape
    assert C == 3
    assert ori_points.shape == points.shape
    assert normal_vec.shape == points.shape

    curv_k = max(1, min(int(curv_loss_knn), max(N - 1, 1)))

    adv = points.astype(jnp.float32)
    ori = ori_points.astype(jnp.float32)
    nrm = normal_vec.astype(jnp.float32)

    # Translation-invariant losses: centre on the original cloud's centroid to
    # reduce cancellation in the Gram expansion ||a||^2+||b||^2-2ab.
    center = jnp.mean(ori, axis=1, keepdims=True)
    adv = adv - center
    ori = ori - center

    budget = _vmem_budget_bytes()
    tn, n_pad = _pick_tiling(N, B, budget)
    num_tiles = n_pad // tn

    if n_pad != N:
        pad = ((0, 0), (0, n_pad - N), (0, 0))
        adv = jnp.pad(adv, pad)
        ori = jnp.pad(ori, pad)
        nrm = jnp.pad(nrm, pad)

    adv_t = jnp.transpose(adv, (0, 2, 1))                 # (B, 3, Np) lane-dense
    ori_t = jnp.transpose(ori, (0, 2, 1))
    nrm_t = jnp.transpose(nrm, (0, 2, 1))
    neg2_ori_t = -2.0 * ori_t
    neg2_adv_t = -2.0 * adv_t
    ori_sq = jnp.sum(ori_t * ori_t, axis=1, keepdims=True)   # (B, 1, Np)
    adv_sq = jnp.sum(adv_t * adv_t, axis=1, keepdims=True)   # (B, 1, Np)

    idx_bits = max(int(n_pad - 1).bit_length(), 1)

    kernel = functools.partial(_boundary_losses_kernel,
                               tn, N, n_pad, curv_k, idx_bits)

    out = pl.pallas_call(
        kernel,
        out_shape=jax.ShapeDtypeStruct((B, num_tiles, 8, 128), jnp.float32),
        grid_spec=pltpu.PrefetchScalarGridSpec(
            num_scalar_prefetch=0,
            grid=(B, num_tiles),
            in_specs=[
                pl.BlockSpec((1, tn, 3), lambda b, t: (b, t, 0)),      # adv tile
                pl.BlockSpec((1, tn, 3), lambda b, t: (b, t, 0)),      # ori tile
                pl.BlockSpec((1, 3, n_pad), lambda b, t: (b, 0, 0)),   # -2*ori^T
                pl.BlockSpec((1, 3, n_pad), lambda b, t: (b, 0, 0)),   # -2*adv^T
                pl.BlockSpec((1, 3, n_pad), lambda b, t: (b, 0, 0)),   # adv^T
                pl.BlockSpec((1, 3, n_pad), lambda b, t: (b, 0, 0)),   # nrm^T
                pl.BlockSpec((1, 1, n_pad), lambda b, t: (b, 0, 0)),   # ||ori||^2
                pl.BlockSpec((1, 1, n_pad), lambda b, t: (b, 0, 0)),   # ||adv||^2
            ],
            out_specs=pl.BlockSpec((1, 1, 8, 128), lambda b, t: (b, t, 0, 0)),
        ),
        compiler_params=pltpu.CompilerParams(
            dimension_semantics=("parallel", "parallel"),
            vmem_limit_bytes=int(budget),
        ),
    )(adv, ori, neg2_ori_t, neg2_adv_t, adv_t, nrm_t, ori_sq, adv_sq)

    l2 = jnp.sum(out[:, :, 0, 0], axis=1)
    hd = jnp.max(out[:, :, 0, 1], axis=1)
    cd = jnp.sum(out[:, :, 0, 2], axis=1) / float(N)
    curv = jnp.sum(out[:, :, 0, 3], axis=1) / float(N * curv_k)
    return l2, hd, cd, curv


# -----------------------------------------------------------------------------
# Module port (no learnable parameters; only configuration scalars).
# -----------------------------------------------------------------------------
class BoundaryProjection1:
    def __init__(self, l2_weight, hd_weight, cd_weight, curv_weight,
                 curv_loss_knn, step_size, stage2_steps, max_steps,
                 exponential_step):
        self.l2_weight = l2_weight
        self.hd_weight = hd_weight
        self.cd_weight = cd_weight
        self.curv_weight = curv_weight
        self.curv_loss_knn = curv_loss_knn
        self.step_size = step_size
        self.stage2_step_size = stage2_steps
        self.epoch = 0
        self.max_steps = max_steps
        self.output_losses = None
        self.output_points = None
        self.in_out = False
        self.exponential_step = exponential_step

    def get_loss(self, points, ori_points, normal_vec):
        l2, hd, cd, curv = boundary_losses(points, ori_points, normal_vec,
                                           self.curv_loss_knn)
        # same ordering as prepare_optim_loss: l2, hd, curvature, chamfer
        losses = []
        if self.l2_weight != 0.0:
            losses.append(l2)
        if self.hd_weight != 0.0:
            losses.append(hd)
        if self.curv_weight != 0.0:
            losses.append(curv)
        if self.cd_weight != 0.0:
            losses.append(cd)
        return losses

    def __call__(self, points, ori_points, normal_vec, g_hat, logits, target):
        # TODO(synk): boundary_projection_1.forward raises NotImplementedError in
        # the reference source; only the get_loss compute path is implemented here.
        return self.get_loss(points, ori_points, normal_vec)


# -----------------------------------------------------------------------------
# Pure-JAX reference (broadcast formulation, no Pallas) for a correctness check.
# -----------------------------------------------------------------------------
def reference_losses(adv, ori, nrm, k):
    adv = adv.astype(jnp.float32)
    ori = ori.astype(jnp.float32)
    nrm = nrm.astype(jnp.float32)
    B, N, _ = adv.shape
    diff = adv - ori
    l2 = jnp.sum(diff * diff, axis=(1, 2))
    D = jnp.sum((adv[:, :, None, :] - ori[:, None, :, :]) ** 2, axis=-1)
    min_d = jnp.min(D, axis=2)
    hd = jnp.max(min_d, axis=1)
    cd = jnp.mean(min_d, axis=1)
    idx = jnp.argmin(D, axis=2)
    knn_nrm = jnp.take_along_axis(nrm, idx[..., None], axis=1)
    DA = jnp.sum((adv[:, :, None, :] - adv[:, None, :, :]) ** 2, axis=-1)
    DA = jnp.where(jnp.eye(N, dtype=bool)[None], 1e30, DA)
    acc = jnp.zeros((B, N), jnp.float32)
    for _ in range(k):
        idx2 = jnp.argmin(DA, axis=2)
        nbr = jnp.take_along_axis(adv, idx2[..., None], axis=1)
        vec = nbr - adv
        vec = vec / jnp.sqrt(jnp.sum(vec * vec, axis=-1, keepdims=True) + 1e-12)
        acc = acc + jnp.abs(jnp.sum(vec * knn_nrm, axis=-1))
        DA = jnp.where(jax.nn.one_hot(idx2, N, dtype=bool), 1e30, DA)
    curv = jnp.mean(acc / k, axis=1)
    return l2, hd, cd, curv


if __name__ == "__main__":
    B, N = 2, 64
    curv_knn = 4

    key = jax.random.PRNGKey(0)
    k1, k2, k3 = jax.random.split(key, 3)
    ori_points = jax.random.normal(k1, (B, N, 3), dtype=jnp.float32)
    points = ori_points + 0.05 * jax.random.normal(k2, (B, N, 3), dtype=jnp.float32)
    normal_vec = jax.random.normal(k3, (B, N, 3), dtype=jnp.float32)
    normal_vec = normal_vec / jnp.linalg.norm(normal_vec, axis=-1, keepdims=True)

    module = BoundaryProjection1(
        l2_weight=1.0, hd_weight=1.0, cd_weight=1.0, curv_weight=1.0,
        curv_loss_knn=curv_knn, step_size=0.01, stage2_steps=0.005,
        max_steps=100, exponential_step=False)

    losses = module(points, ori_points, normal_vec,
                    g_hat=None, logits=None, target=None)
    losses = [jax.block_until_ready(l) for l in losses]

    ref = reference_losses(points, ori_points, normal_vec, curv_knn)
    # module order: l2, hd, curv, cd  <->  reference order: l2, hd, cd, curv
    ref_ordered = [ref[0], ref[1], ref[3], ref[2]]
    for got, want in zip(losses, ref_ordered):
        np.testing.assert_allclose(np.asarray(got), np.asarray(want),
                                   rtol=2e-3, atol=2e-4)

    print("KERNEL_OK")
</pallas_src>

<mosaic_0001>
module attributes {stable_mosaic.version = 11 : i64} {
  func.func @_boundary_losses_kernel(%arg0: i32, %arg1: i32, %arg2: memref<1x128x3xf32, #tpu.memory_space<vmem>>, %arg3: memref<1x128x3xf32, #tpu.memory_space<vmem>>, %arg4: memref<1x3x128xf32, #tpu.memory_space<vmem>>, %arg5: memref<1x3x128xf32, #tpu.memory_space<vmem>>, %arg6: memref<1x3x128xf32, #tpu.memory_space<vmem>>, %arg7: memref<1x3x128xf32, #tpu.memory_space<vmem>>, %arg8: memref<1x1x128xf32, #tpu.memory_space<vmem>>, %arg9: memref<1x1x128xf32, #tpu.memory_space<vmem>>, %arg10: memref<1x1x8x128xf32, #tpu.memory_space<vmem>>) attributes {dimension_semantics = [#tpu.dimension_semantics<parallel>, #tpu.dimension_semantics<parallel>], iteration_bounds = array<i64: 2, 1>, scalar_prefetch = 0 : i64, scratch_operands = 0 : i64, tpu.core_type = #tpu.core_type<tc>, window_params = [{transform_indices = @transform_0, window_bounds = array<i64: 1, 128, 3>}, {transform_indices = @transform_1, window_bounds = array<i64: 1, 128, 3>}, {transform_indices = @transform_2, window_bounds = array<i64: 1, 3, 128>}, {transform_indices = @transform_3, window_bounds = array<i64: 1, 3, 128>}, {transform_indices = @transform_4, window_bounds = array<i64: 1, 3, 128>}, {transform_indices = @transform_5, window_bounds = array<i64: 1, 3, 128>}, {transform_indices = @transform_6, window_bounds = array<i64: 1, 1, 128>}, {transform_indices = @transform_7, window_bounds = array<i64: 1, 1, 128>}, {transform_indices = @transform_8, window_bounds = array<i64: 1, 1, 8, 128>}]} {
    %c128_i32 = arith.constant 128 : i32
    %0 = arith.muli %arg1, %c128_i32 : i32
    %c0 = arith.constant 0 : index
    %c0_0 = arith.constant 0 : index
    %c0_1 = arith.constant 0 : index
    %1 = vector.load %arg2[%c0, %c0_0, %c0_1] : memref<1x128x3xf32, #tpu.memory_space<vmem>>, vector<1x128x3xf32>
    %2 = vector.shape_cast %1 : vector<1x128x3xf32> to vector<128x3xf32>
    %c0_2 = arith.constant 0 : index
    %c0_3 = arith.constant 0 : index
    %c0_4 = arith.constant 0 : index
    %3 = vector.load %arg3[%c0_2, %c0_3, %c0_4] : memref<1x128x3xf32, #tpu.memory_space<vmem>>, vector<1x128x3xf32>
    %4 = vector.shape_cast %3 : vector<1x128x3xf32> to vector<128x3xf32>
    %c0_5 = arith.constant 0 : index
    %c0_6 = arith.constant 0 : index
    %c0_7 = arith.constant 0 : index
    %5 = vector.load %arg4[%c0_5, %c0_6, %c0_7] : memref<1x3x128xf32, #tpu.memory_space<vmem>>, vector<1x3x128xf32>
    %6 = vector.shape_cast %5 : vector<1x3x128xf32> to vector<3x128xf32>
    %c0_8 = arith.constant 0 : index
    %c0_9 = arith.constant 0 : index
    %c0_10 = arith.constant 0 : index
    %7 = vector.load %arg5[%c0_8, %c0_9, %c0_10] : memref<1x3x128xf32, #tpu.memory_space<vmem>>, vector<1x3x128xf32>
    %8 = vector.shape_cast %7 : vector<1x3x128xf32> to vector<3x128xf32>
    %c0_11 = arith.constant 0 : index
    %c0_12 = arith.constant 0 : index
    %c0_13 = arith.constant 0 : index
    %9 = vector.load %arg6[%c0_11, %c0_12, %c0_13] : memref<1x3x128xf32, #tpu.memory_space<vmem>>, vector<1x3x128xf32>
    %10 = vector.shape_cast %9 : vector<1x3x128xf32> to vector<3x128xf32>
    %c0_14 = arith.constant 0 : index
    %c0_15 = arith.constant 0 : index
    %c0_16 = arith.constant 0 : index
    %11 = vector.load %arg7[%c0_14, %c0_15, %c0_16] : memref<1x3x128xf32, #tpu.memory_space<vmem>>, vector<1x3x128xf32>
    %12 = vector.shape_cast %11 : vector<1x3x128xf32> to vector<3x128xf32>
    %c0_17 = arith.constant 0 : index
    %c0_18 = arith.constant 0 : index
    %c0_19 = arith.constant 0 : index
    %13 = vector.load %arg8[%c0_17, %c0_18, %c0_19] : memref<1x1x128xf32, #tpu.memory_space<vmem>>, vector<1x1x128xf32>
    %14 = vector.shape_cast %13 : vector<1x1x128xf32> to vector<1x128xf32>
    %c0_20 = arith.constant 0 : index
    %c0_21 = arith.constant 0 : index
    %c0_22 = arith.constant 0 : index
    %15 = vector.load %arg9[%c0_20, %c0_21, %c0_22] : memref<1x1x128xf32, #tpu.memory_space<vmem>>, vector<1x1x128xf32>
    %16 = vector.shape_cast %15 : vector<1x1x128xf32> to vector<1x128xf32>
    %17 = tpu.iota {dimensions = array<i32: 1>} : vector<128x128xi32>
    %18 = tpu.iota {dimensions = array<i32: 0>} : vector<128x1xi32>
    %19 = vector.broadcast %0 : i32 to vector<128x1xi32>
    %20 = arith.addi %18, %19 : vector<128x1xi32>
    %c64_i32 = arith.constant 64 : i32
    %21 = vector.broadcast %c64_i32 : i32 to vector<128x1xi32>
    %22 = arith.cmpi slt, %20, %21 : vector<128x1xi32>
    %23 = arith.subf %2, %4 : vector<128x3xf32>
    %24 = arith.mulf %23, %23 : vector<128x3xf32>
    %cst = arith.constant dense<0.000000e+00> : vector<128xf32>
    %25 = vector.multi_reduction <add>, %24, %cst [1] : vector<128x3xf32> to vector<128xf32>
    %26 = vector.shape_cast %25 : vector<128xf32> to vector<128x1xf32>
    %cst_23 = arith.constant 0.000000e+00 : f32
    %27 = vector.broadcast %cst_23 : f32 to vector<128x1xf32>
    %28 = arith.select %22, %26, %27 : vector<128x1xi1>, vector<128x1xf32>
    %29 = vector.shape_cast %28 : vector<128x1xf32> to vector<1x128x1xf32>
    %cst_24 = arith.constant dense<0.000000e+00> : vector<1xf32>
    %30 = vector.multi_reduction <add>, %29, %cst_24 [1, 2] : vector<1x128x1xf32> to vector<1xf32>
    %31 = vector.shape_cast %30 : vector<1xf32> to vector<1x1x1xf32>
    %32 = vector.extract %31[0, 0, 0] : f32 from vector<1x1x1xf32>
    %33 = arith.mulf %2, %2 : vector<128x3xf32>
    %cst_25 = arith.constant dense<0.000000e+00> : vector<128xf32>
    %34 = vector.multi_reduction <add>, %33, %cst_25 [1] : vector<128x3xf32> to vector<128xf32>
    %35 = vector.shape_cast %34 : vector<128xf32> to vector<128x1xf32>
    %cst_26 = arith.constant dense<0.000000e+00> : vector<128x128xf32>
    %36 = tpu.matmul %2, %6, %cst_26 {dimension_numbers = #tpu.dot_dimension_numbers<[1], [0], [0], [1], [0, 0, 1, 1], [], []>} : vector<128x3xf32>, vector<3x128xf32>, vector<128x128xf32> -> vector<128x128xf32>
    %37 = vector.broadcast %35 : vector<128x1xf32> to vector<128x128xf32>
    %38 = vector.broadcast %14 : vector<1x128xf32> to vector<128x128xf32>
    %39 = arith.addf %37, %38 : vector<128x128xf32>
    %40 = arith.addf %39, %36 : vector<128x128xf32>
    %cst_27 = arith.constant 0.000000e+00 : f32
    %41 = vector.broadcast %cst_27 : f32 to vector<128x128xf32>
    %42 = arith.maximumf %40, %41 : vector<128x128xf32>
    %c64_i32_28 = arith.constant 64 : i32
    %43 = vector.broadcast %c64_i32_28 : i32 to vector<128x128xi32>
    %44 = arith.cmpi slt, %17, %43 : vector<128x128xi32>
    %cst_29 = arith.constant 3.000000e+38 : f32
    %45 = vector.broadcast %cst_29 : f32 to vector<128x128xf32>
    %46 = arith.select %44, %42, %45 : vector<128x128xi1>, vector<128x128xf32>
    %cst_30 = arith.constant dense<0x7F800000> : vector<128xf32>
    %47 = vector.multi_reduction <minimumf>, %46, %cst_30 [1] : vector<128x128xf32> to vector<128xf32>
    %48 = vector.shape_cast %47 : vector<128xf32> to vector<128x1xf32>
    %cst_31 = arith.constant 0.000000e+00 : f32
    %49 = vector.broadcast %cst_31 : f32 to vector<128x1xf32>
    %50 = arith.select %22, %48, %49 : vector<128x1xi1>, vector<128x1xf32>
    %51 = vector.shape_cast %50 : vector<128x1xf32> to vector<1x128x1xf32>
    %cst_32 = arith.constant dense<0xFF800000> : vector<1xf32>
    %52 = vector.multi_reduction <maximumf>, %51, %cst_32 [1, 2] : vector<1x128x1xf32> to vector<1xf32>
    %53 = vector.shape_cast %52 : vector<1xf32> to vector<1x1x1xf32>
    %54 = vector.extract %53[0, 0, 0] : f32 from vector<1x1x1xf32>
    %55 = vector.shape_cast %50 : vector<128x1xf32> to vector<1x128x1xf32>
    %cst_33 = arith.constant dense<0.000000e+00> : vector<1xf32>
    %56 = vector.multi_reduction <add>, %55, %cst_33 [1, 2] : vector<1x128x1xf32> to vector<1xf32>
    %57 = vector.shape_cast %56 : vector<1xf32> to vector<1x1x1xf32>
    %58 = vector.extract %57[0, 0, 0] : f32 from vector<1x1x1xf32>
    %59 = tpu.bitcast %46 : vector<128x128xf32> -> vector<128x128xi32>
    %c-128_i32 = arith.constant -128 : i32
    %60 = vector.broadcast %c-128_i32 : i32 to vector<128x128xi32>
    %61 = arith.andi %59, %60 : vector<128x128xi32>
    %62 = arith.ori %61, %17 : vector<128x128xi32>
    %63 = tpu.bitcast %62 : vector<128x128xi32> -> vector<128x128xf32>
    %cst_34 = arith.constant dense<0x7F800000> : vector<128xf32>
    %64 = vector.multi_reduction <minimumf>, %63, %cst_34 [1] : vector<128x128xf32> to vector<128xf32>
    %65 = vector.shape_cast %64 : vector<128xf32> to vector<128x1xf32>
    %66 = vector.broadcast %65 : vector<128x1xf32> to vector<128x128xf32>
    %67 = arith.cmpf oeq, %63, %66 : vector<128x128xf32>
    %68 = arith.extui %67 : vector<128x128xi1> to vector<128x128xi32>
    %69 = arith.sitofp %68 : vector<128x128xi32> to vector<128x128xf32>
    %cst_35 = arith.constant dense<0.000000e+00> : vector<128x3xf32>
    %70 = tpu.matmul %69, %12, %cst_35 {dimension_numbers = #tpu.dot_dimension_numbers<[1], [1], [0], [0], [0, 0, 1, 0], [], []>} : vector<128x128xf32>, vector<3x128xf32>, vector<128x3xf32> -> vector<128x3xf32>
    %cst_36 = arith.constant dense<0.000000e+00> : vector<128x128xf32>
    %71 = tpu.matmul %2, %8, %cst_36 {dimension_numbers = #tpu.dot_dimension_numbers<[1], [0], [0], [1], [0, 0, 1, 1], [], []>} : vector<128x3xf32>, vector<3x128xf32>, vector<128x128xf32> -> vector<128x128xf32>
    %72 = vector.broadcast %35 : vector<128x1xf32> to vector<128x128xf32>
    %73 = vector.broadcast %16 : vector<1x128xf32> to vector<128x128xf32>
    %74 = arith.addf %72, %73 : vector<128x128xf32>
    %75 = arith.addf %74, %71 : vector<128x128xf32>
    %cst_37 = arith.constant 0.000000e+00 : f32
    %76 = vector.broadcast %cst_37 : f32 to vector<128x128xf32>
    %77 = arith.maximumf %75, %76 : vector<128x128xf32>
    %78 = tpu.bitcast %77 : vector<128x128xf32> -> vector<128x128xi32>
    %c-128_i32_38 = arith.constant -128 : i32
    %79 = vector.broadcast %c-128_i32_38 : i32 to vector<128x128xi32>
    %80 = arith.andi %78, %79 : vector<128x128xi32>
    %81 = arith.ori %80, %17 : vector<128x128xi32>
    %82 = tpu.bitcast %81 : vector<128x128xi32> -> vector<128x128xf32>
    %83 = tpu.iota {dimensions = array<i32: 0>} : vector<128x128xi32>
    %84 = vector.broadcast %0 : i32 to vector<128x128xi32>
    %85 = arith.addi %83, %84 : vector<128x128xi32>
    %86 = arith.cmpi eq, %17, %85 : vector<128x128xi32>
    %c64_i32_39 = arith.constant 64 : i32
    %87 = vector.broadcast %c64_i32_39 : i32 to vector<128x128xi32>
    %88 = arith.cmpi sge, %17, %87 : vector<128x128xi32>
    %89 = arith.ori %86, %88 : vector<128x128xi1>
    %cst_40 = arith.constant 3.000000e+38 : f32
    %90 = vector.broadcast %cst_40 : f32 to vector<128x128xf32>
    %91 = arith.select %89, %90, %82 : vector<128x128xi1>, vector<128x128xf32>
    %cst_41 = arith.constant 0.000000e+00 : f32
    %92 = vector.broadcast %cst_41 : f32 to vector<128x1xf32>
    %93 = arith.mulf %35, %92 : vector<128x1xf32>
    %c0_i32 = arith.constant 0 : i32
    %cst_42 = arith.constant dense<0x7F800000> : vector<128xf32>
    %94 = vector.multi_reduction <minimumf>, %91, %cst_42 [1] : vector<128x128xf32> to vector<128xf32>
    %95 = vector.shape_cast %94 : vector<128xf32> to vector<128x1xf32>
    %96 = vector.broadcast %95 : vector<128x1xf32> to vector<128x128xf32>
    %97 = arith.cmpf oeq, %91, %96 : vector<128x128xf32>
    %98 = arith.extui %97 : vector<128x128xi1> to vector<128x128xi32>
    %99 = arith.sitofp %98 : vector<128x128xi32> to vector<128x128xf32>
    %cst_43 = arith.constant dense<0.000000e+00> : vector<128x3xf32>
    %100 = tpu.matmul %99, %10, %cst_43 {dimension_numbers = #tpu.dot_dimension_numbers<[1], [1], [0], [0], [0, 0, 1, 0], [], []>} : vector<128x128xf32>, vector<3x128xf32>, vector<128x3xf32> -> vector<128x3xf32>
    %101 = arith.subf %100, %2 : vector<128x3xf32>
    %102 = arith.mulf %101, %101 : vector<128x3xf32>
    %cst_44 = arith.constant dense<0.000000e+00> : vector<128xf32>
    %103 = vector.multi_reduction <add>, %102, %cst_44 [1] : vector<128x3xf32> to vector<128xf32>
    %104 = vector.shape_cast %103 : vector<128xf32> to vector<128x1xf32>
    %cst_45 = arith.constant 9.99999996E-13 : f32
    %105 = vector.broadcast %cst_45 : f32 to vector<128x1xf32>
    %106 = arith.addf %104, %105 : vector<128x1xf32>
    %107 = math.rsqrt %106 : vector<128x1xf32>
    %108 = arith.mulf %101, %70 : vector<128x3xf32>
    %cst_46 = arith.constant dense<0.000000e+00> : vector<128xf32>
    %109 = vector.multi_reduction <add>, %108, %cst_46 [1] : vector<128x3xf32> to vector<128xf32>
    %110 = vector.shape_cast %109 : vector<128xf32> to vector<128x1xf32>
    %111 = math.absf %110 : vector<128x1xf32>
    %112 = arith.mulf %111, %107 : vector<128x1xf32>
    %cst_47 = arith.constant 3.000000e+38 : f32
    %113 = vector.broadcast %cst_47 : f32 to vector<128x128xf32>
    %114 = arith.select %97, %113, %91 : vector<128x128xi1>, vector<128x128xf32>
    %115 = arith.addf %93, %112 : vector<128x1xf32>
    %c1_i32 = arith.constant 1 : i32
    %cst_48 = arith.constant dense<0x7F800000> : vector<128xf32>
    %116 = vector.multi_reduction <minimumf>, %114, %cst_48 [1] : vector<128x128xf32> to vector<128xf32>
    %117 = vector.shape_cast %116 : vector<128xf32> to vector<128x1xf32>
    %118 = vector.broadcast %117 : vector<128x1xf32> to vector<128x128xf32>
    %119 = arith.cmpf oeq, %114, %118 : vector<128x128xf32>
    %120 = arith.extui %119 : vector<128x128xi1> to vector<128x128xi32>
    %121 = arith.sitofp %120 : vector<128x128xi32> to vector<128x128xf32>
    %cst_49 = arith.constant dense<0.000000e+00> : vector<128x3xf32>
    %122 = tpu.matmul %121, %10, %cst_49 {dimension_numbers = #tpu.dot_dimension_numbers<[1], [1], [0], [0], [0, 0, 1, 0], [], []>} : vector<128x128xf32>, vector<3x128xf32>, vector<128x3xf32> -> vector<128x3xf32>
    %123 = arith.subf %122, %2 : vector<128x3xf32>
    %124 = arith.mulf %123, %123 : vector<128x3xf32>
    %cst_50 = arith.constant dense<0.000000e+00> : vector<128xf32>
    %125 = vector.multi_reduction <add>, %124, %cst_50 [1] : vector<128x3xf32> to vector<128xf32>
    %126 = vector.shape_cast %125 : vector<128xf32> to vector<128x1xf32>
    %cst_51 = arith.constant 9.99999996E-13 : f32
    %127 = vector.broadcast %cst_51 : f32 to vector<128x1xf32>
    %128 = arith.addf %126, %127 : vector<128x1xf32>
    %129 = math.rsqrt %128 : vector<128x1xf32>
    %130 = arith.mulf %123, %70 : vector<128x3xf32>
    %cst_52 = arith.constant dense<0.000000e+00> : vector<128xf32>
    %131 = vector.multi_reduction <add>, %130, %cst_52 [1] : vector<128x3xf32> to vector<128xf32>
    %132 = vector.shape_cast %131 : vector<128xf32> to vector<128x1xf32>
    %133 = math.absf %132 : vector<128x1xf32>
    %134 = arith.mulf %133, %129 : vector<128x1xf32>
    %cst_53 = arith.constant 3.000000e+38 : f32
    %135 = vector.broadcast %cst_53 : f32 to vector<128x128xf32>
    %136 = arith.select %119, %135, %114 : vector<128x128xi1>, vector<128x128xf32>
    %137 = arith.addf %115, %134 : vector<128x1xf32>
    %c2_i32 = arith.constant 2 : i32
    %cst_54 = arith.constant dense<0x7F800000> : vector<128xf32>
    %138 = vector.multi_reduction <minimumf>, %136, %cst_54 [1] : vector<128x128xf32> to vector<128xf32>
    %139 = vector.shape_cast %138 : vector<128xf32> to vector<128x1xf32>
    %140 = vector.broadcast %139 : vector<128x1xf32> to vector<128x128xf32>
    %141 = arith.cmpf oeq, %136, %140 : vector<128x128xf32>
    %142 = arith.extui %141 : vector<128x128xi1> to vector<128x128xi32>
    %143 = arith.sitofp %142 : vector<128x128xi32> to vector<128x128xf32>
    %cst_55 = arith.constant dense<0.000000e+00> : vector<128x3xf32>
    %144 = tpu.matmul %143, %10, %cst_55 {dimension_numbers = #tpu.dot_dimension_numbers<[1], [1], [0], [0], [0, 0, 1, 0], [], []>} : vector<128x128xf32>, vector<3x128xf32>, vector<128x3xf32> -> vector<128x3xf32>
    %145 = arith.subf %144, %2 : vector<128x3xf32>
    %146 = arith.mulf %145, %145 : vector<128x3xf32>
    %cst_56 = arith.constant dense<0.000000e+00> : vector<128xf32>
    %147 = vector.multi_reduction <add>, %146, %cst_56 [1] : vector<128x3xf32> to vector<128xf32>
    %148 = vector.shape_cast %147 : vector<128xf32> to vector<128x1xf32>
    %cst_57 = arith.constant 9.99999996E-13 : f32
    %149 = vector.broadcast %cst_57 : f32 to vector<128x1xf32>
    %150 = arith.addf %148, %149 : vector<128x1xf32>
    %151 = math.rsqrt %150 : vector<128x1xf32>
    %152 = arith.mulf %145, %70 : vector<128x3xf32>
    %cst_58 = arith.constant dense<0.000000e+00> : vector<128xf32>
    %153 = vector.multi_reduction <add>, %152, %cst_58 [1] : vector<128x3xf32> to vector<128xf32>
    %154 = vector.shape_cast %153 : vector<128xf32> to vector<128x1xf32>
    %155 = math.absf %154 : vector<128x1xf32>
    %156 = arith.mulf %155, %151 : vector<128x1xf32>
    %cst_59 = arith.constant 3.000000e+38 : f32
    %157 = vector.broadcast %cst_59 : f32 to vector<128x128xf32>
    %158 = arith.select %141, %157, %136 : vector<128x128xi1>, vector<128x128xf32>
    %159 = arith.addf %137, %156 : vector<128x1xf32>
    %c3_i32 = arith.constant 3 : i32
    %cst_60 = arith.constant dense<0x7F800000> : vector<128xf32>
    %160 = vector.multi_reduction <minimumf>, %158, %cst_60 [1] : vector<128x128xf32> to vector<128xf32>
    %161 = vector.shape_cast %160 : vector<128xf32> to vector<128x1xf32>
    %162 = vector.broadcast %161 : vector<128x1xf32> to vector<128x128xf32>
    %163 = arith.cmpf oeq, %158, %162 : vector<128x128xf32>
    %164 = arith.extui %163 : vector<128x128xi1> to vector<128x128xi32>
    %165 = arith.sitofp %164 : vector<128x128xi32> to vector<128x128xf32>
    %cst_61 = arith.constant dense<0.000000e+00> : vector<128x3xf32>
    %166 = tpu.matmul %165, %10, %cst_61 {dimension_numbers = #tpu.dot_dimension_numbers<[1], [1], [0], [0], [0, 0, 1, 0], [], []>} : vector<128x128xf32>, vector<3x128xf32>, vector<128x3xf32> -> vector<128x3xf32>
    %167 = arith.subf %166, %2 : vector<128x3xf32>
    %168 = arith.mulf %167, %167 : vector<128x3xf32>
    %cst_62 = arith.constant dense<0.000000e+00> : vector<128xf32>
    %169 = vector.multi_reduction <add>, %168, %cst_62 [1] : vector<128x3xf32> to vector<128xf32>
    %170 = vector.shape_cast %169 : vector<128xf32> to vector<128x1xf32>
    %cst_63 = arith.constant 9.99999996E-13 : f32
    %171 = vector.broadcast %cst_63 : f32 to vector<128x1xf32>
    %172 = arith.addf %170, %171 : vector<128x1xf32>
    %173 = math.rsqrt %172 : vector<128x1xf32>
    %174 = arith.mulf %167, %70 : vector<128x3xf32>
    %cst_64 = arith.constant dense<0.000000e+00> : vector<128xf32>
    %175 = vector.multi_reduction <add>, %174, %cst_64 [1] : vector<128x3xf32> to vector<128xf32>
    %176 = vector.shape_cast %175 : vector<128xf32> to vector<128x1xf32>
    %177 = math.absf %176 : vector<128x1xf32>
    %178 = arith.mulf %177, %173 : vector<128x1xf32>
    %cst_65 = arith.constant 3.000000e+38 : f32
    %179 = vector.broadcast %cst_65 : f32 to vector<128x128xf32>
    %180 = arith.select %163, %179, %158 : vector<128x128xi1>, vector<128x128xf32>
    %181 = arith.addf %159, %178 : vector<128x1xf32>
    %cst_66 = arith.constant 0.000000e+00 : f32
    %182 = vector.broadcast %cst_66 : f32 to vector<128x1xf32>
    %183 = arith.select %22, %181, %182 : vector<128x1xi1>, vector<128x1xf32>
    %184 = vector.shape_cast %183 : vector<128x1xf32> to vector<1x128x1xf32>
    %cst_67 = arith.constant dense<0.000000e+00> : vector<1xf32>
    %185 = vector.multi_reduction <add>, %184, %cst_67 [1, 2] : vector<1x128x1xf32> to vector<1xf32>
    %186 = vector.shape_cast %185 : vector<1xf32> to vector<1x1x1xf32>
    %187 = vector.extract %186[0, 0, 0] : f32 from vector<1x1x1xf32>
    %188 = tpu.iota {dimensions = array<i32: 1>} : vector<8x128xi32>
    %c0_i32_68 = arith.constant 0 : i32
    %189 = vector.broadcast %c0_i32_68 : i32 to vector<8x128xi32>
    %190 = arith.cmpi eq, %188, %189 : vector<8x128xi32>
    %c1_i32_69 = arith.constant 1 : i32
    %191 = vector.broadcast %c1_i32_69 : i32 to vector<8x128xi32>
    %192 = arith.cmpi eq, %188, %191 : vector<8x128xi32>
    %c2_i32_70 = arith.constant 2 : i32
    %193 = vector.broadcast %c2_i32_70 : i32 to vector<8x128xi32>
    %194 = arith.cmpi eq, %188, %193 : vector<8x128xi32>
    %c3_i32_71 = arith.constant 3 : i32
    %195 = vector.broadcast %c3_i32_71 : i32 to vector<8x128xi32>
    %196 = arith.cmpi eq, %188, %195 : vector<8x128xi32>
    %cst_72 = arith.constant 0.000000e+00 : f32
    %197 = vector.broadcast %187 : f32 to vector<8x128xf32>
    %198 = vector.broadcast %cst_72 : f32 to vector<8x128xf32>
    %199 = arith.select %196, %197, %198 : vector<8x128xi1>, vector<8x128xf32>
    %200 = vector.broadcast %58 : f32 to vector<8x128xf32>
    %201 = arith.select %194, %200, %199 : vector<8x128xi1>, vector<8x128xf32>
    %202 = vector.broadcast %54 : f32 to vector<8x128xf32>
    %203 = arith.select %192, %202, %201 : vector<8x128xi1>, vector<8x128xf32>
    %204 = vector.broadcast %32 : f32 to vector<8x128xf32>
    %205 = arith.select %190, %204, %203 : vector<8x128xi1>, vector<8x128xf32>
    %c0_73 = arith.constant 0 : index
    %c0_74 = arith.constant 0 : index
    %c0_75 = arith.constant 0 : index
    %c0_76 = arith.constant 0 : index
    %206 = vector.load %arg10[%c0_73, %c0_74, %c0_75, %c0_76] : memref<1x1x8x128xf32, #tpu.memory_space<vmem>>, vector<1x1x8x128xf32>
    %207 = vector.shape_cast %206 : vector<1x1x8x128xf32> to vector<8x128xf32>
    %208 = vector.shape_cast %205 : vector<8x128xf32> to vector<1x1x8x128xf32>
    tpu.vector_store %arg10[%c0_73, %c0_74, %c0_75, %c0_76], %208 {strides = array<i32>} : memref<1x1x8x128xf32, #tpu.memory_space<vmem>>, vector<1x1x8x128xf32>,
    return
  }
  func.func @transform_0(%arg0: i32, %arg1: i32) -> (i32, i32, i32) {
    %c0_i32 = arith.constant 0 : i32
    %c0_i32_0 = arith.constant 0 : i32
    return %arg0, %arg1, %c0_i32 : i32, i32, i32
  }
  func.func @transform_1(%arg0: i32, %arg1: i32) -> (i32, i32, i32) {
    %c0_i32 = arith.constant 0 : i32
    %c0_i32_0 = arith.constant 0 : i32
    return %arg0, %arg1, %c0_i32 : i32, i32, i32
  }
  func.func @transform_2(%arg0: i32, %arg1: i32) -> (i32, i32, i32) {
    %c0_i32 = arith.constant 0 : i32
    %c0_i32_0 = arith.constant 0 : i32
    %c0_i32_1 = arith.constant 0 : i32
    return %arg0, %c0_i32, %c0_i32_0 : i32, i32, i32
  }
  func.func @transform_3(%arg0: i32, %arg1: i32) -> (i32, i32, i32) {
    %c0_i32 = arith.constant 0 : i32
    %c0_i32_0 = arith.constant 0 : i32
    %c0_i32_1 = arith.constant 0 : i32
    return %arg0, %c0_i32, %c0_i32_0 : i32, i32, i32
  }
  func.func @transform_4(%arg0: i32, %arg1: i32) -> (i32, i32, i32) {
    %c0_i32 = arith.constant 0 : i32
    %c0_i32_0 = arith.constant 0 : i32
    %c0_i32_1 = arith.constant 0 : i32
    return %arg0, %c0_i32, %c0_i32_0 : i32, i32, i32
  }
  func.func @transform_5(%arg0: i32, %arg1: i32) -> (i32, i32, i32) {
    %c0_i32 = arith.constant 0 : i32
    %c0_i32_0 = arith.constant 0 : i32
    %c0_i32_1 = arith.constant 0 : i32
    return %arg0, %c0_i32, %c0_i32_0 : i32, i32, i32
  }
  func.func @transform_6(%arg0: i32, %arg1: i32) -> (i32, i32, i32) {
    %c0_i32 = arith.constant 0 : i32
    %c0_i32_0 = arith.constant 0 : i32
    %c0_i32_1 = arith.constant 0 : i32
    return %arg0, %c0_i32, %c0_i32_0 : i32, i32, i32
  }
  func.func @transform_7(%arg0: i32, %arg1: i32) -> (i32, i32, i32) {
    %c0_i32 = arith.constant 0 : i32
    %c0_i32_0 = arith.constant 0 : i32
    %c0_i32_1 = arith.constant 0 : i32
    return %arg0, %c0_i32, %c0_i32_0 : i32, i32, i32
  }
  func.func @transform_8(%arg0: i32, %arg1: i32) -> (i32, i32, i32, i32) {
    %c0_i32 = arith.constant 0 : i32
    %c0_i32_0 = arith.constant 0 : i32
    %c0_i32_1 = arith.constant 0 : i32
    return %arg0, %arg1, %c0_i32, %c0_i32_0 : i32, i32, i32, i32
  }
}

</mosaic_0001>

<bundles_post_ra>
// kernel: tpu_custom_call.1
= control target key start
LH: loop header
LB: loop body
LE: loop exit
PB: predicated region body
PF: predicated region fallthrough
CT: control target
= control target key end

     0   :  { %13 = vsyncpa [#allocation3], 0  ;;  %s6560_s0 = inlined_call_operand.vmem [shape: f32[2,128,3], index: 0, kind: input, shape index: {}]   ;;  %s6561_s1 = inlined_call_operand.vmem [shape: f32[2,128,3], index: 1, kind: input, shape index: {}]   ;;  %s6562_s2 = inlined_call_operand.vmem [shape: f32[2,3,128], index: 2, kind: input, shape index: {}]   ;;  %s6563_s3 = inlined_call_operand.vmem [shape: f32[2,3,128], index: 3, kind: input, shape index: {}]   ;;  %s6564_s4 = inlined_call_operand.vmem [shape: f32[2,3,128], index: 4, kind: input, shape index: {}]   ;;  %s6565_s5 = inlined_call_operand.vmem [shape: f32[2,3,128], index: 5, kind: input, shape index: {}]   ;;  %s6566_s6 = inlined_call_operand.vmem [shape: f32[2,1,128], index: 6, kind: input, shape index: {}]   ;;  %s6567_s7 = inlined_call_operand.vmem [shape: f32[2,1,128], index: 7, kind: input, shape index: {}]   ;;  %s6568_s8 = inlined_call_operand.hbm [shape: f32[2,1,8,128], index: 8, kind: output, shape index: {}]  }
   0x1   :  { %15 = vsyncpa [#allocation3 + $0x1], 0  ;;  %s4626_s27 = smov 0   ;;  %s4628_s28 = smov 0  }
   0x2   :  { %s4630_s29 = smov 0   ;;  %s4632_s30 = smov 0  }
   0x3   :  { %s4634_s9 = smov 0   ;;  %s4636_s10 = smov 0  }
   0x4 LB: > { %s3843_s11 = sadd.s32 4294967295, %s4577_s10   ;;  %s3844_s12 = sadd.s32 4294967294, %s4577_s10   ;;  %s4577_s10 = sphi %s4636_s10, %s21_s10   ;;  %s4573_s9 = sphi %s4634_s9, %s6818_s9   ;;  %s4569_s30 = sphi %s4632_s30, %s6817_s30   ;;  %s4565_s29 = sphi %s4630_s29, %s6816_s29   ;;  %s4561_s28 = sphi %s4628_s28, %s6815_s28   ;;  %s4557_s27 = sphi %s4626_s27, %s6814_s27  }
   0x5   : > { %s33_s13 = sadd.s32 1, %s4573_s9  ;;  %s254_s14 = sadd.s32 1, %s4565_s29 }
   0x6   : > { %p35_p0 = scmp.ge.s32.totalorder %s33_s13, 2  ;;  %p264_p1 = scmp.ne.s32.totalorder %s4565_s29, %s4561_s28 }
   0x7   : > { %p265_p2 = scmp.eq.s32.totalorder %s3843_s11, 1  ;;  %p270_p3 = scmp.ne.s32.totalorder %s4561_s28, %s4557_s27 }
   0x8   : > { %s6820_s13 = smov (%p35_p0, %s33_s13), 0  ;;  %p271_p5 = scmp.eq.s32.totalorder %s3844_s12, 1 }
   0x9   : > { %p4666_p4 = por %p265_p2, %p264_p1  ;;  %s249_s16 = ssub.s32 %s4573_s9, %s6820_s13 }
   0xa   : > { %p3847_p6 = scmp.ge.s32.totalorder %s4577_s10, 1  ;;  %p252_p7 = scmp.eq.s32.totalorder %s249_s16, 0 }
   0xb   : > { %p4673_p8 = por %p271_p5, %p270_p3  ;;  %p355_p9 = scmp.lt.s32.totalorder %s4577_s10, 3 }
   0xc   : > { %s4679_s18 = scalar_select %p252_p7, %s4565_s29, %s254_s14  }
   0xd   : > { %p356_p10 = pnand %p3847_p6, %p355_p9 }
   0xf   : > { %359 = sbr.rel (%p356_p10) target bundleno = 1510 (0x5e6), region = 52 }
  0x16   : > { %p425_p11 = scmp.lt.s32.totalorder %s4569_s30, 1  ;;  %vm807_vm0 = vcmask 1042432   ;;  %vm6592_vm1 = vcmask 23552   ;;  %v505_v42 = vlaneseq  ;;  %s4054_s23 = sshll.u32 %s4569_s30, 7 }
  0x18   : > { %s4683_s19 = scalar_select %p425_p11, %s4569_s30, 1  ;;  %v4850_v45 = vshrl.u32 %v505_v42, 7  ;;  %v4865_v54 = vand.u32 127, %v505_v42 }
  0x1a   : > { %s4057_s20 = sshll.u32 %s4683_s19, 7  ;;  %s4687_s21 = sshll.u32 %s4683_s19, 2  ;;  %v509_v51 = vadd.s32 8, %v4850_v45  ;;  %6637 = vst [vmem:[#allocation9_spill] sm:$0xff] %v4865_v54  ;;  %vm1708_vm3 = vcmp.ge.s32.totalorder %v4865_v54, 64  ;;  %v511_v62 = vadd.s32 24, %v4850_v45  ;;  %vm1692_vm4 = vcmp.eq.s32.totalorder %v4865_v54, %v4850_v45 }
  0x1b   : > { %s4694_s24 = scalar_lea.vmem %s6560_s0, %s4057_s20  ;;  %s447_s11 = scalar_lea.vmem %s6562_s2, %s4687_s21  ;;  %vm4896_vm6 = vmor %vm1692_vm4, %vm1708_vm3 }
  0x1c   : > { %v499_v0 = vld [vmem:[%s447_s11] sm:$0x7]  ;;  %v4702_v2 = vld [vmem:[%s4694_s24 + $0x8] sm:$0xff]  ;;  %s451_s16 = scalar_lea.vmem %s6563_s3, %s4687_s21  ;;  %v4711_v3 = vld [vmem:[%s4694_s24 + $0x10] sm:$0xff]  ;;  %s4732_s25 = scalar_lea.vmem %s6564_s4, %s4687_s21  ;;  %vm1693_vm2 = vcmp.eq.s32.totalorder %v4865_v54, %v509_v51  ;;  %vm1695_vm7 = vcmp.eq.s32.totalorder %v4865_v54, %v511_v62  ;;  %v514_v62 = vadd.s32 48, %v4850_v45 }
  0x1d   : > { %v467_v1 = vld [vmem:[%s4694_s24] sm:$0xff]  ;;  %4178 = vmatprep.subr.msk.mxu0 %vm807_vm0, %v499_v0  ;;  %v4715_v6 = vld [vmem:[%s4694_s24 + $0x18] sm:$0xff]  ;;  %v697_v7 = vmul.f32 %v4711_v3, %v4711_v3  ;;  %v696_v8 = vmul.f32 %v4702_v2, %v4702_v2  ;;  %4360 = vmatprep.subr.msk.mxu1 %vm807_vm0, %v499_v0  ;;  %v472_v13 = vld [vmem:[%s4694_s24 + $0x28] sm:$0xff]  ;;  %s465_s12 = scalar_lea.vmem %s6567_s7, %s4683_s19  ;;  %s462_s22 = scalar_lea.vmem %s6566_s6, %s4683_s19 }
  0x1e   : > { %4180 = vmatprep.mubr.msk.f32.mxu0 %vm6592_vm1, %v467_v1  ;;  %v695_v4 = vmul.f32 %v467_v1, %v467_v1  ;;  %4179 = vmatpush3.msk.msra.mxu0 %vm807_vm0, %v499_v0  ;;  %v500_v5 = vld [vmem:[%s451_s16] sm:$0x7]  ;;  %v698_v10 = vmul.f32 %v4715_v6, %v4715_v6  ;;  %v700_v17 = vmul.f32 %v472_v13, %v472_v13  ;;  %v4746_v19 = vld [vmem:[%s4694_s24 + $0x48] sm:$0xff]  ;;  %v4757_v21 = vld [vmem:[%s4694_s24 + $0x50] sm:$0xff]  ;;  %s459_s11 = scalar_lea.vmem %s6565_s5, %s4687_s21  ;;  %s421_s19 = sand.u32 1, %s4561_s28  }
  0x1f   : > { %4181 = vmatmul.mubr.msk.f32.vlgmr.msra.gmra.mrb[0].mxu0 %vm6592_vm1, %v4702_v2  ;;  %4230 = vmatprep.subr.msk.mxu0 %vm807_vm0, %v500_v5  ;;  %v717_v11 = vsel %vm6592_vm1, %v697_v7, 0.0  ;;  %v471_v12 = vld [vmem:[%s4694_s24 + $0x20] sm:$0xff]  ;;  %v714_v15 = vsel %vm6592_vm1, %v696_v8, 0.0  ;;  %v473_v22 = vld [vmem:[%s4694_s24 + $0x30] sm:$0xff]  ;;  %v474_v23 = vld [vmem:[%s4694_s24 + $0x38] sm:$0xff]  ;;  %s3671_s30 = scalar_lea.sflag [#allocation3], %s421_s19 }
  0x20   : > { %v711_v9 = vsel %vm6592_vm1, %v695_v4, 0.0  ;;  %4231 = vmatpush3.msk.msra.mxu0 %vm807_vm0, %v500_v5  ;;  %4183 = vmatprep.mubr.msk.f32.mxu0 %vm6592_vm1, %v4711_v3  ;;  %v4741_v14 = vld [vmem:[%s4694_s24 + $0x40] sm:$0xff]  ;;  %v720_v16 = vsel %vm6592_vm1, %v698_v10, 0.0  ;;  %v699_v18 = vmul.f32 %v471_v12, %v471_v12  ;;  %v726_v24 = vsel %vm6592_vm1, %v700_v17, 0.0  ;;  %v4769_v28 = vld [vmem:[%s4694_s24 + $0x58] sm:$0xff]  ;;  %v4784_v32 = vld [vmem:[%s4694_s24 + $0x68] sm:$0xff] }
  0x21   : > { %712 = vadd.xlane.f32.xlu0 %v711_v9  ;;  %718 = vadd.xlane.f32.xlu1 %v717_v11  ;;  %v4752_v20 = vld [vmem:[%s4732_s25] sm:$0x7]  ;;  %v702_v26 = vmul.f32 %v474_v23, %v474_v23  ;;  %v701_v27 = vmul.f32 %v473_v22, %v473_v22  ;;  %v4788_v33 = vld [vmem:[%s4694_s24 + $0x70] sm:$0xff]  ;;  %v4796_v34 = vld [vmem:[%s4694_s24 + $0x78] sm:$0xff] }
  0x22   : > { %4361 = vmatpush3.msk.msra.mxu1 %vm807_vm0, %v499_v0  ;;  %4192 = vmatprep.mubr.msk.f32.mxu1 %vm6592_vm1, %v4741_v14  ;;  %v723_v25 = vsel %vm6592_vm1, %v699_v18, 0.0  ;;  %v4774_v29 = vld [vmem:[%s4694_s24 + $0x60] sm:$0xff]  ;;  %vm4889_vm5 = vmor %vm1693_vm2, %vm1708_vm3  ;;  %vm1698_vm0 = vcmp.eq.s32.totalorder %v4865_v54, %v514_v62 }
  0x23   : > { %4184 = vmatmul.mubr.msk.f32.gmra.mrb[2].mxu0 %vm6592_vm1, %v4715_v6  ;;  %4193 = vmatmul.mubr.msk.f32.vlgmr.msra.gmra.mrb[0].mxu1 %vm6592_vm1, %v4746_v19  ;;  %v732_v30 = vsel %vm6592_vm1, %v702_v26, 0.0  ;;  %v729_v31 = vsel %vm6592_vm1, %v701_v27, 0.0  ;;  %v4852_v46 = vld [vmem:[%s465_s12] ss:$0 sm:$0xff]  ;;  %vm1712_vm9 = vmor %vm1695_vm7, %vm1708_vm3  ;;  %s6023_s12 = scalar_lea.vmem %s6561_s1, %s4057_s20  ;;  %s3848_s20 = sshll.u32 %s421_s19, 3 }
  0x24   : > { %4186 = vmatprep.mubr.msk.f32.mxu0 %vm6592_vm1, %v471_v12  ;;  %4195 = vmatprep.mubr.msk.f32.mxu1 %vm6592_vm1, %v4757_v21  ;;  %vm1715_vm4 = vmor %vm1698_vm0, %vm1708_vm3  ;;  %s423_s26 = scalar_lea.vmem [#allocation2], %s3848_s20 }
  0x25   : > { %715 = vadd.xlane.f32.xlu0 %v714_v15  ;;  %721 = vadd.xlane.f32.xlu1 %v720_v16  ;;  %v513_v15 = vadd.s32 40, %v4850_v45 }
  0x26   : > { %4282 = vmatprep.subr.mxu0 %v4752_v20 }
  0x27   : > { %4187 = vmatmul.mubr.msk.f32.gmra.mrb[4].mxu0 %vm6592_vm1, %v472_v13  ;;  %4196 = vmatmul.mubr.msk.f32.gmra.mrb[2].mxu1 %vm6592_vm1, %v4769_v28  ;;  %vm1697_vm11 = vcmp.eq.s32.totalorder %v4865_v54, %v513_v15 }
  0x28   : > { %4189 = vmatprep.mubr.msk.f32.mxu0 %vm6592_vm1, %v473_v22  ;;  %4198 = vmatprep.mubr.msk.f32.mxu1 %vm6592_vm1, %v4774_v29  ;;  %vm1714_vm13 = vmor %vm1697_vm11, %vm1708_vm3 }
  0x29   : > { %727 = vadd.xlane.f32.xlu1 %v726_v24  ;;  %724 = vadd.xlane.f32.xlu0 %v723_v25 }
  0x2b   : > { %4190 = vmatmul.mubr.msk.f32.gmra.mrb[6].mxu0 %vm6592_vm1, %v474_v23  ;;  %4199 = vmatmul.mubr.msk.f32.gmra.mrb[4].mxu1 %vm6592_vm1, %v4784_v32 }
  0x2c   : > { %4232 = vmatprep.mubr.msk.f32.mxu0 %vm6592_vm1, %v467_v1  ;;  %4201 = vmatprep.mubr.msk.f32.mxu1 %vm6592_vm1, %v4788_v33 }
  0x2d   : > { %733 = vadd.xlane.f32.xlu1 %v732_v30  ;;  %730 = vadd.xlane.f32.xlu0 %v729_v31 }
  0x2f   : > { %4233 = vmatmul.mubr.msk.f32.vlgmr.msra.gmra.mrb[8].mxu0 %vm6592_vm1, %v4702_v2  ;;  %4202 = vmatmul.mubr.msk.f32.gmra.mrb[6].mxu1 %vm6592_vm1, %v4796_v34  ;;  %v510_v2 = vadd.s32 16, %v4850_v45 }
  0x30   : > { %4235 = vmatprep.mubr.msk.f32.mxu0 %vm6592_vm1, %v4711_v3  ;;  %4283 = vmatpush3.xpose.msra.mxu0 %v4752_v20 }
  0x31   : > { %4334 = vmatprep.subr.mxu0 %v4752_v20  ;;  %vm1694_vm8 = vcmp.eq.s32.totalorder %v4865_v54, %v510_v2 }
  0x32   : > { %vm1711_vm10 = vmor %vm1694_vm8, %vm1708_vm3 }
  0x33   : > { %4236 = vmatmul.mubr.msk.f32.gmra.mrb[10].mxu0 %vm6592_vm1, %v4715_v6 }
  0x34   : > { %4238 = vmatprep.mubr.msk.f32.mxu0 %vm6592_vm1, %v471_v12 }
  0x37   : > { %4239 = vmatmul.mubr.msk.f32.gmra.mrb[12].mxu0 %vm6592_vm1, %v472_v13 }
  0x38   : > { %4241 = vmatprep.mubr.msk.f32.mxu0 %vm6592_vm1, %v473_v22 }
  0x3b   : > { %4242 = vmatmul.mubr.msk.f32.gmra.mrb[14].mxu0 %vm6592_vm1, %v474_v23  ;;  %v512_v23 = vadd.s32 32, %v4850_v45 }
  0x3c   : > { %4244 = vmatprep.mubr.msk.f32.mxu0 %vm6592_vm1, %v4741_v14 }
  0x3d   : > { %vm1696_vm12 = vcmp.eq.s32.totalorder %v4865_v54, %v512_v23 }
  0x3e   : > { %vm1713_vm14 = vmor %vm1696_vm12, %vm1708_vm3 }
  0x3f   : > { %4245 = vmatmul.mubr.msk.f32.gmra.mrb[16].mxu0 %vm6592_vm1, %v4746_v19 }
  0x40   : > { %4247 = vmatprep.mubr.msk.f32.mxu0 %vm6592_vm1, %v4757_v21 }
  0x43   : > { %4248 = vmatmul.mubr.msk.f32.gmra.mrb[18].mxu0 %vm6592_vm1, %v4769_v28 }
  0x44   : > { %4250 = vmatprep.mubr.msk.f32.mxu0 %vm6592_vm1, %v4774_v29 }
  0x47   : > { %4251 = vmatmul.mubr.msk.f32.gmra.mrb[20].mxu0 %vm6592_vm1, %v4784_v32 }
  0x48   : > { %4253 = vmatprep.mubr.msk.f32.mxu0 %vm6592_vm1, %v4788_v33 }
  0x4b   : > { %4254 = vmatmul.mubr.msk.f32.gmra.mrb[22].mxu0 %vm6592_vm1, %v4796_v34 }
  0xae   : > { %v4834_v38 = vpop.xlane.xlu0 %712  ;;  %v4838_v40 = vpop.xlane.xlu1 %718 }
  0xaf   : > { %6633 = vst [vmem:[#allocation5_spill] sm:$0xff] %v4834_v38  ;;  %6634 = vst [vmem:[#allocation6_spill] sm:$0xff] %v4838_v40  ;;  %v1580_v53 = vadd.f32 %v4852_v46, %v4834_v38  ;;  %v1582_v1 = vadd.f32 %v4852_v46, %v4838_v40 }
  0xb2   : > { %v4848_v44 = vpop.xlane.xlu0 %715  ;;  %v4854_v47 = vpop.xlane.xlu1 %721 }
  0xb3   : > { %6635 = vst [vmem:[#allocation7_spill] sm:$0xff] %v4848_v44  ;;  %6636 = vst [vmem:[#allocation8_spill] sm:$0xff] %v4854_v47  ;;  %v1581_v50 = vadd.f32 %v4852_v46, %v4848_v44  ;;  %v1583_v57 = vadd.f32 %v4852_v46, %v4854_v47 }
  0xb6   : > { %v4869_v58 = vpop.xlane.xlu1 %727  ;;  %v4871_v60 = vpop.xlane.xlu0 %724 }
  0xb7   : > { %6638 = vst [vmem:[#allocation10_spill] sm:$0xff] %v4869_v58  ;;  %6639 = vst [vmem:[#allocation11_spill] sm:$0xff] %v4871_v60  ;;  %v1585_v6 = vadd.f32 %v4852_v46, %v4869_v58  ;;  %v1584_v9 = vadd.f32 %v4852_v46, %v4871_v60 }
  0xba   : > { %v4902_v16 = vpop.xlane.xlu1 %733  ;;  %v4907_v24 = vpop.xlane.xlu0 %730 }
  0xbb   : > { %6644 = vst [vmem:[#allocation12_spill] sm:$0xff] %v4902_v16  ;;  %6645 = vst [vmem:[#allocation13_spill] sm:$0xff] %v4907_v24  ;;  %v1587_v31 = vadd.f32 %v4852_v46, %v4902_v16 }
  0xf2   : > { %v4828_v35 = vpop.f32.mrb[0].mxu0 }
  0xf3   : > { %v4830_v36 = vpop.f32.mrb[1].mxu0 }
  0xf6   : > { %v4832_v37 = vpop.f32.mrb[2].mxu0 }
  0xf7   : > { %v4836_v39 = vpop.f32.mrb[3].mxu0 }
  0xfa   : > { %v4840_v41 = vpop.f32.mrb[4].mxu0 }
  0xfb   : > { %v4846_v43 = vpop.f32.mrb[5].mxu0 }
  0xfe   : > { %v4856_v48 = vpop.f32.mrb[6].mxu0 }
  0xff   : > { %v4858_v49 = vpop.f32.mrb[7].mxu0 }
 0x102   : > { %v4234_v52 = vpop.f32.mrb[8].mxu0 }
 0x103   : > { %v1597_v55 = vadd.f32 %v4234_v52, %v1581_v50  ;;  %v1495_v56 = vpop.f32.mrb[9].mxu0  ;;  %v1586_v52 = vadd.f32 %v4852_v46, %v4907_v24 }
 0x104   : > { %v1596_v59 = vadd.f32 %v1580_v53, %v1495_v56  ;;  %v515_v56 = vadd.s32 56, %v4850_v45 }
 0x105   : > { %v1613_v61 = vmax.f32 %v1597_v55, 0.0 }
 0x106   : > { %v1612_v63 = vmax.f32 %v1596_v59, 0.0  ;;  %v4237_v0 = vpop.f32.mrb[10].mxu0  ;;  %vm1699_vm15 = vcmp.eq.s32.totalorder %v4865_v54, %v515_v56 }
 0x107   : > { %v1645_v3 = vand.u32 4294967168, %v1613_v61  ;;  %v1599_v4 = vadd.f32 %v4237_v0, %v1583_v57  ;;  %v1505_v5 = vpop.f32.mrb[11].mxu0  ;;  %vm1716_vm2 = vmor %vm1699_vm15, %vm1708_vm3 }
 0x108   : > { %v1644_v7 = vand.u32 4294967168, %v1612_v63  ;;  %v1598_v8 = vadd.f32 %v1582_v1, %v1505_v5 }
 0x109   : > { %v1661_v11 = vor.u32 %v1645_v3, %v4865_v54  ;;  %v1615_v12 = vmax.f32 %v1599_v4, 0.0 }
 0x10a   : > { %v1660_v17 = vor.u32 %v1644_v7, %v4865_v54  ;;  %v1614_v18 = vmax.f32 %v1598_v8, 0.0  ;;  %v4240_v22 = vpop.f32.mrb[12].mxu0 }
 0x10b   : > { %v1647_v25 = vand.u32 4294967168, %v1615_v12  ;;  %v1601_v26 = vadd.f32 %v4240_v22, %v1585_v6  ;;  %v1515_v27 = vpop.f32.mrb[13].mxu0  ;;  %v4911_v30 = vsel %vm4889_vm5, 3e+38, %v1661_v11  ;;  %v703_v22 = vmul.f32 %v4741_v14, %v4741_v14 }
 0x10c   : > { %6646 = vst [vmem:[#allocation14_spill] sm:$0xff] %v4911_v30  ;;  %v1646_v42 = vand.u32 4294967168, %v1614_v18  ;;  %v1600_v50 = vadd.f32 %v1584_v9, %v1515_v27  ;;  %1759 = vmin.xlane.f32.xlu1 %v4911_v30  ;;  %v4918_v51 = vsel %vm4896_vm6, 3e+38, %v1660_v17  ;;  %v704_v17 = vmul.f32 %v4746_v19, %v4746_v19 }
 0x10d   : > { %6647 = vst [vmem:[#allocation15_spill] sm:$0xff] %v4918_v51  ;;  %v1663_v53 = vor.u32 %v1647_v25, %v4865_v54  ;;  %v1617_v55 = vmax.f32 %v1601_v26, 0.0  ;;  %1757 = vmin.xlane.f32.xlu0 %v4918_v51  ;;  %v706_v27 = vmul.f32 %v4769_v28, %v4769_v28  ;;  %v735_v19 = vsel %vm6592_vm1, %v703_v22, 0.0 }
 0x10e   : > { %v1662_v57 = vor.u32 %v1646_v42, %v4865_v54  ;;  %v1616_v59 = vmax.f32 %v1600_v50, 0.0  ;;  %v4243_v61 = vpop.f32.mrb[14].mxu0  ;;  %v738_v26 = vsel %vm6592_vm1, %v704_v17, 0.0  ;;  %v708_v42 = vmul.f32 %v4784_v32, %v4784_v32 }
 0x10f   : > { %v1649_v63 = vand.u32 4294967168, %v1617_v55  ;;  %v1603_v0 = vadd.f32 %v4243_v61, %v1587_v31  ;;  %v1525_v1 = vpop.f32.mrb[15].mxu0  ;;  %v4937_v3 = vsel %vm1712_vm9, 3e+38, %v1663_v53  ;;  %v705_v31 = vmul.f32 %v4757_v21, %v4757_v21 }
 0x110   : > { %6648 = vst [vmem:[#allocation16_spill] sm:$0xff] %v4937_v3  ;;  %v1648_v4 = vand.u32 4294967168, %v1616_v59  ;;  %v1602_v2 = vadd.f32 %v1586_v52, %v1525_v1  ;;  %1763 = vmin.xlane.f32.xlu1 %v4937_v3  ;;  %v4940_v5 = vsel %vm1711_vm10, 3e+38, %v1662_v57  ;;  %v744_v14 = vsel %vm6592_vm1, %v706_v27, 0.0 }
 0x111   : > { %6649 = vst [vmem:[#allocation17_spill] sm:$0xff] %v4940_v5  ;;  %v1665_v6 = vor.u32 %v1649_v63, %v4865_v54  ;;  %v1619_v7 = vmax.f32 %v1603_v0, 0.0  ;;  %1761 = vmin.xlane.f32.xlu0 %v4940_v5  ;;  %v741_v50 = vsel %vm6592_vm1, %v705_v31, 0.0  ;;  %v707_v52 = vmul.f32 %v4774_v29, %v4774_v29  ;;  %v5007_v0 = vpop.f32.mrb[0].mxu1 }
 0x112   : > { %v1664_v8 = vor.u32 %v1648_v4, %v4865_v54  ;;  %v1618_v9 = vmax.f32 %v1602_v2, 0.0  ;;  %v750_v28 = vsel %vm6592_vm1, %v708_v42, 0.0  ;;  %v710_v53 = vmul.f32 %v4796_v34, %v4796_v34  ;;  %v4246_v29 = vpop.f32.mrb[16].mxu0  ;;  %v5009_v1 = vpop.f32.mrb[1].mxu1 }
 0x113   : > { %v1651_v10 = vand.u32 4294967168, %v1619_v7  ;;  %v4953_v11 = vsel %vm1714_vm13, 3e+38, %v1665_v6  ;;  %v747_v21 = vsel %vm6592_vm1, %v707_v52, 0.0  ;;  %v709_v55 = vmul.f32 %v4788_v33, %v4788_v33  ;;  %v1535_v57 = vpop.f32.mrb[17].mxu0  ;;  %v5011_v4 = vpop.f32.mrb[2].mxu1 }
 0x114   : > { %6650 = vst [vmem:[#allocation18_spill] sm:$0xff] %v4953_v11  ;;  %v1650_v12 = vand.u32 4294967168, %v1618_v9  ;;  %1767 = vmin.xlane.f32.xlu1 %v4953_v11  ;;  %v4956_v13 = vsel %vm1713_vm14, 3e+38, %v1664_v8  ;;  %v756_v32 = vsel %vm6592_vm1, %v710_v53, 0.0  ;;  %v5013_v2 = vpop.f32.mrb[3].mxu1 }
 0x115   : > { %6651 = vst [vmem:[#allocation19_spill] sm:$0xff] %v4956_v13  ;;  %v1667_v15 = vor.u32 %v1651_v10, %v4865_v54  ;;  %1765 = vmin.xlane.f32.xlu0 %v4956_v13  ;;  %v753_v56 = vsel %vm6592_vm1, %v709_v55, 0.0  ;;  %v5015_v6 = vpop.f32.mrb[4].mxu1  ;;  %v5117_v55 = vld [vmem:[%s462_s22] ss:$0 sm:$0xff] }
 0x116   : > { %v1666_v18 = vor.u32 %v1650_v12, %v4865_v54  ;;  %v4995_v59 = vpop.f32.mrb[18].mxu0  ;;  %v5017_v7 = vpop.f32.mrb[5].mxu1 }
 0x117   : > { %v4969_v23 = vsel %vm1716_vm2, 3e+38, %v1667_v15  ;;  %v4997_v61 = vpop.f32.mrb[19].mxu0  ;;  %v5019_v8 = vpop.f32.mrb[6].mxu1 }
 0x118   : > { %6652 = vst [vmem:[#allocation20_spill] sm:$0xff] %v4969_v23  ;;  %1771 = vmin.xlane.f32.xlu1 %v4969_v23  ;;  %v4972_v25 = vsel %vm1715_vm4, 3e+38, %v1666_v18  ;;  %6654 = vst [vmem:[#allocation22_spill] sm:$0xff] %v5019_v8  ;;  %v5021_v9 = vpop.f32.mrb[7].mxu1 }
 0x119   : > { %6653 = vst [vmem:[#allocation21_spill] sm:$0xff] %v4972_v25  ;;  %1769 = vmin.xlane.f32.xlu0 %v4972_v25 }
 0x11a   : > { %v4999_v34 = vpop.f32.mrb[20].mxu0 }
 0x11b   : > { %v5001_v62 = vpop.f32.mrb[21].mxu0 }
 0x11c   : > { %739 = vadd.xlane.f32.xlu1 %v738_v26 }
 0x11d   : > { %736 = vadd.xlane.f32.xlu0 %v735_v19 }
 0x11e   : > { %v5003_v63 = vpop.f32.mrb[22].mxu0 }
 0x11f   : > { %v5005_v33 = vpop.f32.mrb[23].mxu0 }
 0x120   : > { %745 = vadd.xlane.f32.xlu1 %v744_v14 }
 0x121   : > { %742 = vadd.xlane.f32.xlu0 %v741_v50 }
 0x124   : > { %751 = vadd.xlane.f32.xlu1 %v750_v28 }
 0x125   : > { %748 = vadd.xlane.f32.xlu0 %v747_v21 }
 0x128   : > { %757 = vadd.xlane.f32.xlu1 %v756_v32 }
 0x129   : > { %754 = vadd.xlane.f32.xlu0 %v753_v56 }
 0x199   : > { %v5023_v10 = vpop.xlane.xlu1 %1759 }
 0x19a   : > { %6655 = vst [vmem:[#allocation23_spill] sm:$0xff] %v5023_v10  ;;  %vm1790_vm5 = vcmp.eq.f32.partialorder %v4911_v30, %v5023_v10  ;;  %v5027_v12 = vpop.xlane.xlu0 %1757 }
 0x19b   : > { %6656 = vst [vmem:[#allocation24_spill] sm:$0xff] %v5027_v12  ;;  %vm1789_vm6 = vcmp.eq.f32.partialorder %v4918_v51, %v5027_v12  ;;  %v5035_v15 = vsel %vm1790_vm5, 3e+38, %v4911_v30  ;;  %v520_v12 = vadd.s32 96, %v4850_v45 }
 0x19c   : > { %2224 = vmin.xlane.f32.xlu1 %v5035_v15  ;;  %v5042_v17 = vsel %vm1789_vm6, 3e+38, %v4918_v51 }
 0x19d   : > { %v5044_v18 = vpop.xlane.xlu1 %1763  ;;  %2222 = vmin.xlane.f32.xlu0 %v5042_v17 }
 0x19e   : > { %6657 = vst [vmem:[#allocation25_spill] sm:$0xff] %v5044_v18  ;;  %vm1792_vm7 = vcmp.eq.f32.partialorder %v4937_v3, %v5044_v18  ;;  %v5049_v22 = vpop.xlane.xlu0 %1761 }
 0x19f   : > { %6658 = vst [vmem:[#allocation26_spill] sm:$0xff] %v5049_v22  ;;  %vm1791_vm8 = vcmp.eq.f32.partialorder %v4940_v5, %v5049_v22  ;;  %v5057_v26 = vsel %vm1792_vm7, 3e+38, %v4937_v3  ;;  %v519_v22 = vadd.s32 88, %v4850_v45 }
 0x1a0   : > { %2228 = vmin.xlane.f32.xlu1 %v5057_v26  ;;  %v5064_v27 = vsel %vm1791_vm8, 3e+38, %v4940_v5 }
 0x1a1   : > { %v5066_v19 = vpop.xlane.xlu1 %1767  ;;  %2226 = vmin.xlane.f32.xlu0 %v5064_v27  ;;  %vm1703_vm2 = vcmp.eq.s32.totalorder %v4865_v54, %v519_v22 }
 0x1a2   : > { %6659 = vst [vmem:[#allocation27_spill] sm:$0xff] %v5066_v19  ;;  %vm1794_vm9 = vcmp.eq.f32.partialorder %v4953_v11, %v5066_v19  ;;  %v5071_v31 = vpop.xlane.xlu0 %1765  ;;  %v962_v19 = vadd.f32 %v5117_v55, %v4834_v38  ;;  %v521_v38 = vadd.s32 104, %v4850_v45 }
 0x1a3   : > { %6660 = vst [vmem:[#allocation28_spill] sm:$0xff] %v5071_v31  ;;  %vm1793_vm10 = vcmp.eq.f32.partialorder %v4956_v13, %v5071_v31  ;;  %v5079_v14 = vsel %vm1794_vm9, 3e+38, %v4953_v11 }
 0x1a4   : > { %2232 = vmin.xlane.f32.xlu1 %v5079_v14  ;;  %v5086_v42 = vsel %vm1793_vm10, 3e+38, %v4956_v13 }
 0x1a5   : > { %v5088_v50 = vpop.xlane.xlu1 %1771  ;;  %2230 = vmin.xlane.f32.xlu0 %v5086_v42 }
 0x1a6   : > { %6661 = vst [vmem:[#allocation29_spill] sm:$0xff] %v5088_v50  ;;  %vm1796_vm11 = vcmp.eq.f32.partialorder %v4969_v23, %v5088_v50  ;;  %v5093_v52 = vpop.xlane.xlu0 %1769  ;;  %v517_v50 = vadd.s32 72, %v4850_v45 }
 0x1a7   : > { %6662 = vst [vmem:[#allocation30_spill] sm:$0xff] %v5093_v52  ;;  %vm1795_vm12 = vcmp.eq.f32.partialorder %v4972_v25, %v5093_v52  ;;  %v5105_v28 = vsel %vm1796_vm11, 3e+38, %v4969_v23  ;;  %v516_v52 = vadd.s32 64, %v4850_v45 }
 0x1a8   : > { %2236 = vmin.xlane.f32.xlu1 %v5105_v28  ;;  %v5112_v53 = vsel %vm1795_vm12, 3e+38, %v4972_v25  ;;  %vm1701_vm13 = vcmp.eq.s32.totalorder %v4865_v54, %v517_v50  ;;  %v978_v50 = vadd.f32 %v962_v19, %v4830_v36 }
 0x1a9   : > { %v5114_v21 = vpop.xlane.xlu1 %739  ;;  %2234 = vmin.xlane.f32.xlu0 %v5112_v53  ;;  %vm1700_vm14 = vcmp.eq.s32.totalorder %v4865_v54, %v516_v52  ;;  %vm1718_vm15 = vmor %vm1701_vm13, %vm1708_vm3  ;;  %vm1705_vm13 = vcmp.eq.s32.totalorder %v4865_v54, %v521_v38 }
 0x1aa   : > { %v5119_v32 = vpop.xlane.xlu0 %736  ;;  %v1589_v56 = vadd.f32 %v4852_v46, %v5114_v21  ;;  %vm1717_vm0 = vmor %vm1700_vm14, %vm1708_vm3 }
 0x1ab   : > { %v1588_v23 = vadd.f32 %v4852_v46, %v5119_v32  ;;  %vm5178_vm14 = vmor %vm1703_vm2, %vm1708_vm3 }
 0x1ac   : > { %v1605_v25 = vadd.f32 %v4246_v29, %v1589_v56  ;;  %vm1722_vm2 = vmor %vm1705_vm13, %vm1708_vm3 }
 0x1ad   : > { %v1604_v11 = vadd.f32 %v1588_v23, %v1535_v57  ;;  %v5129_v31 = vpop.xlane.xlu1 %745  ;;  %v518_v23 = vadd.s32 80, %v4850_v45 }
 0x1ae   : > { %v1621_v13 = vmax.f32 %v1605_v25, 0.0  ;;  %v5131_v18 = vpop.xlane.xlu0 %742  ;;  %v1591_v3 = vadd.f32 %v4852_v46, %v5129_v31  ;;  %v963_v25 = vadd.f32 %v5117_v55, %v4848_v44 }
 0x1af   : > { %v1620_v5 = vmax.f32 %v1604_v11, 0.0  ;;  %v1590_v29 = vadd.f32 %v4852_v46, %v5131_v18  ;;  %vm1702_vm4 = vcmp.eq.s32.totalorder %v4865_v54, %v518_v23  ;;  %v994_v23 = vmax.f32 %v978_v50, 0.0 }
 0x1b0   : > { %v1653_v57 = vand.u32 4294967168, %v1621_v13  ;;  %v1607_v56 = vadd.f32 %v4995_v59, %v1591_v3 }
 0x1b1   : > { %v1652_v10 = vand.u32 4294967168, %v1620_v5  ;;  %v1606_v11 = vadd.f32 %v1590_v29, %v4997_v61  ;;  %v5147_v30 = vpop.xlane.xlu1 %751 }
 0x1b2   : > { %v1669_v51 = vor.u32 %v1653_v57, %v4865_v54  ;;  %v1623_v44 = vmax.f32 %v1607_v56, 0.0  ;;  %v5153_v13 = vpop.xlane.xlu0 %748  ;;  %v1593_v3 = vadd.f32 %v4852_v46, %v5147_v30 }
 0x1b3   : > { %v1668_v36 = vor.u32 %v1652_v10, %v4865_v54  ;;  %v1622_v5 = vmax.f32 %v1606_v11, 0.0  ;;  %v1592_v59 = vadd.f32 %v4852_v46, %v5153_v13  ;;  %v523_v11 = vadd.s32 120, %v4850_v45 }
 0x1b4   : > { %v1655_v61 = vand.u32 4294967168, %v1623_v44  ;;  %v1609_v19 = vadd.f32 %v4999_v34, %v1593_v3  ;;  %v5167_v29 = vsel %vm1718_vm15, 3e+38, %v1669_v51  ;;  %vm1704_vm15 = vcmp.eq.s32.totalorder %v4865_v54, %v520_v12 }
 0x1b5   : > { %6663 = vst [vmem:[#allocation31_spill] sm:$0xff] %v5167_v29  ;;  %v1654_v57 = vand.u32 4294967168, %v1622_v5  ;;  %v1608_v52 = vadd.f32 %v1592_v59, %v5001_v62  ;;  %1775 = vmin.xlane.f32.xlu1 %v5167_v29  ;;  %v5172_v22 = vpop.xlane.xlu1 %757  ;;  %v5174_v10 = vsel %vm1717_vm0, 3e+38, %v1668_v36  ;;  %vm1719_vm0 = vmor %vm1702_vm4, %vm1708_vm3  ;;  %v522_v59 = vadd.s32 112, %v4850_v45 }
 0x1b6   : > { %6664 = vst [vmem:[#allocation32_spill] sm:$0xff] %v5172_v22  ;;  %6665 = vst [vmem:[#allocation33_spill] sm:$0xff] %v5174_v10  ;;  %v1671_v44 = vor.u32 %v1655_v61, %v4865_v54  ;;  %v1625_v51 = vmax.f32 %v1609_v19, 0.0  ;;  %1773 = vmin.xlane.f32.xlu0 %v5174_v10  ;;  %v5185_v34 = vpop.xlane.xlu0 %754  ;;  %v1595_v62 = vadd.f32 %v4852_v46, %v5172_v22  ;;  %vm1010_vm4 = vcmp.lt.s32.totalorder %v4865_v54, 64 }
 0x1b7   : > { %v1670_v3 = vor.u32 %v1654_v57, %v4865_v54  ;;  %v1624_v36 = vmax.f32 %v1608_v52, 0.0  ;;  %v1594_v5 = vadd.f32 %v4852_v46, %v5185_v34  ;;  %v979_v61 = vadd.f32 %v4828_v35, %v963_v25 }
 0x1b8   : > { %v1657_v19 = vand.u32 4294967168, %v1625_v51  ;;  %v1611_v29 = vadd.f32 %v5003_v63, %v1595_v62  ;;  %v5202_v10 = vsel %vm5178_vm14, 3e+38, %v1671_v44  ;;  %vm1721_vm14 = vmor %vm1704_vm15, %vm1708_vm3  ;;  %vm1706_vm1 = vcmp.eq.s32.totalorder %v4865_v54, %v522_v59 }
 0x1b9   : > { %v1656_v8 = vand.u32 4294967168, %v1624_v36  ;;  %v1610_v22 = vadd.f32 %v1594_v5, %v5005_v33  ;;  %1779 = vmin.xlane.f32.xlu1 %v5202_v10  ;;  %v5206_v57 = vsel %vm1719_vm0, 3e+38, %v1670_v3  ;;  %vm1707_vm0 = vcmp.eq.s32.totalorder %v4865_v54, %v523_v11  ;;  %vm1723_vm15 = vmor %vm1706_vm1, %vm1708_vm3  ;;  %v502_v36 = vld [vmem:[%s459_s11] sm:$0x7]  ;;  %s3685_s11 = sshll.u32 %s423_s26, 4  ;;  %s6515_s11 = int_to_ptr.vmem [resolvable:$true] %s3685_s11 }
 0x1ba   : > { %v1673_v35 = vor.u32 %v1657_v19, %v4865_v54  ;;  %v1627_v45 = vmax.f32 %v1611_v29, 0.0  ;;  %1777 = vmin.xlane.f32.xlu0 %v5206_v57  ;;  %v995_v25 = vmax.f32 %v979_v61, 0.0  ;;  %v5226_v50 = vsel %vm1010_vm4, %v994_v23, 3e+38  ;;  %vm1724_vm13 = vmor %vm1707_vm0, %vm1708_vm3  ;;  %4204 = vmatprep.subr.mxu1 %v502_v36  ;;  %s4499_s20 = scalar_lea.vmem %s6515_s11, 128 }
 0x1bb   : > { %v1672_v46 = vor.u32 %v1656_v8, %v4865_v54  ;;  %v1626_v63 = vmax.f32 %v1610_v22, 0.0  ;;  %6668 = vst [vmem:[#allocation34_spill] sm:$0xff] %v5226_v50  ;;  %v1153_v56 = vand.u32 4294967168, %v5226_v50  ;;  %4205 = vmatpush3.xpose.msra.mxu1 %v502_v36  ;;  %v964_v5 = vadd.f32 %v5117_v55, %v4838_v40  ;;  %p4500_p12 = scmp.ne.s32.totalorder %s6515_s11, %s4499_s20 }
 0x1bc   : > { %v1659_v38 = vand.u32 4294967168, %v1627_v45  ;;  %v5222_v33 = vsel %vm1722_vm2, 3e+38, %v1673_v35  ;;  %v5243_v44 = vsel %vm1010_vm4, %v995_v25, 3e+38  ;;  %4256 = vmatprep.subr.mxu1 %v4752_v20  ;;  %v965_v59 = vadd.f32 %v5117_v55, %v4854_v47 }
 0x1bd   : > { %v1658_v29 = vand.u32 4294967168, %v1626_v63  ;;  %1783 = vmin.xlane.f32.xlu1 %v5222_v33  ;;  %v5229_v12 = vsel %vm1721_vm14, 3e+38, %v1672_v46  ;;  %6669 = vst [vmem:[#allocation35_spill] sm:$0xff] %v5243_v44  ;;  %v5250_v62 = vor.u32 %v1153_v56, %v4865_v54  ;;  %v1154_v11 = vand.u32 4294967168, %v5243_v44  ;;  %p4501_p13 = pnand %p4500_p12, %p4666_p4 }
 0x1be   : > { %v1675_v8 = vor.u32 %v1659_v38, %v4865_v54  ;;  %1781 = vmin.xlane.f32.xlu0 %v5229_v12  ;;  %v980_v61 = vadd.f32 %v964_v5, %v4836_v39  ;;  %v981_v19 = vadd.f32 %v4832_v37, %v965_v59  ;;  %v966_v35 = vadd.f32 %v5117_v55, %v4871_v60 }
 0x1bf   : > { %v1674_v52 = vor.u32 %v1658_v29, %v4865_v54  ;;  %v5255_v3 = vor.u32 %v1154_v11, %v4865_v54  ;;  %v968_v38 = vadd.f32 %v5117_v55, %v4907_v24  ;;  %v6594_v29 = vmov 1.0   ;;  %p4502_p0 = pneg %p4501_p13 }
 0x1c0   : > { %v5238_v22 = vsel %vm1724_vm13, 3e+38, %v1675_v8  ;;  %v996_v23 = vmax.f32 %v980_v61, 0.0  ;;  %v997_v46 = vmax.f32 %v981_v19, 0.0  ;;  %v982_v39 = vadd.f32 %v966_v35, %v4846_v43 }
 0x1c1   : > { %1787 = vmin.xlane.f32.xlu1 %v5238_v22  ;;  %v5246_v51 = vsel %vm1723_vm15, 3e+38, %v1674_v52  ;;  %v967_v43 = vadd.f32 %v5117_v55, %v4869_v58  ;;  %v970_v59 = vadd.f32 %v5117_v55, %v5119_v32 }
 0x1c2   : > { %1785 = vmin.xlane.f32.xlu0 %v5246_v51  ;;  %v5280_v37 = vsel %vm1010_vm4, %v996_v23, 3e+38  ;;  %v998_v5 = vmax.f32 %v982_v39, 0.0 }
 0x1c3   : > { %6670 = vst [vmem:[#allocation36_spill] sm:$0xff] %v5280_v37  ;;  %v1155_v36 = vand.u32 4294967168, %v5280_v37 }
 0x1c6   : > { %1201 = vmin.xlane.f32.xlu0 %v5250_v62 }
 0x1ca   : > { %1203 = vmin.xlane.f32.xlu0 %v5255_v3 }
 0x229   : > { %v2225_v45 = vpop.xlane.xlu1 %2224 }
 0x22a   : > { %vm2255_vm1 = vcmp.eq.f32.partialorder %v5035_v15, %v2225_v45  ;;  %v2223_v63 = vpop.xlane.xlu0 %2222  ;;  %v5323_v45 = vor.u32 %v1155_v36, %v4865_v54  ;;  %v974_v36 = vadd.f32 %v5117_v55, %v5153_v13 }
 0x22b   : > { %vm2254_vm3 = vcmp.eq.f32.partialorder %v5042_v17, %v2223_v63  ;;  %v5276_v25 = vsel %vm2255_vm1, 3e+38, %v5035_v15  ;;  %v5292_v15 = vsel %vm1010_vm4, %v997_v46, 3e+38  ;;  %v986_v46 = vadd.f32 %v970_v59, %v5009_v1 }
 0x22c   : > { %2689 = vmin.xlane.f32.xlu1 %v5276_v25  ;;  %4284 = vmatprep.mubr.msk.f32.mxu0 %vm2254_vm3, %v6594_v29  ;;  %v5286_v8 = vsel %vm2254_vm3, 3e+38, %v5042_v17  ;;  %6671 = vst [vmem:[#allocation37_spill] sm:$0xff] %v5292_v15  ;;  %v984_v17 = vadd.f32 %v968_v38, %v4858_v49  ;;  %v983_v49 = vadd.f32 %v4840_v41, %v967_v43  ;;  %v1156_v23 = vand.u32 4294967168, %v5292_v15 }
 0x22d   : > { %v2229_v52 = vpop.xlane.xlu1 %2228  ;;  %2687 = vmin.xlane.f32.xlu0 %v5286_v8  ;;  %4285 = vmatmul.mubr.msk.f32.vlgmr.msra.gmra.mrb[24].mxu0 %vm2255_vm1, %v6594_v29  ;;  %v5327_v41 = vsel %vm1010_vm4, %v998_v5, 3e+38  ;;  %v972_v63 = vadd.f32 %v5117_v55, %v5131_v18  ;;  %v971_v1 = vadd.f32 %v5117_v55, %v5114_v21 }
 0x22e   : > { %vm2257_vm2 = vcmp.eq.f32.partialorder %v5057_v26, %v2229_v52  ;;  %v2227_v56 = vpop.xlane.xlu0 %2226  ;;  %4335 = vmatpush3.xpose.msra.mxu0 %v4752_v20  ;;  %v1000_v35 = vmax.f32 %v984_v17, 0.0  ;;  %6672 = vst [vmem:[#allocation38_spill] sm:$0xff] %v5327_v41  ;;  %v999_v38 = vmax.f32 %v983_v49, 0.0  ;;  %v5342_v18 = vor.u32 %v1156_v23, %v4865_v54 }
 0x22f   : > { %vm2256_vm14 = vcmp.eq.f32.partialorder %v5064_v27, %v2227_v56  ;;  %v5301_v11 = vsel %vm2257_vm2, 3e+38, %v5057_v26  ;;  %v969_v26 = vadd.f32 %v5117_v55, %v4902_v16  ;;  %v1002_v17 = vmax.f32 %v986_v46, 0.0 }
 0x230   : > { %2693 = vmin.xlane.f32.xlu1 %v5301_v11  ;;  %4287 = vmatprep.mubr.msk.f32.mxu0 %vm2256_vm14, %v6594_v29  ;;  %v5309_v61 = vsel %vm2256_vm14, 3e+38, %v5064_v27  ;;  %v5346_v43 = vsel %vm1010_vm4, %v1000_v35, 3e+38  ;;  %v988_v21 = vadd.f32 %v972_v63, %v5013_v2  ;;  %v987_v5 = vadd.f32 %v5007_v0, %v971_v1 }
 0x231   : > { %v2233_v19 = vpop.xlane.xlu1 %2232  ;;  %2691 = vmin.xlane.f32.xlu0 %v5309_v61  ;;  %4288 = vmatmul.mubr.msk.f32.gmra.mrb[26].mxu0 %vm2257_vm2, %v6594_v29  ;;  %v985_v39 = vadd.f32 %v4856_v48, %v969_v26  ;;  %6673 = vst [vmem:[#allocation39_spill] sm:$0xff] %v5346_v43  ;;  %v1157_v48 = vand.u32 4294967168, %v5327_v41  ;;  %v973_v2 = vadd.f32 %v5117_v55, %v5129_v31  ;;  %v5370_v13 = vsel %vm1010_vm4, %v999_v38, 3e+38 }
 0x232   : > { %vm2259_vm0 = vcmp.eq.f32.partialorder %v5079_v14, %v2233_v19  ;;  %v2231_v32 = vpop.xlane.xlu0 %2230  ;;  %6674 = vst [vmem:[#allocation40_spill] sm:$0xff] %v5370_v13  ;;  %v1159_v49 = vand.u32 4294967168, %v5346_v43  ;;  %v1019_v26 = vsel %vm1010_vm4, %v1002_v17, 3e+38  ;;  %v990_v0 = vadd.f32 %v974_v36, %v5017_v7 }
 0x233   : > { %vm2258_vm13 = vcmp.eq.f32.partialorder %v5086_v42, %v2231_v32  ;;  %v5320_v27 = vsel %vm2259_vm0, 3e+38, %v5079_v14  ;;  %v5376_v19 = vor.u32 %v1157_v48, %v4865_v54  ;;  %v1004_v32 = vmax.f32 %v988_v21, 0.0  ;;  %v6676_v21 = vld [vmem:[#allocation32_spill] sm:$0xff] }
 0x234   : > { %2697 = vmin.xlane.f32.xlu1 %v5320_v27  ;;  %4290 = vmatprep.mubr.msk.f32.mxu0 %vm2258_vm13, %v6594_v29  ;;  %v5352_v56 = vsel %vm2258_vm13, 3e+38, %v5086_v42  ;;  %v1001_v42 = vmax.f32 %v985_v39, 0.0  ;;  %v976_v31 = vadd.f32 %v5117_v55, %v5185_v34  ;;  %v1003_v23 = vmax.f32 %v987_v5, 0.0 }
 0x235   : > { %v2237_v14 = vpop.xlane.xlu1 %2236  ;;  %1205 = vmin.xlane.f32.xlu0 %v5323_v45  ;;  %4291 = vmatmul.mubr.msk.f32.gmra.mrb[28].mxu0 %vm2259_vm0, %v6594_v29  ;;  %v989_v35 = vadd.f32 %v5011_v4, %v973_v2  ;;  %v1158_v46 = vand.u32 4294967168, %v5370_v13  ;;  %v1161_v63 = vand.u32 4294967168, %v1019_v26  ;;  %v975_v7 = vadd.f32 %v5117_v55, %v5147_v30 }
 0x236   : > { %v2235_v52 = vpop.xlane.xlu0 %2234  ;;  %vm2261_vm1 = vcmp.eq.f32.partialorder %v5105_v28, %v2237_v14  ;;  %v5400_v38 = vor.u32 %v1159_v49, %v4865_v54  ;;  %v1021_v39 = vsel %vm1010_vm4, %v1004_v32, 3e+38  ;;  %v1006_v1 = vmax.f32 %v990_v0, 0.0  ;;  %v6677_v0 = vld [vmem:[#allocation22_spill] sm:$0xff] }
 0x237   : > { %vm2260_vm15 = vcmp.eq.f32.partialorder %v5112_v53, %v2235_v52  ;;  %v5397_v34 = vsel %vm2261_vm1, 3e+38, %v5105_v28  ;;  %v992_v4 = vadd.f32 %v976_v31, %v5021_v9  ;;  %v1020_v30 = vsel %vm1010_vm4, %v1003_v23, 3e+38 }
 0x238   : > { %2695 = vmin.xlane.f32.xlu1 %v5352_v56  ;;  %4293 = vmatprep.mubr.msk.f32.mxu0 %vm2260_vm15, %v6594_v29  ;;  %v5373_v59 = vsel %vm2260_vm15, 3e+38, %v5112_v53  ;;  %v5388_v53 = vsel %vm1010_vm4, %v1001_v42, 3e+38  ;;  %v1005_v52 = vmax.f32 %v989_v35, 0.0  ;;  %v5410_v28 = vor.u32 %v1158_v46, %v4865_v54 }
 0x239   : > { %1207 = vmin.xlane.f32.xlu0 %v5342_v18  ;;  %4294 = vmatmul.mubr.msk.f32.gmra.mrb[30].mxu0 %vm2261_vm1, %v6594_v29  ;;  %6675 = vst [vmem:[#allocation41_spill] sm:$0xff] %v5388_v53  ;;  %v1160_v14 = vand.u32 4294967168, %v5388_v53  ;;  %v1163_v48 = vand.u32 4294967168, %v1021_v39  ;;  %v991_v17 = vadd.f32 %v5015_v6, %v975_v7  ;;  %v977_v36 = vadd.f32 %v5117_v55, %v6676_v21 }
 0x23a   : > { %v5419_v42 = vor.u32 %v1161_v63, %v4865_v54  ;;  %v1023_v5 = vsel %vm1010_vm4, %v1006_v1, 3e+38  ;;  %v1008_v2 = vmax.f32 %v992_v4, 0.0  ;;  %v1162_v49 = vand.u32 4294967168, %v1020_v30 }
 0x23b   : > { %v1022_v6 = vsel %vm1010_vm4, %v1005_v52, 3e+38  ;;  %v5428_v26 = vor.u32 %v1160_v14, %v4865_v54  ;;  %v1007_v55 = vmax.f32 %v991_v17, 0.0  ;;  %v1165_v32 = vand.u32 4294967168, %v1023_v5 }
 0x23c   : > { %2699 = vmin.xlane.f32.xlu1 %v5373_v59  ;;  %v993_v31 = vadd.f32 %v6677_v0, %v977_v36  ;;  %v5434_v35 = vor.u32 %v1163_v48, %v4865_v54  ;;  %v1025_v46 = vsel %vm1010_vm4, %v1008_v2, 3e+38  ;;  %v1164_v63 = vand.u32 4294967168, %v1022_v6  ;;  %v6678_v2 = vld [vmem:[#allocation33_spill] sm:$0xff] }
 0x23d   : > { %1209 = vmin.xlane.f32.xlu0 %v5376_v19  ;;  %v5441_v7 = vor.u32 %v1162_v49, %v4865_v54  ;;  %v1024_v39 = vsel %vm1010_vm4, %v1007_v55, 3e+38  ;;  %v1167_v4 = vand.u32 4294967168, %v1025_v46  ;;  %v5448_v52 = vor.u32 %v1165_v32, %v4865_v54  ;;  %v6679_v46 = vld [vmem:[#allocation31_spill] sm:$0xff] }
 0x23e   : > { %v1009_v1 = vmax.f32 %v993_v31, 0.0  ;;  %v1166_v14 = vand.u32 4294967168, %v1024_v39  ;;  %v5453_v48 = vor.u32 %v1164_v63, %v4865_v54  ;;  %v6680_v43 = vmov 1.0  }
 0x23f   : > { %v5462_v5 = vor.u32 %v1167_v4, %v4865_v54 }
 0x240   : > { %2701 = vmin.xlane.f32.xlu1 %v5397_v34  ;;  %v1026_v17 = vsel %vm1010_vm4, %v1009_v1, 3e+38  ;;  %v5469_v6 = vor.u32 %v1166_v14, %v4865_v54 }
 0x241   : > { %1213 = vmin.xlane.f32.xlu0 %v5400_v38  ;;  %v1168_v49 = vand.u32 4294967168, %v1026_v17 }
 0x242   : > { %v5457_v21 = vpop.xlane.xlu1 %1775 }
 0x243   : > { %v5416_v9 = vpop.xlane.xlu0 %1773  ;;  %v5486_v31 = vor.u32 %v1168_v49, %v4865_v54  ;;  %vm1798_vm14 = vcmp.eq.f32.partialorder %v6679_v46, %v5457_v21 }
 0x244   : > { %1211 = vmin.xlane.f32.xlu1 %v5410_v28  ;;  %vm1797_vm3 = vcmp.eq.f32.partialorder %v6678_v2, %v5416_v9 }
 0x245   : > { %1217 = vmin.xlane.f32.xlu0 %v5419_v42  ;;  %v5477_v32 = vsel %vm1797_vm3, 3e+38, %v6678_v2 }
 0x246   : > { %v5479_v0 = vpop.xlane.xlu1 %1779 }
 0x247   : > { %v5431_v23 = vpop.xlane.xlu0 %1777  ;;  %vm6623_vm15 = vcmp.eq.f32.partialorder %v5202_v10, %v5479_v0 }
 0x248   : > { %1215 = vmin.xlane.f32.xlu1 %v5428_v26  ;;  %vm6626_vm2 = vcmp.eq.f32.partialorder %v5206_v57, %v5431_v23 }
 0x249   : > { %1221 = vmin.xlane.f32.xlu0 %v5434_v35  ;;  %v5496_v63 = vsel %vm6626_vm2, 3e+38, %v5206_v57 }
 0x24a   : > { %v5503_v39 = vpop.xlane.xlu1 %1783 }
 0x24b   : > { %v5445_v30 = vpop.xlane.xlu0 %1781 }
 0x24c   : > { %1219 = vmin.xlane.f32.xlu1 %v5441_v7  ;;  %vm6614_vm13 = vcmp.eq.f32.partialorder %v5229_v12, %v5445_v30 }
 0x24d   : > { %1225 = vmin.xlane.f32.xlu0 %v5448_v52  ;;  %v5519_v1 = vsel %vm6614_vm13, 3e+38, %v5229_v12 }
 0x24e   : > { %v5539_v14 = vpop.xlane.xlu1 %1787 }
 0x24f   : > { %v5459_v36 = vpop.xlane.xlu0 %1785 }
 0x250   : > { %1223 = vmin.xlane.f32.xlu1 %v5453_v48  ;;  %vm6593_vm1 = vcmp.eq.f32.partialorder %v5246_v51, %v5459_v36 }
 0x251   : > { %1229 = vmin.xlane.f32.xlu0 %v5462_v5  ;;  %v5537_v4 = vsel %vm6593_vm1, 3e+38, %v5246_v51 }
 0x253   : > { %v1202_v55 = vpop.xlane.xlu0 %1201 }
 0x254   : > { %vm1233_vm4 = vcmp.eq.f32.partialorder %v5250_v62, %v1202_v55  ;;  %1227 = vmin.xlane.f32.xlu1 %v5469_v6 }
 0x255   : > { %2238 = vmin.xlane.f32.xlu0 %v5477_v32  ;;  %4206 = vmatprep.mubr.msk.f32.mxu1 %vm1233_vm4, %v6594_v29  ;;  %vm6596_vm4 = vcmp.eq.f32.partialorder %v5222_v33, %v5503_v39 }
 0x256   : > { %v5546_v17 = vsel %vm6596_vm4, 3e+38, %v5222_v33 }
 0x257   : > { %v1204_v62 = vpop.xlane.xlu0 %1203 }
 0x258   : > { %vm1234_vm0 = vcmp.eq.f32.partialorder %v5255_v3, %v1204_v62  ;;  %1231 = vmin.xlane.f32.xlu1 %v5486_v31  ;;  %v5509_v3 = vsel %vm1798_vm14, 3e+38, %v6679_v46 }
 0x259   : > { %2242 = vmin.xlane.f32.xlu0 %v5496_v63  ;;  %4207 = vmatmul.mubr.msk.f32.vlgmr.msra.gmra.mrb[8].mxu1 %vm1234_vm0, %v6594_v29  ;;  %vm6603_vm0 = vcmp.eq.f32.partialorder %v5238_v22, %v5539_v14 }
 0x25a   : > { %4257 = vmatpush3.xpose.msra.mxu1 %v4752_v20  ;;  %v5555_v49 = vsel %vm6603_vm0, 3e+38, %v5238_v22 }
 0x25b   : > { %4308 = vmatprep.subr.mxu1 %v4752_v20  ;;  %v5528_v20 = vsel %vm6623_vm15, 3e+38, %v5202_v10 }
 0x25c   : > { %2240 = vmin.xlane.f32.xlu1 %v5509_v3 }
 0x25d   : > { %2246 = vmin.xlane.f32.xlu0 %v5519_v1 }
 0x260   : > { %2244 = vmin.xlane.f32.xlu1 %v5528_v20 }
 0x261   : > { %2250 = vmin.xlane.f32.xlu0 %v5537_v4 }
 0x264   : > { %2248 = vmin.xlane.f32.xlu1 %v5546_v17 }
 0x268   : > { %2252 = vmin.xlane.f32.xlu1 %v5555_v49 }
 0x2b9   : > { %v5558_v55 = vpop.xlane.xlu1 %2689 }
 0x2ba   : > { %v5560_v62 = vpop.xlane.xlu0 %2687  ;;  %vm6601_vm1 = vcmp.eq.f32.partialorder %v5276_v25, %v5558_v55 }
 0x2bb   : > { %v5568_v29 = vsel %vm6601_vm1, 3e+38, %v5276_v25  ;;  %vm6608_vm4 = vcmp.eq.f32.partialorder %v5286_v8, %v5560_v62 }
 0x2bc   : > { %3154 = vmin.xlane.f32.xlu1 %v5568_v29  ;;  %v5577_v54 = vsel %vm6608_vm4, 3e+38, %v5286_v8 }
 0x2bd   : > { %v5579_v16 = vpop.xlane.xlu1 %2693  ;;  %3152 = vmin.xlane.f32.xlu0 %v5577_v54 }
 0x2be   : > { %v5582_v40 = vpop.xlane.xlu0 %2691  ;;  %vm6607_vm1 = vcmp.eq.f32.partialorder %v5301_v11, %v5579_v16 }
 0x2bf   : > { %v5590_v47 = vsel %vm6607_vm1, 3e+38, %v5301_v11  ;;  %vm6613_vm0 = vcmp.eq.f32.partialorder %v5309_v61, %v5582_v40 }
 0x2c0   : > { %3158 = vmin.xlane.f32.xlu1 %v5590_v47  ;;  %v5599_v24 = vsel %vm6613_vm0, 3e+38, %v5309_v61 }
 0x2c1   : > { %v5601_v60 = vpop.xlane.xlu1 %2697  ;;  %3156 = vmin.xlane.f32.xlu0 %v5599_v24 }
 0x2c2   : > { %v1206_v58 = vpop.xlane.xlu0 %1205  ;;  %vm6616_vm1 = vcmp.eq.f32.partialorder %v5320_v27, %v5601_v60 }
 0x2c3   : > { %vm1235_vm4 = vcmp.eq.f32.partialorder %v5323_v45, %v1206_v58  ;;  %v5611_v53 = vsel %vm6616_vm1, 3e+38, %v5320_v27 }
 0x2c4   : > { %3162 = vmin.xlane.f32.xlu1 %v5611_v53  ;;  %4209 = vmatprep.mubr.msk.f32.mxu1 %vm1235_vm4, %v6680_v43 }
 0x2c5   : > { %v5615_v13 = vpop.xlane.xlu1 %2695 }
 0x2c6   : > { %v1208_v41 = vpop.xlane.xlu0 %1207  ;;  %vm6621_vm0 = vcmp.eq.f32.partialorder %v5352_v56, %v5615_v13 }
 0x2c7   : > { %vm1236_vm13 = vcmp.eq.f32.partialorder %v5342_v18, %v1208_v41  ;;  %v5624_v58 = vsel %vm6621_vm0, 3e+38, %v5352_v56 }
 0x2c8   : > { %3160 = vmin.xlane.f32.xlu0 %v5624_v58  ;;  %4210 = vmatmul.mubr.msk.f32.gmra.mrb[10].mxu1 %vm1236_vm13, %v6680_v43 }
 0x2c9   : > { %v5628_v45 = vpop.xlane.xlu1 %2699 }
 0x2ca   : > { %v1210_v15 = vpop.xlane.xlu0 %1209  ;;  %vm6618_vm4 = vcmp.eq.f32.partialorder %v5373_v59, %v5628_v45 }
 0x2cb   : > { %vm1237_vm1 = vcmp.eq.f32.partialorder %v5376_v19, %v1210_v15  ;;  %v5637_v41 = vsel %vm6618_vm4, 3e+38, %v5373_v59 }
 0x2cc   : > { %6681 = vst [vmem:[#allocation32_spill] sm:$0xff] %v5637_v41  ;;  %3164 = vmin.xlane.f32.xlu0 %v5637_v41  ;;  %4212 = vmatprep.mubr.msk.f32.mxu1 %vm1237_vm1, %v6680_v43 }
 0x2cd   : > { %v5641_v18 = vpop.xlane.xlu1 %2701 }
 0x2ce   : > { %v1214_v50 = vpop.xlane.xlu0 %1213  ;;  %vm6625_vm13 = vcmp.eq.f32.partialorder %v5397_v34, %v5641_v18 }
 0x2cf   : > { %v5649_v15 = vsel %vm6625_vm13, 3e+38, %v5397_v34  ;;  %vm1239_vm1 = vcmp.eq.f32.partialorder %v5400_v38, %v1214_v50 }
 0x2d0   : > { %6682 = vst [vmem:[#allocation22_spill] sm:$0xff] %v5649_v15  ;;  %3166 = vmin.xlane.f32.xlu1 %v5649_v15 }
 0x2d1   : > { %v1212_v19 = vpop.xlane.xlu1 %1211 }
 0x2d2   : > { %vm1238_vm4 = vcmp.eq.f32.partialorder %v5410_v28, %v1212_v19  ;;  %v1218_v37 = vpop.xlane.xlu0 %1217 }
 0x2d3   : > { %4213 = vmatmul.mubr.msk.f32.gmra.mrb[12].mxu1 %vm1238_vm4, %v6680_v43  ;;  %vm1241_vm15 = vcmp.eq.f32.partialorder %v5419_v42, %v1218_v37 }
 0x2d4   : > { %4215 = vmatprep.mubr.msk.f32.mxu1 %vm1239_vm1, %v6680_v43 }
 0x2d5   : > { %v1216_v44 = vpop.xlane.xlu1 %1215 }
 0x2d6   : > { %vm1240_vm0 = vcmp.eq.f32.partialorder %v5428_v26, %v1216_v44  ;;  %v1222_v41 = vpop.xlane.xlu0 %1221 }
 0x2d7   : > { %4216 = vmatmul.mubr.msk.f32.gmra.mrb[14].mxu1 %vm1240_vm0, %v6680_v43  ;;  %vm1243_vm2 = vcmp.eq.f32.partialorder %v5434_v35, %v1222_v41 }
 0x2d8   : > { %4218 = vmatprep.mubr.msk.f32.mxu1 %vm1241_vm15, %v6680_v43 }
 0x2d9   : > { %v1220_v15 = vpop.xlane.xlu1 %1219 }
 0x2da   : > { %vm1242_vm13 = vcmp.eq.f32.partialorder %v5441_v7, %v1220_v15  ;;  %v1226_v28 = vpop.xlane.xlu0 %1225 }
 0x2db   : > { %4219 = vmatmul.mubr.msk.f32.gmra.mrb[16].mxu1 %vm1242_vm13, %v6680_v43  ;;  %vm1245_vm1 = vcmp.eq.f32.partialorder %v5448_v52, %v1226_v28 }
 0x2dc   : > { %4221 = vmatprep.mubr.msk.f32.mxu1 %vm1243_vm2, %v6680_v43 }
 0x2dd   : > { %v1224_v50 = vpop.xlane.xlu1 %1223 }
 0x2de   : > { %vm1244_vm4 = vcmp.eq.f32.partialorder %v5453_v48, %v1224_v50  ;;  %v1230_v44 = vpop.xlane.xlu0 %1229  ;;  %v4490_v50 = vld [vmem:[%s4732_s25] sm:$0x7] }
 0x2df   : > { %4222 = vmatmul.mubr.msk.f32.gmra.mrb[18].mxu1 %vm1244_vm4, %v6680_v43  ;;  %vm1247_vm0 = vcmp.eq.f32.partialorder %v5462_v5, %v1230_v44 }
 0x2e0   : > { %4224 = vmatprep.mubr.msk.f32.mxu1 %vm1245_vm1, %v6680_v43 }
 0x2e1   : > { %v1228_v37 = vpop.xlane.xlu1 %1227 }
 0x2e2   : > { %vm1246_vm15 = vcmp.eq.f32.partialorder %v5469_v6, %v1228_v37  ;;  %v2239_v38 = vpop.xlane.xlu0 %2238  ;;  %v5977_v37 = vld [vmem:[%s4694_s24 + $0x20] sm:$0xff] }
 0x2e3   : > { %vm2262_vm13 = vcmp.eq.f32.partialorder %v5477_v32, %v2239_v38  ;;  %4225 = vmatmul.mubr.msk.f32.gmra.mrb[20].mxu1 %vm1246_vm15, %v6680_v43 }
 0x2e4   : > { %4227 = vmatprep.mubr.msk.f32.mxu1 %vm1247_vm0, %v6680_v43  ;;  %4296 = vmatprep.mubr.msk.f32.mxu0 %vm2262_vm13, %v6680_v43  ;;  %v5675_v42 = vsel %vm2262_vm13, 3e+38, %v5477_v32  ;;  %vm6705_vm0 = vcmp.eq.f32.partialorder %v5286_v8, %v5560_v62  ;;  %vm6706_vm13 = vcmp.eq.f32.partialorder %v5276_v25, %v5558_v55  ;;  %v5846_v25 = vld [vmem:[%s4694_s24] sm:$0xff]  ;;  %v5951_v62 = vld [vmem:[%s4694_s24 + $0x10] sm:$0xff] }
 0x2e5   : > { %v1232_v26 = vpop.xlane.xlu1 %1231  ;;  %2703 = vmin.xlane.f32.xlu0 %v5675_v42 }
 0x2e6   : > { %vm1248_vm2 = vcmp.eq.f32.partialorder %v5486_v31, %v1232_v26  ;;  %v2243_v35 = vpop.xlane.xlu0 %2242 }
 0x2e7   : > { %vm2264_vm4 = vcmp.eq.f32.partialorder %v5496_v63, %v2243_v35  ;;  %4228 = vmatmul.mubr.msk.f32.gmra.mrb[22].mxu1 %vm1248_vm2, %v6680_v43  ;;  %vm6707_vm2 = vcmp.eq.f32.partialorder %v5309_v61, %v5582_v40  ;;  %v5840_v40 = vld [vmem:[%s4694_s24 + $0x8] sm:$0xff] }
 0x2e8   : > { %4258 = vmatprep.mubr.msk.f32.mxu1 %vm1789_vm6, %v6680_v43  ;;  %v5686_v48 = vsel %vm2264_vm4, 3e+38, %v5496_v63 }
 0x2e9   : > { %v2241_v5 = vpop.xlane.xlu1 %2240  ;;  %2707 = vmin.xlane.f32.xlu0 %v5686_v48 }
 0x2ea   : > { %vm2263_vm1 = vcmp.eq.f32.partialorder %v5509_v3, %v2241_v5  ;;  %v2247_v6 = vpop.xlane.xlu0 %2246 }
 0x2eb   : > { %vm2266_vm15 = vcmp.eq.f32.partialorder %v5519_v1, %v2247_v6  ;;  %4259 = vmatmul.mubr.msk.f32.vlgmr.msra.gmra.mrb[24].mxu1 %vm1790_vm5, %v6680_v43  ;;  %4297 = vmatmul.mubr.msk.f32.gmra.mrb[32].mxu0 %vm2263_vm1, %v6680_v43  ;;  %v5697_v41 = vsel %vm2263_vm1, 3e+38, %v5509_v3  ;;  %vm6709_vm1 = vcmp.eq.f32.partialorder %v5352_v56, %v5615_v13 }
 0x2ec   : > { %2705 = vmin.xlane.f32.xlu1 %v5697_v41  ;;  %4261 = vmatprep.mubr.msk.f32.mxu1 %vm1791_vm8, %v6680_v43  ;;  %v5707_v19 = vsel %vm2266_vm15, 3e+38, %v5519_v1  ;;  %v5996_v1 = vld [vmem:[%s4694_s24 + $0x30] sm:$0xff] }
 0x2ed   : > { %4299 = vmatprep.mubr.msk.f32.mxu0 %vm2264_vm4, %v6680_v43  ;;  %v2245_v28 = vpop.xlane.xlu1 %2244  ;;  %2711 = vmin.xlane.f32.xlu0 %v5707_v19  ;;  %vm6708_vm4 = vcmp.eq.f32.partialorder %v5301_v11, %v5579_v16 }
 0x2ee   : > { %vm2265_vm5 = vcmp.eq.f32.partialorder %v5528_v20, %v2245_v28  ;;  %v2251_v3 = vpop.xlane.xlu0 %2250  ;;  %4309 = vmatpush3.xpose.msra.mxu1 %v4490_v50  ;;  %v5970_v50 = vld [vmem:[%s4694_s24 + $0x28] sm:$0xff] }
 0x2ef   : > { %vm2268_vm6 = vcmp.eq.f32.partialorder %v5537_v4, %v2251_v3  ;;  %4262 = vmatmul.mubr.msk.f32.gmra.mrb[26].mxu1 %vm1792_vm7, %v6680_v43  ;;  %4300 = vmatmul.mubr.msk.f32.gmra.mrb[34].mxu0 %vm2265_vm5, %v6680_v43  ;;  %v5720_v38 = vsel %vm2265_vm5, 3e+38, %v5528_v20  ;;  %vm6711_vm5 = vcmp.eq.f32.partialorder %v5373_v59, %v5628_v45 }
 0x2f0   : > { %2709 = vmin.xlane.f32.xlu1 %v5720_v38  ;;  %4264 = vmatprep.mubr.msk.f32.mxu1 %vm1793_vm10, %v6680_v43  ;;  %v5730_v7 = vsel %vm2268_vm6, 3e+38, %v5537_v4  ;;  %vm6700_vm10 = vcmp.eq.f32.partialorder %v5202_v10, %v5479_v0 }
 0x2f1   : > { %4302 = vmatprep.mubr.msk.f32.mxu0 %vm2266_vm15, %v6680_v43  ;;  %v2249_v52 = vpop.xlane.xlu1 %2248  ;;  %2715 = vmin.xlane.f32.xlu0 %v5730_v7  ;;  %vm6710_vm15 = vcmp.eq.f32.partialorder %v5320_v27, %v5601_v60 }
 0x2f2   : > { %vm2267_vm7 = vcmp.eq.f32.partialorder %v5546_v17, %v2249_v52 }
 0x2f3   : > { %4265 = vmatmul.mubr.msk.f32.gmra.mrb[28].mxu1 %vm1794_vm9, %v6680_v43  ;;  %4303 = vmatmul.mubr.msk.f32.gmra.mrb[36].mxu0 %vm2267_vm7, %v6680_v43  ;;  %v5743_v32 = vsel %vm2267_vm7, 3e+38, %v5546_v17  ;;  %vm6699_vm9 = vcmp.eq.f32.partialorder %v5206_v57, %v5431_v23 }
 0x2f4   : > { %2713 = vmin.xlane.f32.xlu1 %v5743_v32  ;;  %4267 = vmatprep.mubr.msk.f32.mxu1 %vm1795_vm12, %v6680_v43  ;;  %vm6702_vm12 = vcmp.eq.f32.partialorder %v5222_v33, %v5503_v39 }
 0x2f5   : > { %4305 = vmatprep.mubr.msk.f32.mxu0 %vm2268_vm6, %v6680_v43  ;;  %v2253_v31 = vpop.xlane.xlu1 %2252  ;;  %vm6712_vm6 = vcmp.eq.f32.partialorder %v5397_v34, %v5641_v18 }
 0x2f6   : > { %vm2269_vm8 = vcmp.eq.f32.partialorder %v5555_v49, %v2253_v31 }
 0x2f7   : > { %4268 = vmatmul.mubr.msk.f32.gmra.mrb[30].mxu1 %vm1796_vm11, %v6680_v43  ;;  %4306 = vmatmul.mubr.msk.f32.gmra.mrb[38].mxu0 %vm2269_vm8, %v6680_v43  ;;  %v5760_v17 = vsel %vm2269_vm8, 3e+38, %v5555_v49  ;;  %vm6701_vm11 = vcmp.eq.f32.partialorder %v5229_v12, %v5445_v30  ;;  %v5944_v49 = vld [vmem:[%s4694_s24 + $0x18] sm:$0xff] }
 0x2f8   : > { %2717 = vmin.xlane.f32.xlu1 %v5760_v17  ;;  %4270 = vmatprep.mubr.msk.f32.mxu1 %vm1797_vm3, %v6680_v43  ;;  %vm6703_vm3 = vcmp.eq.f32.partialorder %v5246_v51, %v5459_v36 }
 0x2fb   : > { %4271 = vmatmul.mubr.msk.f32.gmra.mrb[32].mxu1 %vm1798_vm14, %v6680_v43  ;;  %vm6704_vm14 = vcmp.eq.f32.partialorder %v5238_v22, %v5539_v14 }
 0x2fc   : > { %4273 = vmatprep.mubr.msk.f32.mxu1 %vm6699_vm9, %v6680_v43 }
 0x2ff   : > { %4274 = vmatmul.mubr.msk.f32.gmra.mrb[34].mxu1 %vm6700_vm10, %v6680_v43 }
 0x300   : > { %4276 = vmatprep.mubr.msk.f32.mxu1 %vm6701_vm11, %v6680_v43  ;;  %v4286_v9 = vpop.f32.mrb[24].mxu0 }
 0x301   : > { %v2368_v2 = vpop.f32.mrb[25].mxu0  ;;  %v5843_v16 = vsub.f32 %v4286_v9, %v5840_v40 }
 0x302   : > { %v5849_v60 = vsub.f32 %v2368_v2, %v5846_v25 }
 0x303   : > { %4277 = vmatmul.mubr.msk.f32.gmra.mrb[36].mxu1 %vm6702_vm12, %v6680_v43 }
 0x304   : > { %4279 = vmatprep.mubr.msk.f32.mxu1 %vm6703_vm3, %v6680_v43  ;;  %v5791_v10 = vpop.f32.mrb[26].mxu0 }
 0x305   : > { %v5793_v57 = vpop.f32.mrb[27].mxu0  ;;  %v5948_v55 = vsub.f32 %v5791_v10, %v5944_v49 }
 0x307   : > { %4280 = vmatmul.mubr.msk.f32.gmra.mrb[38].mxu1 %vm6704_vm14, %v6680_v43  ;;  %6716 = vst [vmem:[#allocation31_spill] sm:$0xff] %v5948_v55 }
 0x308   : > { %v5799_v12 = vpop.f32.mrb[28].mxu0  ;;  %4310 = vmatprep.mubr.msk.f32.mxu1 %vm6705_vm0, %v6680_v43 }
 0x309   : > { %v5805_v33 = vpop.f32.mrb[29].mxu0  ;;  %v5974_v44 = vsub.f32 %v5799_v12, %v5970_v50 }
 0x30a   : > { %v5981_v26 = vsub.f32 %v5805_v33, %v5977_v37 }
 0x30b   : > { %4311 = vmatmul.mubr.msk.f32.vlgmr.msra.gmra.mrb[40].mxu1 %vm6706_vm13, %v6680_v43 }
 0x30c   : > { %v5811_v51 = vpop.f32.mrb[30].mxu0  ;;  %4313 = vmatprep.mubr.msk.f32.mxu1 %vm6707_vm2, %v6680_v43 }
 0x30d   : > { %v5817_v22 = vpop.f32.mrb[31].mxu0 }
 0x30e   : > { %v6000_v6 = vsub.f32 %v5817_v22, %v5996_v1 }
 0x30f   : > { %4314 = vmatmul.mubr.msk.f32.gmra.mrb[42].mxu1 %vm6708_vm4, %v6680_v43 }
 0x310   : > { %4316 = vmatprep.mubr.msk.f32.mxu1 %vm6709_vm1, %v6680_v43  ;;  %6719 = vst [vmem:[#allocation14_spill] sm:$0xff] %v6000_v6 }
 0x313   : > { %4317 = vmatmul.mubr.msk.f32.gmra.mrb[44].mxu1 %vm6710_vm15, %v6680_v43 }
 0x314   : > { %4319 = vmatprep.mubr.msk.f32.mxu1 %vm6711_vm5, %v6680_v43 }
 0x317   : > { %4320 = vmatmul.mubr.msk.f32.gmra.mrb[46].mxu1 %vm6712_vm6, %v6680_v43 }
 0x32c   : > { %v5851_v8 = vpop.f32.mrb[8].mxu1 }
 0x32d   : > { %v5853_v11 = vpop.f32.mrb[9].mxu1  ;;  %v5857_v61 = vmul.f32 %v5851_v8, %v5843_v16 }
 0x32e   : > { %v5861_v27 = vmul.f32 %v5849_v60, %v5853_v11 }
 0x32f   : > { %6713 = vst [vmem:[#allocation33_spill] sm:$0xff] %v5857_v61 }
 0x349   : > { %v3155_v56 = vpop.xlane.xlu1 %3154 }
 0x34a   : > { %v3153_v13 = vpop.xlane.xlu0 %3152  ;;  %vm3185_vm8 = vcmp.eq.f32.partialorder %v5568_v29, %v3155_v56  ;;  %v6714_v29 = vld [vmem:[#allocation32_spill] sm:$0xff] }
 0x34b   : > { %vm3184_vm7 = vcmp.eq.f32.partialorder %v5577_v54, %v3153_v13 }
 0x34c   : > { %4336 = vmatprep.mubr.msk.f32.mxu0 %vm3184_vm7, %v6680_v43  ;;  %vm6721_vm7 = vcmask 23552  }
 0x34d   : > { %v3159_v59 = vpop.xlane.xlu1 %3158  ;;  %4337 = vmatmul.mubr.msk.f32.vlgmr.msra.gmra.mrb[40].mxu0 %vm3185_vm8, %v6680_v43  ;;  %vm6722_vm8 = vmmov %vm6721_vm7 }
 0x34e   : > { %v3157_v34 = vpop.xlane.xlu0 %3156  ;;  %vm3187_vm10 = vcmp.eq.f32.partialorder %v5590_v47, %v3159_v59 }
 0x34f   : > { %vm3186_vm9 = vcmp.eq.f32.partialorder %v5599_v24, %v3157_v34  ;;  %v6715_v24 = vld [vmem:[#allocation22_spill] sm:$0xff] }
 0x350   : > { %4339 = vmatprep.mubr.msk.f32.mxu0 %vm3186_vm9, %v6680_v43  ;;  %vm6723_vm9 = vmmov %vm6721_vm7 }
 0x351   : > { %4340 = vmatmul.mubr.msk.f32.gmra.mrb[42].mxu0 %vm3187_vm10, %v6680_v43  ;;  %v3163_v23 = vpop.xlane.xlu1 %3162  ;;  %vm6724_vm10 = vmmov %vm6721_vm7 }
 0x352   : > { %vm3189_vm12 = vcmp.eq.f32.partialorder %v5611_v53, %v3163_v23 }
 0x355   : > { %v3161_v30 = vpop.xlane.xlu0 %3160 }
 0x356   : > { %vm3188_vm11 = vcmp.eq.f32.partialorder %v5624_v58, %v3161_v30  ;;  %v5955_v58 = vsub.f32 %v5793_v57, %v5951_v62 }
 0x357   : > { %4342 = vmatprep.mubr.msk.f32.mxu0 %vm3188_vm11, %v6680_v43  ;;  %vm6725_vm11 = vmmov %vm6721_vm7 }
 0x358   : > { %4343 = vmatmul.mubr.msk.f32.gmra.mrb[44].mxu0 %vm3189_vm12, %v6680_v43  ;;  %6717 = vst [vmem:[#allocation15_spill] sm:$0xff] %v5955_v58  ;;  %vm6726_vm12 = vmmov %vm6721_vm7 }
 0x359   : > { %v3165_v54 = vpop.xlane.xlu0 %3164 }
 0x35a   : > { %vm3190_vm3 = vcmp.eq.f32.partialorder %v6714_v29, %v3165_v54 }
 0x35b   : > { %4345 = vmatprep.mubr.msk.f32.mxu0 %vm3190_vm3, %v6680_v43  ;;  %vm6727_vm3 = vmmov %vm6721_vm7 }
 0x35d   : > { %v3167_v47 = vpop.xlane.xlu1 %3166 }
 0x35e   : > { %vm3191_vm14 = vcmp.eq.f32.partialorder %v6715_v24, %v3167_v47 }
 0x35f   : > { %4346 = vmatmul.mubr.msk.f32.gmra.mrb[46].mxu0 %vm3191_vm14, %v6680_v43  ;;  %vm6728_vm14 = vmmov %vm6727_vm3 }
 0x372   : > { %v5879_v21 = vpop.xlane.xlu0 %2703 }
 0x373   : > { %vm2727_vm0 = vcmp.eq.f32.partialorder %v5675_v42, %v5879_v21 }
 0x374   : > { %4322 = vmatprep.mubr.msk.f32.mxu1 %vm2727_vm0, %v6680_v43 }
 0x376   : > { %v5887_v53 = vpop.xlane.xlu0 %2707 }
 0x377   : > { %vm2729_vm2 = vcmp.eq.f32.partialorder %v5686_v48, %v5887_v53 }
 0x379   : > { %v5889_v36 = vpop.xlane.xlu1 %2705 }
 0x37a   : > { %vm2728_vm13 = vcmp.eq.f32.partialorder %v5697_v41, %v5889_v36  ;;  %v5893_v0 = vpop.xlane.xlu0 %2711 }
 0x37b   : > { %4323 = vmatmul.mubr.msk.f32.gmra.mrb[48].mxu1 %vm2728_vm13, %v6680_v43  ;;  %vm2731_vm1 = vcmp.eq.f32.partialorder %v5707_v19, %v5893_v0 }
 0x37c   : > { %4325 = vmatprep.mubr.msk.f32.mxu1 %vm2729_vm2, %v6680_v43  ;;  %v6198_v21 = vsel %vm2731_vm1, 3e+38, %v5707_v19 }
 0x37d   : > { %v5905_v46 = vpop.xlane.xlu1 %2709 }
 0x37e   : > { %vm2730_vm4 = vcmp.eq.f32.partialorder %v5720_v38, %v5905_v46  ;;  %v5915_v39 = vpop.xlane.xlu0 %2715 }
 0x37f   : > { %4326 = vmatmul.mubr.msk.f32.gmra.mrb[50].mxu1 %vm2730_vm4, %v6680_v43  ;;  %vm2733_vm5 = vcmp.eq.f32.partialorder %v5730_v7, %v5915_v39 }
 0x380   : > { %4328 = vmatprep.mubr.msk.f32.mxu1 %vm2731_vm1, %v6680_v43 }
 0x381   : > { %v5921_v4 = vpop.xlane.xlu1 %2713 }
 0x382   : > { %vm2732_vm15 = vcmp.eq.f32.partialorder %v5743_v32, %v5921_v4 }
 0x383   : > { %4329 = vmatmul.mubr.msk.f32.gmra.mrb[52].mxu1 %vm2732_vm15, %v6680_v43 }
 0x384   : > { %4331 = vmatprep.mubr.msk.f32.mxu1 %vm2733_vm5, %v6680_v43 }
 0x385   : > { %v5935_v14 = vpop.xlane.xlu1 %2717 }
 0x386   : > { %vm2734_vm6 = vcmp.eq.f32.partialorder %v5760_v17, %v5935_v14  ;;  %v485_v14 = vld [vmem:[%s6023_s12 + $0x10] sm:$0xff] }
 0x387   : > { %4332 = vmatmul.mubr.msk.f32.gmra.mrb[54].mxu1 %vm2734_vm6, %v6680_v43 }
 0x39b   : > { %v5957_v45 = vpop.f32.mrb[10].mxu1 }
 0x39c   : > { %v5959_v18 = vpop.f32.mrb[11].mxu1  ;;  %v5963_v28 = vmul.f32 %v5957_v45, %v5948_v55 }
 0x39d   : > { %v5967_v3 = vmul.f32 %v5955_v58, %v5959_v18  ;;  %v6040_v58 = vld [vmem:[%s4694_s24 + $0x38] sm:$0xff] }
 0x3a6   : > { %v5983_v35 = vpop.f32.mrb[12].mxu1 }
 0x3a7   : > { %v5985_v52 = vpop.f32.mrb[13].mxu1  ;;  %v5989_v20 = vmul.f32 %v5983_v35, %v5974_v44 }
 0x3a8   : > { %v5993_v5 = vmul.f32 %v5981_v26, %v5985_v52 }
 0x3aa   : > { %6718 = vst [vmem:[#allocation24_spill] sm:$0xff] %v5993_v5  ;;  %v6002_v31 = vpop.f32.mrb[14].mxu1 }
 0x3ab   : > { %v6004_v63 = vpop.f32.mrb[15].mxu1 }
 0x3ac   : > { %v6008_v15 = vmul.f32 %v6000_v6, %v6004_v63 }
 0x3ae   : > { %6720 = vst [vmem:[#allocation23_spill] sm:$0xff] %v6008_v15  ;;  %v4220_v9 = vpop.f32.mrb[16].mxu1 }
 0x3af   : > { %v1387_v2 = vpop.f32.mrb[17].mxu1 }
 0x3b1   : > { %v6749_v0 = vld [vmem:[#allocation24_spill] sm:$0xff] }
 0x3b2   : > { %v4223_v10 = vpop.f32.mrb[18].mxu1 }
 0x3b3   : > { %v1397_v57 = vpop.f32.mrb[19].mxu1 }
 0x3b6   : > { %v4226_v12 = vpop.f32.mrb[20].mxu1 }
 0x3b7   : > { %v1407_v33 = vpop.f32.mrb[21].mxu1 }
 0x3ba   : > { %v4229_v56 = vpop.f32.mrb[22].mxu1 }
 0x3bb   : > { %v1417_v13 = vpop.f32.mrb[23].mxu1 }
 0x3be   : > { %v4260_v59 = vpop.f32.mrb[24].mxu1  ;;  %v4298_v34 = vpop.f32.mrb[32].mxu0 }
 0x3bf   : > { %v1983_v22 = vsub.f32 %v4260_v59, %v5840_v40  ;;  %v1903_v23 = vpop.f32.mrb[25].mxu1  ;;  %v2408_v30 = vpop.f32.mrb[33].mxu0 }
 0x3c0   : > { %v1982_v54 = vsub.f32 %v1903_v23, %v5846_v25 }
 0x3c1   : > { %v1999_v29 = vmul.f32 %v1983_v22, %v1983_v22  ;;  %v2095_v47 = vmul.f32 %v5851_v8, %v1983_v22 }
 0x3c2   : > { %v4263_v24 = vpop.f32.mrb[26].mxu1  ;;  %v4301_v9 = vpop.f32.mrb[34].mxu0  ;;  %v1998_v2 = vmul.f32 %v1982_v54, %v1982_v54  ;;  %v2094_v10 = vmul.f32 %v1982_v54, %v5853_v11 }
 0x3c3   : > { %v1985_v57 = vsub.f32 %v4263_v24, %v5944_v49  ;;  %v1913_v12 = vpop.f32.mrb[27].mxu1  ;;  %v2418_v33 = vpop.f32.mrb[35].mxu0  ;;  %v2017_v56 = vsel %vm6721_vm7, %v1999_v29, 0.0  ;;  %vm6729_vm7 = vmmov %vm6727_vm3 }
 0x3c4   : > { %v1984_v13 = vsub.f32 %v1913_v12, %v5951_v62  ;;  %2018 = vadd.xlane.f32.xlu1 %v2017_v56  ;;  %v2014_v59 = vsel %vm6722_vm8, %v1998_v2, 0.0  ;;  %v484_v33 = vld [vmem:[%s6023_s12 + $0x8] sm:$0xff]  ;;  %vm6730_vm8 = vmmov %vm6727_vm3 }
 0x3c5   : > { %v6026_v34 = vmul.f32 %v5957_v45, %v1985_v57  ;;  %2015 = vadd.xlane.f32.xlu0 %v2014_v59  ;;  %v2001_v22 = vmul.f32 %v1985_v57, %v1985_v57 }
 0x3c6   : > { %v2096_v23 = vmul.f32 %v1984_v13, %v5959_v18  ;;  %v4266_v30 = vpop.f32.mrb[28].mxu1  ;;  %v4304_v54 = vpop.f32.mrb[36].mxu0  ;;  %v2000_v29 = vmul.f32 %v1984_v13, %v1984_v13 }
 0x3c7   : > { %v1987_v24 = vsub.f32 %v4266_v30, %v5970_v50  ;;  %v1923_v9 = vpop.f32.mrb[29].mxu1  ;;  %v2428_v2 = vpop.f32.mrb[37].mxu0  ;;  %v2023_v12 = vsel %vm6723_vm9, %v2001_v22, 0.0  ;;  %vm6731_vm9 = vmmov %vm6727_vm3 }
 0x3c8   : > { %v1986_v56 = vsub.f32 %v1923_v9, %v5977_v37  ;;  %2024 = vadd.xlane.f32.xlu1 %v2023_v12  ;;  %v2020_v43 = vsel %vm6724_vm10, %v2000_v29, 0.0  ;;  %v558_v2 = vsub.f32 %v5840_v40, %v484_v33  ;;  %vm6733_vm10 = vmmov %vm6727_vm3 }
 0x3c9   : > { %v6035_v57 = vmul.f32 %v5983_v35, %v1987_v24  ;;  %2021 = vadd.xlane.f32.xlu0 %v2020_v43  ;;  %v2003_v59 = vmul.f32 %v1987_v24, %v1987_v24 }
 0x3ca   : > { %v2098_v13 = vmul.f32 %v1986_v56, %v5985_v52  ;;  %v4269_v54 = vpop.f32.mrb[30].mxu1  ;;  %v4307_v30 = vpop.f32.mrb[38].mxu0  ;;  %v2002_v15 = vmul.f32 %v1986_v56, %v1986_v56  ;;  %v574_v55 = vmul.f32 %v558_v2, %v558_v2  ;;  %v6732_v2 = vld [vmem:[#allocation35_spill] sm:$0xff] }
 0x3cb   : > { %v1989_v22 = vsub.f32 %v4269_v54, %v6040_v58  ;;  %v1933_v9 = vpop.f32.mrb[31].mxu1  ;;  %v2438_v12 = vpop.f32.mrb[39].mxu0  ;;  %v2029_v29 = vsel %vm6725_vm11, %v2003_v59, 0.0  ;;  %vm6735_vm11 = vmmov %vm6727_vm3 }
 0x3cc   : > { %v1988_v61 = vsub.f32 %v1933_v9, %v5996_v1  ;;  %v2026_v43 = vsel %vm6726_vm12, %v2002_v15, 0.0  ;;  %v2113_v12 = vsel %vm6727_vm3, %v2095_v47, 0.0  ;;  %v593_v15 = vsel %vm6729_vm7, %v574_v55, 0.0  ;;  %vm6739_vm12 = vmmov %vm6727_vm3 }
 0x3cd   : > { %v6047_v24 = vmul.f32 %v6002_v31, %v1989_v22  ;;  %2027 = vadd.xlane.f32.xlu1 %v2026_v43  ;;  %2030 = vadd.xlane.f32.xlu0 %v2029_v29  ;;  %v2005_v5 = vmul.f32 %v1989_v22, %v1989_v22  ;;  %v2110_v29 = vsel %vm6730_vm8, %v2094_v10, 0.0  ;;  %vm6743_vm7 = vmmov %vm6727_vm3 }
 0x3ce   : > { %v6050_v56 = vmul.f32 %v1988_v61, %v6004_v63  ;;  %v4272_v33 = vpop.f32.mrb[32].mxu1  ;;  %v2004_v30 = vmul.f32 %v1988_v61, %v1988_v61  ;;  %vm6744_vm8 = vmmov %vm6727_vm3 }
 0x3cf   : > { %v1943_v54 = vpop.f32.mrb[33].mxu1  ;;  %v2035_v61 = vsel %vm6731_vm9, %v2005_v5, 0.0  ;;  %v6067_v5 = vsel %vm2728_vm13, 3e+38, %v5697_v41  ;;  %vm6736_vm13 = vmmov %vm6727_vm3 }
 0x3d0   : > { %v2032_v59 = vsel %vm6728_vm14, %v2004_v30, 0.0  ;;  %v2116_v54 = vsel %vm6733_vm10, %v2096_v23, 0.0  ;;  %v2119_v23 = vsel %vm6735_vm11, %v6026_v34, 0.0  ;;  %v6091_v34 = vsel %vm2730_vm4, 3e+38, %v5720_v38  ;;  %vm6737_vm4 = vmmov %vm6727_vm3 }
 0x3d1   : > { %2114 = vadd.xlane.f32.xlu1 %v2113_v12  ;;  %2033 = vadd.xlane.f32.xlu0 %v2032_v59  ;;  %v6734_v12 = vld [vmem:[#allocation36_spill] sm:$0xff]  ;;  %vm6742_vm14 = vmmov %vm6727_vm3 }
 0x3d2   : > { %v4275_v9 = vpop.f32.mrb[34].mxu1  ;;  %vm6745_vm9 = vmmov %vm6727_vm3 }
 0x3d3   : > { %v1953_v6 = vpop.f32.mrb[35].mxu1  ;;  %vm6746_vm10 = vmmov %vm6727_vm3 }
 0x3d4   : > { %vm6747_vm11 = vmmov %vm6727_vm3 }
 0x3d5   : > { %594 = vadd.xlane.f32.xlu1 %v593_v15  ;;  %2111 = vadd.xlane.f32.xlu0 %v2110_v29  ;;  %v483_v29 = vld [vmem:[%s6023_s12] sm:$0xff] }
 0x3d6   : > { %v4278_v43 = vpop.f32.mrb[36].mxu1  ;;  %v557_v38 = vsub.f32 %v5846_v25, %v483_v29 }
 0x3d7   : > { %v1963_v33 = vpop.f32.mrb[37].mxu1 }
 0x3d8   : > { %v2122_v33 = vsel %vm6736_vm13, %v2098_v13, 0.0  ;;  %v6114_v13 = vsel %vm2732_vm15, 3e+38, %v5743_v32  ;;  %v573_v4 = vmul.f32 %v557_v38, %v557_v38  ;;  %vm6738_vm15 = vmmov %vm6727_vm3 }
 0x3d9   : > { %1029 = vmin.xlane.f32.xlu1 %v6732_v2  ;;  %2036 = vadd.xlane.f32.xlu0 %v2035_v61 }
 0x3da   : > { %v4281_v47 = vpop.f32.mrb[38].mxu1 }
 0x3db   : > { %v1973_v30 = vpop.f32.mrb[39].mxu1 }
 0x3dd   : > { %1031 = vmin.xlane.f32.xlu1 %v6734_v12  ;;  %2117 = vadd.xlane.f32.xlu0 %v2116_v54  ;;  %v2125_v12 = vsel %vm6737_vm4, %v6035_v57, 0.0  ;;  %v2463_v57 = vmul.f32 %v5849_v60, %v5849_v60 }
 0x3de   : > { %v4312_v55 = vpop.f32.mrb[40].mxu1 }
 0x3df   : > { %v6061_v6 = vsub.f32 %v4312_v55, %v5840_v40  ;;  %v2833_v10 = vpop.f32.mrb[41].mxu1 }
 0x3e0   : > { %v6070_v22 = vsub.f32 %v2833_v10, %v5846_v25 }
 0x3e1   : > { %v6076_v59 = vmul.f32 %v5851_v8, %v6061_v6  ;;  %3170 = vmin.xlane.f32.xlu1 %v6067_v5  ;;  %2120 = vadd.xlane.f32.xlu0 %v2119_v23 }
 0x3e2   : > { %v6081_v9 = vmul.f32 %v6070_v22, %v5853_v11  ;;  %v4315_v36 = vpop.f32.mrb[42].mxu1 }
 0x3e3   : > { %v6084_v41 = vsub.f32 %v4315_v36, %v5944_v49  ;;  %v2843_v15 = vpop.f32.mrb[43].mxu1 }
 0x3e4   : > { %v6094_v43 = vsub.f32 %v2843_v15, %v5951_v62  ;;  %v6139_v15 = vsel %vm2734_vm6, 3e+38, %v5760_v17  ;;  %v590_v17 = vsel %vm6739_vm12, %v573_v4, 0.0  ;;  %vm6740_vm6 = vmmov %vm6727_vm3  ;;  %v2131_v4 = vsel %vm6743_vm7, %v6047_v24, 0.0 }
 0x3e5   : > { %v6099_v61 = vmul.f32 %v5957_v45, %v6084_v41  ;;  %3174 = vmin.xlane.f32.xlu1 %v6091_v34  ;;  %2123 = vadd.xlane.f32.xlu0 %v2122_v33  ;;  %v2128_v33 = vsel %vm6738_vm15, %v6050_v56, 0.0  ;;  %v2479_v38 = vsel %vm6740_vm6, %v2463_v57, 0.0  ;;  %v559_v56 = vsub.f32 %v5951_v62, %v485_v14 }
 0x3e6   : > { %v6104_v2 = vmul.f32 %v6094_v43, %v5959_v18  ;;  %v4318_v47 = vpop.f32.mrb[44].mxu1  ;;  %v2467_v24 = vmul.f32 %v5981_v26, %v5981_v26 }
 0x3e7   : > { %v6108_v46 = vsub.f32 %v4318_v47, %v5970_v50  ;;  %v2853_v30 = vpop.f32.mrb[45].mxu1 }
 0x3e8   : > { %v6117_v54 = vsub.f32 %v2853_v30, %v5977_v37  ;;  %v2575_v30 = vsel %vm6727_vm3, %v5861_v27, 0.0  ;;  %v2581_v27 = vsel %vm6745_vm9, %v5967_v3, 0.0  ;;  %v6185_v3 = vsel %vm2729_vm2, 3e+38, %v5686_v48 }
 0x3e9   : > { %v6123_v55 = vmul.f32 %v5983_v35, %v6108_v46  ;;  %3178 = vmin.xlane.f32.xlu1 %v6114_v13  ;;  %2126 = vadd.xlane.f32.xlu0 %v2125_v12  ;;  %v6741_v12 = vld [vmem:[#allocation34_spill] sm:$0xff]  ;;  %v2464_v48 = vmul.f32 %v5843_v16, %v5843_v16 }
 0x3ea   : > { %v6128_v10 = vmul.f32 %v6117_v54, %v5985_v52  ;;  %v4321_v32 = vpop.f32.mrb[46].mxu1 }
 0x3eb   : > { %v6131_v23 = vsub.f32 %v4321_v32, %v6040_v58  ;;  %v2863_v36 = vpop.f32.mrb[47].mxu1  ;;  %v575_v32 = vmul.f32 %v559_v56, %v559_v56  ;;  %v6754_v56 = vld [vmem:[#allocation31_spill] sm:$0xff] }
 0x3ec   : > { %v6142_v29 = vsub.f32 %v2863_v36, %v5996_v1  ;;  %v2584_v36 = vsel %vm6742_vm14, %v5963_v28, 0.0  ;;  %v6176_v28 = vsel %vm2727_vm0, 3e+38, %v5675_v42  ;;  %v6192_v42 = vsub.f32 %v5811_v51, %v6040_v58  ;;  %vm6748_vm0 = vmmov %vm6727_vm3 }
 0x3ed   : > { %v6148_v47 = vmul.f32 %v6002_v31, %v6131_v23  ;;  %3182 = vmin.xlane.f32.xlu1 %v6139_v15  ;;  %2129 = vadd.xlane.f32.xlu0 %v2128_v33  ;;  %v596_v57 = vsel %vm6744_vm8, %v575_v32, 0.0  ;;  %v2468_v33 = vmul.f32 %v5974_v44, %v5974_v44  ;;  %v2590_v44 = vsel %vm6747_vm11, %v5989_v20, 0.0  ;;  %vm6750_vm2 = vmmov %vm6748_vm0  ;;  %v6751_v20 = vld [vmem:[#allocation14_spill] sm:$0xff]  ;;  %v6758_v32 = vld [vmem:[#allocation15_spill] sm:$0xff] }
 0x3ee   : > { %v6153_v60 = vmul.f32 %v6142_v29, %v6004_v63  ;;  %v2491_v53 = vsel %vm6748_vm0, %v2467_v24, 0.0  ;;  %v2470_v26 = vmul.f32 %v6192_v42, %v6192_v42  ;;  %v6210_v51 = vsel %vm2733_vm5, 3e+38, %v5730_v7  ;;  %vm6752_vm1 = vmmov %vm6748_vm0 }
 0x3ef   : > { %v2587_v19 = vsel %vm6750_vm2, %v6749_v0, 0.0  ;;  %v2469_v14 = vmul.f32 %v6751_v20, %v6751_v20  ;;  %vm6753_vm13 = vmmov %vm6748_vm0  ;;  %v2466_v39 = vmul.f32 %v6754_v56, %v6754_v56 }
 0x3f0   : > { %v2500_v16 = vsel %vm6752_vm1, %v2470_v26, 0.0  ;;  %vm6755_vm5 = vmmov %vm6748_vm0 }
 0x3f1   : > { %2480 = vadd.xlane.f32.xlu1 %v2479_v38  ;;  %591 = vadd.xlane.f32.xlu0 %v590_v17  ;;  %v2494_v17 = vsel %vm6746_vm10, %v2468_v33, 0.0  ;;  %v2482_v38 = vsel %vm6753_vm13, %v2464_v48, 0.0  ;;  %v2497_v7 = vsel %vm6755_vm5, %v2469_v14, 0.0  ;;  %vm6757_vm4 = vmmov %vm6748_vm0  ;;  %v2931_v14 = vmul.f32 %v6084_v41, %v6084_v41 }
 0x3f2   : > { %vm6760_vm15 = vmmov %vm6748_vm0 }
 0x3f3   : > { %vm6761_vm12 = vmmov %vm6748_vm0 }
 0x3f4   : > { %v2488_v33 = vsel %vm6761_vm12, %v2466_v39, 0.0  ;;  %vm6762_vm6 = vmmov %vm6748_vm0 }
 0x3f5   : > { %2576 = vadd.xlane.f32.xlu1 %v2575_v30  ;;  %1027 = vmin.xlane.f32.xlu0 %v6741_v12  ;;  %v6756_v30 = vld [vmem:[#allocation33_spill] sm:$0xff]  ;;  %v3043_v24 = vsel %vm6762_vm6, %v6076_v59, 0.0  ;;  %vm6763_vm3 = vmmov %vm6748_vm0 }
 0x3f6   : > { %v2578_v12 = vsel %vm6757_vm4, %v6756_v30, 0.0  ;;  %vm6764_vm14 = vmmov %vm6748_vm0 }
 0x3f7   : > { %vm6765_vm7 = vmmov %vm6748_vm0 }
 0x3f8   : > { %vm6766_vm8 = vmmov %vm6748_vm0 }
 0x3f9   : > { %2585 = vadd.xlane.f32.xlu1 %v2584_v36  ;;  %2132 = vadd.xlane.f32.xlu0 %v2131_v4  ;;  %v2465_v36 = vmul.f32 %v6758_v32, %v6758_v32  ;;  %v6759_v4 = vld [vmem:[#allocation23_spill] sm:$0xff]  ;;  %v3040_v20 = vsel %vm6766_vm8, %v6081_v9, 0.0  ;;  %vm6767_vm9 = vmmov %vm6748_vm0 }
 0x3fa   : > { %vm6768_vm10 = vmmov %vm6748_vm0 }
 0x3fb   : > { %vm6769_vm11 = vmmov %vm6748_vm0 }
 0x3fc   : > { %vm6770_vm2 = vmmov %vm6748_vm0 }
 0x3fd   : > { %2582 = vadd.xlane.f32.xlu1 %v2581_v27  ;;  %597 = vadd.xlane.f32.xlu0 %v596_v57  ;;  %v2593_v57 = vsel %vm6760_vm15, %v6759_v4, 0.0  ;;  %v2929_v27 = vmul.f32 %v6061_v6, %v6061_v6  ;;  %vm6771_vm1 = vmmov %vm6748_vm0 }
 0x3fe   : > { %vm6772_vm13 = vmmov %vm6748_vm0 }
 0x3ff   : > { %v2947_v0 = vsel %vm6765_vm7, %v2929_v27, 0.0  ;;  %v2933_v27 = vmul.f32 %v6108_v46, %v6108_v46  ;;  %vm6773_vm5 = vmmov %vm6748_vm0  ;;  %v2932_v46 = vmul.f32 %v6117_v54, %v6117_v54 }
 0x400   : > { %vm6774_vm4 = vmmov %vm6748_vm0 }
 0x401   : > { %2495 = vadd.xlane.f32.xlu1 %v2494_v17  ;;  %3168 = vmin.xlane.f32.xlu0 %v6176_v28  ;;  %v2928_v17 = vmul.f32 %v6070_v22, %v6070_v22  ;;  %vm6775_vm15 = vmmov %vm6748_vm0 }
 0x402   : > { %vm6776_vm12 = vmmov %vm6748_vm0 }
 0x403   : > { %v2944_v26 = vsel %vm6764_vm14, %v2928_v17, 0.0  ;;  %vm6777_vm6 = vmmov %vm6748_vm0 }
 0x404   : > { %vm6779_vm14 = vmmov %vm6748_vm0 }
 0x405   : > { %2591 = vadd.xlane.f32.xlu1 %v2590_v44  ;;  %3172 = vmin.xlane.f32.xlu0 %v6185_v3  ;;  %v2485_v44 = vsel %vm6763_vm3, %v2465_v36, 0.0  ;;  %vm6778_vm3 = vmmov %vm6748_vm0 }
 0x406   : > { %vm6780_vm7 = vmmov %vm6748_vm0 }
 0x407   : > { %vm6781_vm8 = vmmov %vm6748_vm0 }
 0x409   : > { %2492 = vadd.xlane.f32.xlu1 %v2491_v53  ;;  %3176 = vmin.xlane.f32.xlu0 %v6198_v21  ;;  %v2930_v53 = vmul.f32 %v6094_v43, %v6094_v43  ;;  %v486_v43 = vld [vmem:[%s6023_s12 + $0x18] sm:$0xff] }
 0x40a   : > { %v560_v9 = vsub.f32 %v5944_v49, %v486_v43 }
 0x40b   : > { %v2950_v56 = vsel %vm6767_vm9, %v2930_v53, 0.0  ;;  %vm6782_vm9 = vmmov %vm6748_vm0 }
 0x40d   : > { %2588 = vadd.xlane.f32.xlu1 %v2587_v19  ;;  %3180 = vmin.xlane.f32.xlu0 %v6210_v51 }
 0x411   : > { %2501 = vadd.xlane.f32.xlu1 %v2500_v16  ;;  %2483 = vadd.xlane.f32.xlu0 %v2482_v38 }
 0x415   : > { %2498 = vadd.xlane.f32.xlu1 %v2497_v7  ;;  %2579 = vadd.xlane.f32.xlu0 %v2578_v12  ;;  %v576_v12 = vmul.f32 %v560_v9, %v560_v9 }
 0x419   : > { %2594 = vadd.xlane.f32.xlu1 %v2593_v57  ;;  %2489 = vadd.xlane.f32.xlu0 %v2488_v33  ;;  %v599_v57 = vsel %vm6771_vm1, %v576_v12, 0.0  ;;  %vm6786_vm1 = vmmov %vm6748_vm0 }
 0x41d   : > { %3044 = vadd.xlane.f32.xlu1 %v3043_v24  ;;  %2486 = vadd.xlane.f32.xlu0 %v2485_v44 }
 0x420   : > { %v4338_v48 = vpop.f32.mrb[40].mxu0 }
 0x421   : > { %v3378_v6 = vsub.f32 %v4338_v48, %v5840_v40  ;;  %2945 = vadd.xlane.f32.xlu1 %v2944_v26  ;;  %v3298_v22 = vpop.f32.mrb[41].mxu0  ;;  %2948 = vadd.xlane.f32.xlu0 %v2947_v0 }
 0x422   : > { %v6242_v19 = vsub.f32 %v3298_v22, %v5846_v25 }
 0x423   : > { %v6245_v59 = vmul.f32 %v5851_v8, %v3378_v6  ;;  %v3394_v16 = vmul.f32 %v3378_v6, %v3378_v6  ;;  %v2956_v6 = vsel %vm6778_vm3, %v2932_v46, 0.0  ;;  %vm6794_vm3 = vmmov %vm6748_vm0 }
 0x424   : > { %v3489_v40 = vmul.f32 %v6242_v19, %v5853_v11  ;;  %v4341_v38 = vpop.f32.mrb[42].mxu0  ;;  %v2953_v11 = vsel %vm6769_vm11, %v2931_v14, 0.0  ;;  %vm6784_vm11 = vmmov %vm6748_vm0 }
 0x425   : > { %v3380_v25 = vsub.f32 %v4341_v38, %v5944_v49  ;;  %2951 = vadd.xlane.f32.xlu1 %v2950_v56  ;;  %v3308_v39 = vpop.f32.mrb[43].mxu0  ;;  %3041 = vadd.xlane.f32.xlu0 %v3040_v20  ;;  %v3412_v30 = vsel %vm6768_vm10, %v3394_v16, 0.0  ;;  %v3049_v49 = vsel %vm6770_vm2, %v6099_v61, 0.0  ;;  %v3052_v20 = vsel %vm6780_vm7, %v6128_v10, 0.0  ;;  %vm6783_vm10 = vmmov %vm6748_vm0 }
 0x426   : > { %v3379_v8 = vsub.f32 %v3308_v39, %v5951_v62  ;;  %v3058_v62 = vsel %vm6748_vm0, %v6153_v60, 0.0  ;;  %v3046_v60 = vsel %vm6772_vm13, %v6104_v2, 0.0  ;;  %v3505_v26 = vsel %vm6775_vm15, %v3489_v40, 0.0  ;;  %vm6785_vm2 = vmmov %vm6748_vm0 }
 0x427   : > { %v3492_v7 = vmul.f32 %v5957_v45, %v3380_v25  ;;  %v3396_v48 = vmul.f32 %v3380_v25, %v3380_v25  ;;  %v3393_v10 = vmul.f32 %v6242_v19, %v6242_v19  ;;  %vm6787_vm13 = vmmov %vm6748_vm0 }
 0x428   : > { %v3491_v41 = vmul.f32 %v3379_v8, %v5959_v18  ;;  %v3395_v22 = vmul.f32 %v3379_v8, %v3379_v8  ;;  %vm6790_vm15 = vmmov %vm6748_vm0 }
 0x429   : > { %3413 = vadd.xlane.f32.xlu1 %v3412_v30  ;;  %2954 = vadd.xlane.f32.xlu0 %v2953_v11  ;;  %v3418_v0 = vsel %vm6777_vm6, %v3396_v48, 0.0  ;;  %v3514_v54 = vsel %vm6779_vm14, %v3492_v7, 0.0  ;;  %v3409_v9 = vsel %vm6787_vm13, %v3393_v10, 0.0  ;;  %v2566_v7 = vmul.f32 %v6002_v31, %v6192_v42  ;;  %vm6793_vm6 = vmmov %vm6748_vm0 }
 0x42a   : > { %v3415_v43 = vsel %vm6781_vm8, %v3395_v22, 0.0  ;;  %vm6796_vm14 = vmmov %vm6748_vm0 }
 0x42b   : > { %v4344_v32 = vpop.f32.mrb[44].mxu0  ;;  %vm6797_vm7 = vmmov %vm6748_vm0 }
 0x42c   : > { %v3382_v36 = vsub.f32 %v4344_v32, %v5970_v50  ;;  %v3318_v4 = vpop.f32.mrb[45].mxu0  ;;  %vm6798_vm8 = vmmov %vm6748_vm0 }
 0x42d   : > { %v3381_v45 = vsub.f32 %v3318_v4, %v5977_v37  ;;  %3059 = vadd.xlane.f32.xlu1 %v3058_v62  ;;  %3050 = vadd.xlane.f32.xlu0 %v3049_v49 }
 0x42e   : > { %v6269_v18 = vmul.f32 %v5983_v35, %v3382_v36  ;;  %v3061_v35 = vsel %vm6773_vm5, %v6148_v47, 0.0  ;;  %v3055_v47 = vsel %vm6776_vm12, %v6123_v55, 0.0  ;;  %v2934_v55 = vmul.f32 %v6142_v29, %v6142_v29  ;;  %vm6788_vm5 = vmmov %vm6748_vm0 }
 0x42f   : > { %v3493_v33 = vmul.f32 %v3381_v45, %v5985_v52  ;;  %v2959_v52 = vsel %vm6774_vm4, %v2933_v27, 0.0  ;;  %v3398_v16 = vmul.f32 %v3382_v36, %v3382_v36  ;;  %v3397_v38 = vmul.f32 %v3381_v45, %v3381_v45  ;;  %vm6789_vm4 = vmmov %vm6748_vm0  ;;  %v488_v27 = vld [vmem:[%s6023_s12 + $0x28] sm:$0xff] }
 0x430   : > { %v2962_v40 = vsel %vm6784_vm11, %v2934_v55, 0.0  ;;  %v3508_v29 = vsel %vm6785_vm2, %v6245_v59, 0.0  ;;  %v487_v59 = vld [vmem:[%s6023_s12 + $0x20] sm:$0xff]  ;;  %v2596_v4 = vsel %vm6789_vm4, %v2566_v7, 0.0  ;;  %vm6792_vm12 = vmmov %vm6748_vm0  ;;  %v6795_v55 = vld [vmem:[#allocation38_spill] sm:$0xff]  ;;  %vm654_vm11 = vcmask 7168  }
 0x431   : > { %600 = vadd.xlane.f32.xlu1 %v599_v57  ;;  %3047 = vadd.xlane.f32.xlu0 %v3046_v60  ;;  %v3424_v56 = vsel %vm6748_vm0, %v3398_v16, 0.0  ;;  %v3421_v8 = vsel %vm6786_vm1, %v3397_v38, 0.0  ;;  %v3517_v36 = vsel %vm6788_vm5, %v3493_v33, 0.0  ;;  %v561_v42 = vsub.f32 %v5977_v37, %v487_v59  ;;  %v6791_v33 = vld [vmem:[#allocation37_spill] sm:$0xff] }
 0x432   : > { %v4347_v61 = vpop.f32.mrb[46].mxu0 }
 0x433   : > { %v3384_v17 = vsub.f32 %v4347_v61, %v6040_v58  ;;  %v3328_v24 = vpop.f32.mrb[47].mxu0 }
 0x434   : > { %v6279_v44 = vsub.f32 %v3328_v24, %v5996_v1 }
 0x435   : > { %v6285_v53 = vmul.f32 %v6002_v31, %v3384_v17  ;;  %3062 = vadd.xlane.f32.xlu1 %v3061_v35  ;;  %2960 = vadd.xlane.f32.xlu0 %v2959_v52  ;;  %v3400_v32 = vmul.f32 %v3384_v17, %v3384_v17  ;;  %v577_v35 = vmul.f32 %v561_v42, %v561_v42 }
 0x436   : > { %v6289_v2 = vmul.f32 %v6279_v44, %v6004_v63  ;;  %v2935_v63 = vmul.f32 %v6131_v23, %v6131_v23  ;;  %v3511_v23 = vsel %vm6783_vm10, %v3491_v41, 0.0  ;;  %v3399_v60 = vmul.f32 %v6279_v44, %v6279_v44  ;;  %vm6802_vm10 = vmmov %vm6748_vm0 }
 0x437   : > { %v3430_v61 = vsel %vm6790_vm15, %v3400_v32, 0.0  ;;  %v562_v52 = vsub.f32 %v5970_v50, %v488_v27  ;;  %v3526_v38 = vsel %vm6797_vm7, %v6285_v53, 0.0 }
 0x438   : > { %v2965_v14 = vsel %vm6782_vm9, %v2935_v63, 0.0  ;;  %v3427_v48 = vsel %vm6792_vm12, %v3399_v60, 0.0  ;;  %v3523_v7 = vsel %vm6798_vm8, %v6289_v2, 0.0  ;;  %vm6800_vm9 = vmmov %vm6748_vm0 }
 0x439   : > { %3506 = vadd.xlane.f32.xlu1 %v3505_v26  ;;  %3056 = vadd.xlane.f32.xlu0 %v3055_v47  ;;  %v3520_v26 = vsel %vm6793_vm6, %v6269_v18, 0.0  ;;  %v602_v47 = vsel %vm6794_vm3, %v577_v35, 0.0 }
 0x43d   : > { %3419 = vadd.xlane.f32.xlu1 %v3418_v0  ;;  %2957 = vadd.xlane.f32.xlu0 %v2956_v6  ;;  %v578_v0 = vmul.f32 %v562_v52, %v562_v52 }
 0x43f   : > { %v605_v18 = vsel %vm6796_vm14, %v578_v0, 0.0 }
 0x441   : > { %3515 = vadd.xlane.f32.xlu1 %v3514_v54  ;;  %3053 = vadd.xlane.f32.xlu0 %v3052_v20  ;;  %v489_v54 = vld [vmem:[%s6023_s12 + $0x30] sm:$0xff] }
 0x445   : > { %3416 = vadd.xlane.f32.xlu1 %v3415_v43  ;;  %2966 = vadd.xlane.f32.xlu0 %v2965_v14  ;;  %v563_v14 = vsub.f32 %v5996_v1, %v489_v54 }
 0x449   : > { %3512 = vadd.xlane.f32.xlu1 %v3511_v23  ;;  %2963 = vadd.xlane.f32.xlu0 %v2962_v40  ;;  %v490_v40 = vld [vmem:[%s6023_s12 + $0x38] sm:$0xff]  ;;  %s6513_s12 = scalar_lea.hbm %s6568_s8, %s4054_s23 }
 0x44d   : > { %3425 = vadd.xlane.f32.xlu1 %v3424_v56  ;;  %3509 = vadd.xlane.f32.xlu0 %v3508_v29 }
 0x44e   : > { %v4324_v25 = vpop.f32.mrb[48].mxu1 }
 0x44f   : > { %v2873_v39 = vpop.f32.mrb[49].mxu1 }
 0x450   : > { %v579_v39 = vmul.f32 %v563_v14, %v563_v14 }
 0x451   : > { %v2019_v41 = vpop.xlane.xlu1 %2018  ;;  %3422 = vadd.xlane.f32.xlu1 %v3421_v8  ;;  %3410 = vadd.xlane.f32.xlu0 %v3409_v9  ;;  %v564_v8 = vsub.f32 %v6040_v58, %v490_v40  ;;  %v6801_v58 = vld [vmem:[#allocation39_spill] sm:$0xff] }
 0x452   : > { %v2063_v19 = vadd.f32 1e-12, %v2019_v41  ;;  %v4327_v30 = vpop.f32.mrb[50].mxu1  ;;  %v2016_v11 = vpop.xlane.xlu0 %2015  ;;  %v6799_v41 = vld [vmem:[#allocation40_spill] sm:$0xff] }
 0x453   : > { %v2883_v12 = vpop.f32.mrb[51].mxu1  ;;  %v2062_v45 = vadd.f32 1e-12, %v2016_v11  ;;  %v580_v30 = vmul.f32 %v564_v8, %v564_v8 }
 0x454   : > { %4426 = vrsqrt.f32 %v2063_v19  ;;  %v608_v19 = vsel %vm6800_vm9, %v579_v39, 0.0 }
 0x455   : > { %v2025_v62 = vpop.xlane.xlu1 %2024  ;;  %3518 = vadd.xlane.f32.xlu1 %v3517_v36  ;;  %2597 = vadd.xlane.f32.xlu0 %v2596_v4  ;;  %4428 = vrsqrt.f32 %v2062_v45  ;;  %v611_v2 = vsel %vm6802_vm10, %v580_v30, 0.0  ;;  %v6803_v45 = vld [vmem:[#allocation41_spill] sm:$0xff] }
 0x456   : > { %v4330_v49 = vpop.f32.mrb[52].mxu1  ;;  %v2022_v31 = vpop.xlane.xlu0 %2021  ;;  %v2065_v16 = vadd.f32 1e-12, %v2025_v62 }
 0x457   : > { %v2893_v57 = vpop.f32.mrb[53].mxu1  ;;  %v2064_v6 = vadd.f32 1e-12, %v2022_v31 }
 0x459   : > { %3431 = vadd.xlane.f32.xlu1 %v3430_v61  ;;  %1033 = vmin.xlane.f32.xlu0 %v6791_v33  ;;  %4430 = vrsqrt.f32 %v2064_v6 }
 0x45a   : > { %v2028_v17 = vpop.xlane.xlu1 %2027  ;;  %v4333_v24 = vpop.f32.mrb[54].mxu1  ;;  %4432 = vrsqrt.f32 %v2065_v16 }
 0x45b   : > { %v2031_v46 = vpop.xlane.xlu0 %2030  ;;  %v2903_v37 = vpop.f32.mrb[55].mxu1  ;;  %v2066_v1 = vadd.f32 1e-12, %v2028_v17 }
 0x45c   : > { %v2067_v11 = vadd.f32 1e-12, %v2031_v46 }
 0x45d   : > { %3428 = vadd.xlane.f32.xlu1 %v3427_v48  ;;  %3521 = vadd.xlane.f32.xlu0 %v3520_v26  ;;  %4434 = vrsqrt.f32 %v2066_v1 }
 0x45e   : > { %v2115_v44 = vpop.xlane.xlu1 %2114  ;;  %v4427_v50 = vpop.eup %4426  ;;  %4436 = vrsqrt.f32 %v2067_v11 }
 0x45f   : > { %v2159_v63 = vand.u32 2147483647, %v2115_v44  ;;  %v2034_v22 = vpop.xlane.xlu0 %2033  ;;  %v4429_v56 = vpop.eup %4428 }
 0x460   : > { %v2068_v62 = vadd.f32 1e-12, %v2034_v22 }
 0x461   : > { %v6333_v20 = vmul.f32 %v4427_v50, %v2159_v63  ;;  %603 = vadd.xlane.f32.xlu1 %v602_v47  ;;  %1035 = vmin.xlane.f32.xlu0 %v6795_v55 }
 0x462   : > { %v6336_v43 = vpop.xlane.xlu1 %594  ;;  %4438 = vrsqrt.f32 %v2068_v62 }
 0x463   : > { %v2112_v23 = vpop.xlane.xlu0 %2111  ;;  %v4431_v32 = vpop.eup %4430  ;;  %v656_v50 = vsel %vm654_vm11, %v6336_v43, 0.0 }
 0x464   : > { %v2158_v10 = vand.u32 2147483647, %v2112_v23  ;;  %v4433_v42 = vpop.eup %4432 }
 0x465   : > { %3527 = vadd.xlane.f32.xlu1 %v3526_v38  ;;  %606 = vadd.xlane.f32.xlu0 %v605_v18 }
 0x466   : > { %v6343_v29 = vmul.f32 %v4429_v56, %v2158_v10  ;;  %v6345_v25 = vpop.xlane.xlu1 %1029  ;;  %v6804_v56 = vld [vmem:[#allocation5_spill] sm:$0xff] }
 0x467   : > { %v2037_v9 = vpop.xlane.xlu0 %2036  ;;  %v4435_v33 = vpop.eup %4434  ;;  %v1741_v39 = vmul.f32 0.0, %v6804_v56  ;;  %v6809_v56 = vld [vmem:[#allocation13_spill] sm:$0xff] }
 0x468   : > { %v4437_v46 = vpop.eup %4436  ;;  %v2069_v26 = vadd.f32 1e-12, %v2037_v9 }
 0x469   : > { %1037 = vmin.xlane.f32.xlu1 %v6799_v41  ;;  %3524 = vadd.xlane.f32.xlu0 %v3523_v7  ;;  %v2206_v41 = vadd.f32 %v6343_v29, %v1741_v39 }
 0x46a   : > { %v6351_v53 = vpop.xlane.xlu1 %1031  ;;  %4440 = vrsqrt.f32 %v2069_v26 }
 0x46b   : > { %v2118_v12 = vpop.xlane.xlu0 %2117 }
 0x46c   : > { %v2160_v59 = vand.u32 2147483647, %v2118_v12  ;;  %v4439_v0 = vpop.eup %4438 }
 0x46d   : > { %1039 = vmin.xlane.f32.xlu1 %v6801_v58  ;;  %609 = vadd.xlane.f32.xlu0 %v608_v19 }
 0x46e   : > { %v6355_v36 = vmul.f32 %v4431_v32, %v2160_v59  ;;  %v3171_v4 = vpop.xlane.xlu1 %3170 }
 0x46f   : > { %v2121_v49 = vpop.xlane.xlu0 %2120  ;;  %vm3193_vm2 = vcmp.eq.f32.partialorder %v6067_v5, %v3171_v4  ;;  %v6806_v5 = vld [vmem:[#allocation10_spill] sm:$0xff] }
 0x470   : > { %v2161_v31 = vand.u32 2147483647, %v2121_v49  ;;  %v1746_v4 = vmul.f32 0.0, %v6806_v5 }
 0x471   : > { %1041 = vmin.xlane.f32.xlu1 %v6803_v45  ;;  %612 = vadd.xlane.f32.xlu0 %v611_v2  ;;  %v6805_v2 = vmov 1.0  }
 0x472   : > { %v6359_v57 = vmul.f32 %v4433_v42, %v2161_v31  ;;  %v3175_v27 = vpop.xlane.xlu1 %3174 }
 0x473   : > { %v2124_v60 = vpop.xlane.xlu0 %2123  ;;  %vm3195_vm13 = vcmp.eq.f32.partialorder %v6091_v34, %v3175_v27 }
 0x474   : > { %v2162_v61 = vand.u32 2147483647, %v2124_v60  ;;  %v4441_v38 = vpop.eup %4440 }
 0x476   : > { %v6361_v17 = vmul.f32 %v4435_v33, %v2162_v61  ;;  %v3179_v24 = vpop.xlane.xlu1 %3178 }
 0x477   : > { %v2127_v35 = vpop.xlane.xlu0 %2126  ;;  %vm3197_vm4 = vcmp.eq.f32.partialorder %v6114_v13, %v3179_v24  ;;  %v6807_v24 = vld [vmem:[#allocation11_spill] sm:$0xff] }
 0x478   : > { %v2163_v52 = vand.u32 2147483647, %v2127_v35  ;;  %v1745_v35 = vmul.f32 0.0, %v6807_v24 }
 0x47a   : > { %v2179_v37 = vmul.f32 %v4437_v46, %v2163_v52  ;;  %v6363_v48 = vpop.xlane.xlu1 %3182 }
 0x47b   : > { %v2130_v44 = vpop.xlane.xlu0 %2129  ;;  %vm3199_vm12 = vcmp.eq.f32.partialorder %v6139_v15, %v6363_v48  ;;  %v2210_v15 = vadd.f32 %v6361_v17, %v1745_v35  ;;  %v1747_v17 = vmul.f32 0.0, %v6809_v56 }
 0x47c   : > { %v2164_v47 = vand.u32 2147483647, %v2130_v44  ;;  %v2211_v27 = vadd.f32 %v2179_v37, %v1746_v4  ;;  %v6811_v4 = vld [vmem:[#allocation6_spill] sm:$0xff] }
 0x47e   : > { %v6365_v6 = vmul.f32 %v4439_v0, %v2164_v47  ;;  %v2481_v63 = vpop.xlane.xlu1 %2480 }
 0x47f   : > { %v2527_v22 = vadd.f32 1e-12, %v2481_v63  ;;  %v592_v54 = vpop.xlane.xlu0 %591 }
 0x480   : > { %v655_v55 = vsel %vm654_vm11, %v592_v54, 0.0  ;;  %v6808_v54 = vld [vmem:[#allocation7_spill] sm:$0xff] }
 0x481   : > { %4442 = vrsqrt.f32 %v2527_v22  ;;  %v657_v18 = vadd.f32 %v656_v50, %v655_v55  ;;  %v1742_v50 = vmul.f32 0.0, %v6808_v54 }
 0x482   : > { %v2577_v14 = vpop.xlane.xlu1 %2576 }
 0x483   : > { %v6370_v16 = vpop.xlane.xlu0 %1027  ;;  %v2623_v8 = vand.u32 2147483647, %v2577_v14 }
 0x486   : > { %v6372_v23 = vpop.xlane.xlu1 %2585 }
 0x487   : > { %v2133_v40 = vpop.xlane.xlu0 %2132 }
 0x488   : > { %v2165_v10 = vand.u32 2147483647, %v2133_v40 }
 0x48a   : > { %v6375_v1 = vmul.f32 %v4441_v38, %v2165_v10  ;;  %v6377_v9 = vpop.xlane.xlu1 %2582  ;;  %v2207_v10 = vadd.f32 %v6333_v20, %v1742_v50  ;;  %v2626_v20 = vand.u32 2147483647, %v6372_v23 }
 0x48b   : > { %v4443_v43 = vpop.eup %4442  ;;  %v598_v7 = vpop.xlane.xlu0 %597 }
 0x48c   : > { %v2639_v19 = vmul.f32 %v4443_v43, %v2623_v8  ;;  %v658_v30 = vsel %vm654_vm11, %v598_v7, 0.0 }
 0x48d   : > { %v6381_v11 = vadd.f32 %v658_v30, %v657_v18 }
 0x48e   : > { %v6383_v12 = vadd.f32 %v2639_v19, %v2206_v41  ;;  %v2496_v59 = vpop.xlane.xlu1 %2495  ;;  %v2212_v19 = vadd.f32 %v6365_v6, %v1747_v17  ;;  %v2625_v6 = vand.u32 2147483647, %v6377_v9 }
 0x48f   : > { %v2532_v32 = vadd.f32 1e-12, %v2496_v59  ;;  %v3169_v58 = vpop.xlane.xlu0 %3168 }
 0x490   : > { %vm3192_vm0 = vcmp.eq.f32.partialorder %v6176_v28, %v3169_v58 }
 0x491   : > { %4444 = vrsqrt.f32 %v2532_v32  ;;  %4348 = vmatprep.mubr.msk.f32.mxu0 %vm3192_vm0, %v6805_v2 }
 0x492   : > { %4349 = vmatmul.mubr.msk.f32.gmra.mrb[48].mxu0 %vm3193_vm2, %v6805_v2  ;;  %v2592_v29 = vpop.xlane.xlu1 %2591 }
 0x493   : > { %v3173_v62 = vpop.xlane.xlu0 %3172  ;;  %v2628_v42 = vand.u32 2147483647, %v2592_v29 }
 0x494   : > { %vm3194_vm1 = vcmp.eq.f32.partialorder %v6185_v3, %v3173_v62 }
 0x495   : > { %4351 = vmatprep.mubr.msk.f32.mxu0 %vm3194_vm1, %v6805_v2 }
 0x496   : > { %4352 = vmatmul.mubr.msk.f32.gmra.mrb[50].mxu0 %vm3195_vm13, %v6805_v2  ;;  %v2493_v49 = vpop.xlane.xlu1 %2492 }
 0x497   : > { %v2531_v31 = vadd.f32 1e-12, %v2493_v49  ;;  %v3177_v28 = vpop.xlane.xlu0 %3176 }
 0x498   : > { %vm3196_vm5 = vcmp.eq.f32.partialorder %v6198_v21, %v3177_v28 }
 0x499   : > { %4446 = vrsqrt.f32 %v2531_v31  ;;  %4354 = vmatprep.mubr.msk.f32.mxu0 %vm3196_vm5, %v6805_v2 }
 0x49a   : > { %4355 = vmatmul.mubr.msk.f32.gmra.mrb[52].mxu0 %vm3197_vm4, %v6805_v2  ;;  %v2589_v34 = vpop.xlane.xlu1 %2588 }
 0x49b   : > { %v4445_v3 = vpop.eup %4444  ;;  %v3181_v45 = vpop.xlane.xlu0 %3180  ;;  %v2627_v52 = vand.u32 2147483647, %v2589_v34 }
 0x49c   : > { %v2644_v60 = vmul.f32 %v4445_v3, %v2628_v42  ;;  %vm3198_vm15 = vcmp.eq.f32.partialorder %v6210_v51, %v3181_v45  ;;  %v1743_v42 = vmul.f32 0.0, %v6811_v4 }
 0x49d   : > { %4357 = vmatprep.mubr.msk.f32.mxu0 %vm3198_vm15, %v6805_v2 }
 0x49e   : > { %v6402_v13 = vadd.f32 %v2644_v60, %v2211_v27  ;;  %4358 = vmatmul.mubr.msk.f32.gmra.mrb[54].mxu0 %vm3199_vm12, %v6805_v2  ;;  %v6405_v21 = vpop.xlane.xlu1 %2501  ;;  %v6810_v2 = vld [vmem:[#allocation8_spill] sm:$0xff]  ;;  %v2208_v27 = vadd.f32 %v6355_v36, %v1743_v42 }
 0x49f   : > { %v2484_v61 = vpop.xlane.xlu0 %2483  ;;  %v1744_v29 = vmul.f32 0.0, %v6810_v2 }
 0x4a0   : > { %v2528_v33 = vadd.f32 1e-12, %v2484_v61 }
 0x4a1   : > { %v2209_v31 = vadd.f32 %v6359_v57, %v1744_v29 }
 0x4a2   : > { %4448 = vrsqrt.f32 %v2528_v33  ;;  %v2499_v46 = vpop.xlane.xlu1 %2498 }
 0x4a3   : > { %v4447_v37 = vpop.eup %4446  ;;  %v2533_v51 = vadd.f32 1e-12, %v2499_v46  ;;  %v2580_v26 = vpop.xlane.xlu0 %2579 }
 0x4a4   : > { %v2643_v48 = vmul.f32 %v4447_v37, %v2627_v52  ;;  %v2624_v55 = vand.u32 2147483647, %v2580_v26 }
 0x4a5   : > { %4450 = vrsqrt.f32 %v2533_v51 }
 0x4a6   : > { %v6409_v44 = vadd.f32 %v2643_v48, %v2210_v15  ;;  %v2595_v47 = vpop.xlane.xlu1 %2594 }
 0x4a7   : > { %v2490_v0 = vpop.xlane.xlu0 %2489  ;;  %v2629_v39 = vand.u32 2147483647, %v2595_v47 }
 0x4a8   : > { %v2530_v63 = vadd.f32 1e-12, %v2490_v0 }
 0x4aa   : > { %4452 = vrsqrt.f32 %v2530_v63  ;;  %v3045_v22 = vpop.xlane.xlu1 %3044 }
 0x4ab   : > { %v2487_v18 = vpop.xlane.xlu0 %2486  ;;  %v3089_v23 = vand.u32 2147483647, %v3045_v22 }
 0x4ac   : > { %v4449_v14 = vpop.eup %4448  ;;  %v2529_v40 = vadd.f32 1e-12, %v2487_v18 }
 0x4ad   : > { %v2640_v38 = vmul.f32 %v4449_v14, %v2624_v55  ;;  %v2534_v55 = vadd.f32 1e-12, %v6405_v21 }
 0x4ae   : > { %4454 = vrsqrt.f32 %v2529_v40  ;;  %v2946_v8 = vpop.xlane.xlu1 %2945 }
 0x4af   : > { %v4451_v43 = vpop.eup %4450  ;;  %v2672_v7 = vadd.f32 %v2640_v38, %v2207_v10  ;;  %v2949_v41 = vpop.xlane.xlu0 %2948  ;;  %v2992_v54 = vadd.f32 1e-12, %v2946_v8 }
 0x4b0   : > { %v2645_v30 = vmul.f32 %v4451_v43, %v2629_v39  ;;  %v2993_v59 = vadd.f32 1e-12, %v2949_v41 }
 0x4b2   : > { %v6415_v32 = vadd.f32 %v2645_v30, %v2212_v19  ;;  %4456 = vrsqrt.f32 %v2993_v59  ;;  %v2952_v58 = vpop.xlane.xlu1 %2951 }
 0x4b3   : > { %v6419_v62 = vpop.xlane.xlu0 %3041  ;;  %v2994_v50 = vadd.f32 1e-12, %v2952_v58  ;;  %4458 = vrsqrt.f32 %v2992_v54 }
 0x4b4   : > { %v4453_v49 = vpop.eup %4452 }
 0x4b5   : > { %v2642_v28 = vmul.f32 %v4453_v49, %v2626_v20  ;;  %4460 = vrsqrt.f32 %v2994_v50  ;;  %v6812_v49 = vld [vmem:[#allocation12_spill] sm:$0xff] }
 0x4b6   : > { %v3414_v5 = vpop.xlane.xlu1 %3413  ;;  %4462 = vrsqrt.f32 %v2534_v55  ;;  %v1097_v55 = vsel %vm654_vm11, %v6370_v16, 0.0 }
 0x4b7   : > { %v2955_v34 = vpop.xlane.xlu0 %2954  ;;  %v6424_v3 = vadd.f32 %v2642_v28, %v2209_v31  ;;  %v3458_v14 = vadd.f32 1e-12, %v3414_v5  ;;  %v1748_v31 = vmul.f32 0.0, %v6812_v49  ;;  %v3088_v28 = vand.u32 2147483647, %v6419_v62 }
 0x4b8   : > { %v4455_v45 = vpop.eup %4454  ;;  %v2995_v10 = vadd.f32 1e-12, %v2955_v34  ;;  %v1100_v49 = vsel %vm654_vm11, %v6351_v53, 0.0 }
 0x4b9   : > { %v2641_v60 = vmul.f32 %v4455_v45, %v2625_v6  ;;  %4464 = vrsqrt.f32 %v3458_v14 }
 0x4ba   : > { %v6427_v61 = vpop.xlane.xlu1 %3059  ;;  %4466 = vrsqrt.f32 %v2995_v10 }
 0x4bb   : > { %v6429_v33 = vpop.xlane.xlu0 %3050  ;;  %v6431_v24 = vadd.f32 %v2641_v60, %v2208_v27 }
 0x4bc   : > { %v4457_v57 = vpop.eup %4456 }
 0x4bd   : > { %v3105_v35 = vmul.f32 %v4457_v57, %v3089_v23  ;;  %v4459_v59 = vpop.eup %4458  ;;  %v2213_v23 = vadd.f32 %v6375_v1, %v1748_v31 }
 0x4be   : > { %v6433_v52 = vpop.xlane.xlu1 %600  ;;  %v3104_v27 = vmul.f32 %v4459_v59, %v3088_v28 }
 0x4bf   : > { %v3048_v46 = vpop.xlane.xlu0 %3047  ;;  %v6435_v9 = vadd.f32 %v3105_v35, %v2672_v7  ;;  %v4461_v20 = vpop.eup %4460 }
 0x4c0   : > { %v3090_v58 = vand.u32 2147483647, %v3048_v46  ;;  %v4463_v4 = vpop.eup %4462  ;;  %v3136_v1 = vadd.f32 %v3104_v27, %v6383_v12 }
 0x4c2   : > { %v6437_v37 = vpop.xlane.xlu1 %3062  ;;  %v3106_v57 = vmul.f32 %v4461_v20, %v3090_v58 }
 0x4c3   : > { %v2961_v51 = vpop.xlane.xlu0 %2960  ;;  %v4465_v45 = vpop.eup %4464 }
 0x4c4   : > { %v2997_v7 = vadd.f32 1e-12, %v2961_v51  ;;  %v4467_v60 = vpop.eup %4466 }
 0x4c6   : > { %v6439_v26 = vpop.xlane.xlu1 %3506 }
 0x4c7   : > { %v6441_v36 = vpop.xlane.xlu0 %3056 }
 0x4c8   : > { %v3093_v12 = vand.u32 2147483647, %v6441_v36 }
 0x4ca   : > { %v3420_v15 = vpop.xlane.xlu1 %3419 }
 0x4cb   : > { %v2958_v48 = vpop.xlane.xlu0 %2957  ;;  %v3460_v38 = vadd.f32 1e-12, %v3420_v15 }
 0x4cc   : > { %v2996_v39 = vadd.f32 1e-12, %v2958_v48 }
 0x4cd   : > { %4468 = vrsqrt.f32 %v3460_v38  ;;  %v3138_v38 = vadd.f32 %v3106_v57, %v6431_v24 }
 0x4ce   : > { %v6443_v47 = vpop.xlane.xlu1 %3515 }
 0x4cf   : > { %v6445_v0 = vpop.xlane.xlu0 %3053 }
 0x4d2   : > { %v3417_v63 = vpop.xlane.xlu1 %3416 }
 0x4d3   : > { %v2967_v22 = vpop.xlane.xlu0 %2966  ;;  %v3459_v56 = vadd.f32 1e-12, %v3417_v63  ;;  %v3091_v63 = vand.u32 2147483647, %v6429_v33  ;;  %v3092_v33 = vand.u32 2147483647, %v6445_v0 }
 0x4d4   : > { %v2999_v42 = vadd.f32 1e-12, %v2967_v22  ;;  %v1098_v0 = vsel %vm654_vm11, %v6345_v25, 0.0 }
 0x4d5   : > { %4470 = vrsqrt.f32 %v3459_v56  ;;  %v3107_v10 = vmul.f32 %v4467_v60, %v3091_v63  ;;  %v3556_v56 = vand.u32 2147483647, %v6443_v47 }
 0x4d6   : > { %v6448_v18 = vpop.xlane.xlu1 %3512  ;;  %4472 = vrsqrt.f32 %v2996_v39 }
 0x4d7   : > { %v2964_v40 = vpop.xlane.xlu0 %2963  ;;  %4474 = vrsqrt.f32 %v2997_v7  ;;  %v4469_v51 = vpop.eup %4468  ;;  %v3555_v14 = vand.u32 2147483647, %v6448_v18 }
 0x4d8   : > { %v2998_v30 = vadd.f32 1e-12, %v2964_v40  ;;  %v3572_v18 = vmul.f32 %v4469_v51, %v3556_v56 }
 0x4da   : > { %v3426_v17 = vpop.xlane.xlu1 %3425 }
 0x4db   : > { %v3510_v43 = vpop.xlane.xlu0 %3509  ;;  %v3462_v2 = vadd.f32 1e-12, %v3426_v17 }
 0x4dc   : > { %v3554_v6 = vand.u32 2147483647, %v3510_v43  ;;  %v3553_v43 = vand.u32 2147483647, %v6439_v26  ;;  %v3139_v26 = vadd.f32 %v3107_v10, %v6424_v3 }
 0x4de   : > { %v3423_v8 = vpop.xlane.xlu1 %3422  ;;  %v3570_v22 = vmul.f32 %v4465_v45, %v3554_v6  ;;  %v3588_v6 = vadd.f32 %v3572_v18, %v3139_v26 }
 0x4df   : > { %v3461_v21 = vadd.f32 1e-12, %v3423_v8  ;;  %v3411_v41 = vpop.xlane.xlu0 %3410  ;;  %v4471_v62 = vpop.eup %4470 }
 0x4e0   : > { %v3457_v19 = vadd.f32 1e-12, %v3411_v41  ;;  %v4473_v50 = vpop.eup %4472  ;;  %v3571_v7 = vmul.f32 %v4471_v62, %v3555_v14 }
 0x4e1   : > { %4476 = vrsqrt.f32 %v3461_v21  ;;  %v4475_v40 = vpop.eup %4474 }
 0x4e2   : > { %4478 = vrsqrt.f32 %v3457_v19  ;;  %v3519_v29 = vpop.xlane.xlu1 %3518  ;;  %v3108_v19 = vmul.f32 %v4473_v50, %v3092_v33  ;;  %v3109_v58 = vmul.f32 %v4475_v40, %v3093_v12  ;;  %v3587_v36 = vadd.f32 %v3571_v7, %v3138_v38 }
 0x4e3   : > { %v2598_v5 = vpop.xlane.xlu0 %2597  ;;  %4480 = vrsqrt.f32 %v2998_v30  ;;  %v3586_v30 = vadd.f32 %v3570_v22, %v6435_v9  ;;  %v3557_v59 = vand.u32 2147483647, %v3519_v29  ;;  %v3094_v29 = vand.u32 2147483647, %v6427_v61 }
 0x4e4   : > { %v2630_v34 = vand.u32 2147483647, %v2598_v5  ;;  %4482 = vrsqrt.f32 %v3462_v2  ;;  %v3140_v3 = vadd.f32 %v3108_v19, %v6409_v44  ;;  %v3141_v57 = vadd.f32 %v3109_v58, %v6402_v13 }
 0x4e5   : > { %4484 = vrsqrt.f32 %v2999_v42  ;;  %v660_v42 = vsel %vm654_vm11, %v6433_v52, 0.0  ;;  %v3620_v61 = vsel %vm654_vm11, %v3587_v36, 0.0  ;;  %v3622_v13 = vsel %vm654_vm11, %v3588_v6, 0.0 }
 0x4e6   : > { %v2646_v35 = vmul.f32 %v4463_v4, %v2630_v34  ;;  %v3432_v46 = vpop.xlane.xlu1 %3431  ;;  %v1099_v4 = vadd.f32 %v1098_v0, %v1097_v55  ;;  %v3618_v34 = vsel %vm654_vm11, %v3586_v30, 0.0 }
 0x4e7   : > { %v3464_v15 = vadd.f32 1e-12, %v3432_v46  ;;  %v6453_v48 = vpop.xlane.xlu0 %1033 }
 0x4e8   : > { %v6456_v54 = vadd.f32 %v2646_v35, %v2213_v23  ;;  %v3095_v23 = vand.u32 2147483647, %v6437_v37  ;;  %v1102_v52 = vsel %vm654_vm11, %v6453_v48, 0.0  ;;  %v1101_v22 = vadd.f32 %v1100_v49, %v1099_v4 }
 0x4e9   : > { %4486 = vrsqrt.f32 %v3464_v15  ;;  %v661_v37 = vadd.f32 %v660_v42, %v6381_v11 }
 0x4ea   : > { %v3429_v17 = vpop.xlane.xlu1 %3428  ;;  %v1103_v10 = vadd.f32 %v1102_v52, %v1101_v22 }
 0x4eb   : > { %v4477_v39 = vpop.eup %4476  ;;  %v3463_v8 = vadd.f32 1e-12, %v3429_v17  ;;  %v3522_v21 = vpop.xlane.xlu0 %3521 }
 0x4ec   : > { %v4479_v41 = vpop.eup %4478  ;;  %v3558_v47 = vand.u32 2147483647, %v3522_v21  ;;  %v3573_v28 = vmul.f32 %v4477_v39, %v3557_v59 }
 0x4ed   : > { %v3569_v24 = vmul.f32 %v4479_v41, %v3553_v43  ;;  %4488 = vrsqrt.f32 %v3463_v8  ;;  %v4481_v20 = vpop.eup %4480 }
 0x4ee   : > { %v604_v2 = vpop.xlane.xlu1 %603  ;;  %v4483_v9 = vpop.eup %4482  ;;  %v3110_v51 = vmul.f32 %v4481_v20, %v3094_v29  ;;  %v3589_v15 = vadd.f32 %v3573_v28, %v3140_v3 }
 0x4ef   : > { %v3585_v31 = vadd.f32 %v3569_v24, %v3136_v1  ;;  %v1036_v5 = vpop.xlane.xlu0 %1035  ;;  %v3574_v27 = vmul.f32 %v4483_v9, %v3558_v47  ;;  %v4485_v60 = vpop.eup %4484  ;;  %v662_v38 = vsel %vm654_vm11, %v604_v2, 0.0 }
 0x4f0   : > { %v1075_v44 = vmax.f32 %v6370_v16, %v1036_v5  ;;  %v3111_v14 = vmul.f32 %v4485_v60, %v3095_v23  ;;  %v3142_v33 = vadd.f32 %v3110_v51, %v6415_v32  ;;  %v3624_v16 = vsel %vm654_vm11, %v3589_v15, 0.0 }
 0x4f1   : > { %v3617_v45 = vsel %vm654_vm11, %v3585_v31, 0.0  ;;  %v3590_v1 = vadd.f32 %v3574_v27, %v3141_v57  ;;  %v1104_v43 = vsel %vm654_vm11, %v1036_v5, 0.0  ;;  %v663_v19 = vadd.f32 %v662_v38, %v661_v37 }
 0x4f2   : > { %v3619_v35 = vadd.f32 %v3618_v34, %v3617_v45  ;;  %v3528_v46 = vpop.xlane.xlu1 %3527  ;;  %v1079_v39 = vmax.f32 %v1075_v44, 0.0  ;;  %v3143_v21 = vadd.f32 %v3111_v14, %v6456_v54  ;;  %v1105_v59 = vadd.f32 %v1104_v43, %v1103_v10 }
 0x4f3   : > { %v607_v62 = vpop.xlane.xlu0 %606  ;;  %v3560_v50 = vand.u32 2147483647, %v3528_v46  ;;  %v4487_v55 = vpop.eup %4486  ;;  %v3626_v18 = vsel %vm654_vm11, %v3590_v1, 0.0 }
 0x4f4   : > { %v3621_v63 = vadd.f32 %v3620_v61, %v3619_v35  ;;  %v664_v47 = vsel %vm654_vm11, %v607_v62, 0.0  ;;  %v1083_v58 = vmax.f32 %v1079_v39, 0.0 }
 0x4f5   : > { %v3576_v41 = vmul.f32 %v4487_v55, %v3560_v50  ;;  %v665_v5 = vadd.f32 %v664_v47, %v663_v19 }
 0x4f6   : > { %v3623_v40 = vadd.f32 %v3622_v13, %v3621_v63  ;;  %v1038_v56 = vpop.xlane.xlu1 %1037 }
 0x4f7   : > { %v4489_v17 = vpop.eup %4488  ;;  %v1076_v7 = vmax.f32 %v6345_v25, %v1038_v56  ;;  %v3525_v11 = vpop.xlane.xlu0 %3524  ;;  %v1106_v32 = vsel %vm654_vm11, %v1038_v56, 0.0  ;;  %v3592_v49 = vadd.f32 %v3576_v41, %v3143_v21 }
 0x4f8   : > { %v3625_v8 = vadd.f32 %v3624_v16, %v3623_v40  ;;  %v3559_v12 = vand.u32 2147483647, %v3525_v11  ;;  %v1107_v36 = vadd.f32 %v1106_v32, %v1105_v59 }
 0x4f9   : > { %v1080_v30 = vmax.f32 %v1076_v7, 0.0  ;;  %v3630_v57 = vsel %vm654_vm11, %v3592_v49, 0.0 }
 0x4fa   : > { %v3627_v24 = vadd.f32 %v3626_v18, %v3625_v8  ;;  %v3575_v0 = vmul.f32 %v4489_v17, %v3559_v12  ;;  %v1040_v26 = vpop.xlane.xlu1 %1039 }
 0x4fb   : > { %v1084_v25 = vmax.f32 %v1080_v30, 0.0  ;;  %v1077_v2 = vmax.f32 %v6351_v53, %v1040_v26  ;;  %v1108_v54 = vsel %vm654_vm11, %v1040_v26, 0.0  ;;  %v610_v20 = vpop.xlane.xlu0 %609 }
 0x4fc   : > { %v3591_v31 = vadd.f32 %v3575_v0, %v3142_v33  ;;  %v666_v28 = vsel %vm654_vm11, %v610_v20, 0.0  ;;  %v1109_v42 = vadd.f32 %v1108_v54, %v1107_v36 }
 0x4fd   : > { %v1087_v9 = vmax.f32 %v1083_v58, %v1084_v25  ;;  %v1081_v29 = vmax.f32 %v1077_v2, 0.0  ;;  %v667_v3 = vadd.f32 %v666_v28, %v665_v5  ;;  %v6813_v25 = vld [vmem:[#allocation9_spill] sm:$0xff] }
 0x4fe   : > { %v3628_v4 = vsel %vm654_vm11, %v3591_v31, 0.0  ;;  %v1042_v6 = vpop.xlane.xlu1 %1041  ;;  %vm3660_vm6 = vcmp.eq.s32.totalorder %v6813_v25, 3  ;;  %vm3659_vm3 = vcmp.eq.s32.totalorder %v6813_v25, 2  ;;  %vm3658_vm14 = vcmp.eq.s32.totalorder %v6813_v25, 1 }
 0x4ff   : > { %v1078_v34 = vmax.f32 %v6453_v48, %v1042_v6  ;;  %v1110_v53 = vsel %vm654_vm11, %v1042_v6, 0.0  ;;  %v613_v45 = vpop.xlane.xlu0 %612  ;;  %v3629_v27 = vadd.f32 %v3628_v4, %v3627_v24  ;;  %v1085_v61 = vmax.f32 %v1081_v29, 0.0 }
 0x500   : > { %v1111_v60 = vadd.f32 %v1110_v53, %v1109_v42  ;;  %v668_v23 = vsel %vm654_vm11, %v613_v45, 0.0  ;;  %vm3657_vm7 = vcmp.eq.s32.totalorder %v6813_v25, 0 }
 0x501   : > { %v1082_v35 = vmax.f32 %v1078_v34, 0.0  ;;  %v669_v46 = vadd.f32 %v668_v23, %v667_v3  ;;  %v3631_v51 = vadd.f32 %v3630_v57, %v3629_v27 }
 0x502   : > { %1128 = vadd.xlane.f32.xlu1 %v1111_v60 }
 0x503   : > { %v1086_v15 = vmax.f32 %v1082_v35, 0.0  ;;  %686 = vadd.xlane.f32.xlu0 %v669_v46 }
 0x505   : > { %v1088_v52 = vmax.f32 %v1085_v61, %v1086_v15 }
 0x507   : > { %v1089_v44 = vmax.f32 %v1087_v9, %v1088_v52  ;;  %3648 = vadd.xlane.f32.xlu0 %v3631_v51 }
 0x509   : > { %v1090_v1 = vrot.slane %v1089_v44, 4 }
 0x50b   : > { %v1091_v14 = vmax.f32 %v1089_v44, %v1090_v1 }
 0x50d   : > { %v1092_v56 = vrot.slane %v1091_v14, 2 }
 0x50f   : > { %v1093_v7 = vmax.f32 %v1091_v14, %v1092_v56 }
 0x511   : > { %v1094_v18 = vrot.slane %v1093_v7, 1 }
 0x513   : > { %v1095_v0 = vmax.f32 %v1093_v7, %v1094_v18 }
 0x565   : > { %v4350_v48 = vpop.f32.mrb[48].mxu0 }
 0x566   : > { %v3338_v62 = vpop.f32.mrb[49].mxu0 }
 0x569   : > { %v4353_v63 = vpop.f32.mrb[50].mxu0 }
 0x56a   : > { %v3348_v22 = vpop.f32.mrb[51].mxu0 }
 0x56d   : > { %v4356_v50 = vpop.f32.mrb[52].mxu0 }
 0x56e   : > { %v3358_v55 = vpop.f32.mrb[53].mxu0 }
 0x571   : > { %v4359_v37 = vpop.f32.mrb[54].mxu0 }
 0x572   : > { %v3368_v13 = vpop.f32.mrb[55].mxu0 }
 0x58f   : > { %v1129_v40 = vpop.xlane.xlu1 %1128 }
 0x590   : > { %v1130_v10 = vrot.slane %v1129_v40, 4  ;;  %v687_v38 = vpop.xlane.xlu0 %686 }
 0x591   : > { %v688_v33 = vrot.slane %v687_v38, 4 }
 0x592   : > { %v1131_v17 = vadd.f32 %v1130_v10, %v1129_v40 }
 0x593   : > { %v689_v16 = vadd.f32 %v688_v33, %v687_v38 }
 0x594   : > { %v1132_v39 = vrot.slane %v1131_v17, 2  ;;  %v3649_v43 = vpop.xlane.xlu0 %3648 }
 0x595   : > { %v690_v11 = vrot.slane %v689_v16, 2  ;;  %v3650_v8 = vrot.slane %v3649_v43, 4 }
 0x596   : > { %v1133_v21 = vadd.f32 %v1132_v39, %v1131_v17 }
 0x597   : > { %v3651_v41 = vadd.f32 %v3650_v8, %v3649_v43  ;;  %v691_v12 = vadd.f32 %v690_v11, %v689_v16 }
 0x598   : > { %v1134_v19 = vrot.slane %v1133_v21, 1 }
 0x599   : > { %v3652_v30 = vrot.slane %v3651_v41, 2  ;;  %v692_v32 = vrot.slane %v691_v12, 1 }
 0x59a   : > { %v1135_v47 = vadd.f32 %v1134_v19, %v1133_v21 }
 0x59b   : > { %v3653_v24 = vadd.f32 %v3652_v30, %v3651_v41  ;;  %v693_v59 = vadd.f32 %v692_v32, %v691_v12 }
 0x59d   : > { %4362 = vpush %v693_v59  ;;  %v3654_v26 = vrot.slane %v3653_v24, 1 }
 0x59e   : > { %4364 = vpush %v1095_v0 }
 0x59f   : > { %4366 = vpush %v1135_v47  ;;  %v3655_v58 = vadd.f32 %v3654_v26, %v3653_v24 }
 0x5a1   : > { %4368 = vpush %v3655_v58 }
 0x5ce   : > { %s4363_s24 = spop %4362 }
 0x5cf   : > { %s4365_s14 = spop %4364  ;;  %v3667_v31 = vstv %s4363_s24  ;;  %s4580_s24 = smov [#allocation2]  }
 0x5d0   : > { %s4367_s16 = spop %4366  ;;  %v3665_v49 = vstv %s4365_s14  ;;  %s4503_s14 = sshll.u32 %s4580_s24, 4  ;;  %s4504_s14 = int_to_ptr.vmem [resolvable:$false] %s4503_s14 }
 0x5d1   : > { %v3663_v54 = vstv %s4367_s16  ;;  %s4505_s16 = scalar_lea.vmem %s4504_s14, 256  ;;  %p4506_p1 = scmp.lt.s32.totalorder %s6515_s11, %s4504_s14 }
 0x5d2   : > { %s4369_s22 = spop %4368  ;;  %p4507_p2 = scmp.lt.s32.totalorder %s4505_s16, %s4499_s20 }
 0x5d3   : > { %v3661_v2 = vstv %s4369_s22 }
 0x5d4   : > { %v3662_v20 = vsel %vm3660_vm6, %v3661_v2, 0.0  ;;  %p4508_p3 = por %p4507_p2, %p4506_p1 }
 0x5d5   : > { %v3664_v36 = vsel %vm3659_vm3, %v3663_v54, %v3662_v20 }
 0x5d6   : > { %v3666_v28 = vsel %vm3658_vm14, %v3665_v49, %v3664_v36  ;;  %p4509_p5 = pnand %p4508_p3, %p4502_p0 }
 0x5d7   : > { %v3668_v5 = vsel %vm3657_vm7, %v3667_v31, %v3666_v28 }
 0x5d8   : > { %3669 = vst [vmem:[%s423_s26] sm:$0xff] %v3668_v5 }
 0x5d9   : > { %4512 = shalt.err (!%p4509_p5)
}
 0x5da   : > { %s4513_s19 = scalar_lea.hbm %s6513_s12, 128  ;;  %s4517_s26 = scalar_lea.hbm %s6568_s8, 256 }
 0x5db   : > { %p4514_p6 = scmp.ne.s32.totalorder %s6513_s12, %s4513_s19  ;;  %p4518_p10 = scmp.lt.u32.totalorder %s6513_s12, %s6568_s8 }
 0x5dc   : > { %p4519_p11 = scmp.lt.u32.totalorder %s4517_s26, %s4513_s19  ;;  %p4521_p13 = scmp.lt.u32.totalorder %s4513_s19, %s6513_s12 }
 0x5dd   : > { %p4515_p7 = pnand %p4514_p6, %p4666_p4 }
 0x5de   : > { %p4520_p12 = por %p4519_p11, %p4518_p10 }
 0x5df   : > { %p4516_p9 = pneg %p4515_p7 }
 0x5e0   : > { %p4522_p0 = por %p4521_p13, %p4520_p12 }
 0x5e2   : > { %p4523_p1 = pnand %p4522_p0, %p4516_p9 }
 0x5e4   : > { %4526 = shalt.err (!%p4523_p1)
}
 0x5e5   : > { %4370 = dma.vmem_to_hbm [thread:$0]  (%p4666_p4), %s6515_s11, 128, %s6513_s12, %s3671_s30  }
 0x5e6 PF: > { %p4376_p2 = scmp.ge.s32.totalorder %s4577_s10, 2  ;;  %s3697_s20 = sand.u32 1, %s4557_s27  }
 0x5e7   : > { %s3698_s24 = scalar_lea.sflag [#allocation3], %s3697_s20 }
 0x5e8   : > { %p4373_p3 = pnand %p4376_p2, %p4673_p8 }
 0x5ea   : > { %4552 = dma.done.wait (!%p4373_p3), %s3698_s24, 128  }
 0x5eb   : > { %4554 = vsyncadd (!%p4373_p3), %s3698_s24, 4294967168  ;;  %s21_s10 = sadd.s32 1, %s4577_s10   ;;  %s6814_s27 = smov %s4561_s28 }
 0x5ec   : > { %p18_p5 = scmp.ge.s32.totalorder %s21_s10, 4   ;;  %s6815_s28 = smov %s4565_s29 }
 0x5ed   : > { %s6816_s29 = smov %s4679_s18  ;;  %s6817_s30 = smov %s4573_s9 }
 0x5ee   : > { %s6818_s9 = smov %s6820_s13  ;;  %20 = sbr.rel (!%p18_p5) target bundleno = 4 (0x4), region = 108 }
 0x5f5   :  { %3703 = vsyncpa [#allocation3], 1 }
 0x5f6   :  { %3705 = vsyncpa [#allocation3 + $0x1], 1 }

</bundles_post_ra>
